<compile_context>
chip_gen: v7x
topology: tpu7x:2x2x1
jax: 0.10.0
libtpu: 0.0.40
codegen_flags: <defaults>
</compile_context>

<pallas_src>
from functools import lru_cache, partial

import jax
import jax.numpy as jnp
from jax import lax
from jax.experimental import pallas as pl
from jax.experimental.pallas import tpu as pltpu


def _round_up(a, b):
    return (a + b - 1) // b * b


# ----------------------------------------------------------------------------
# One-time feature probe: single-buffered (Buffered(1)) grid-invariant operands.
# Compiles a tiny kernel once; falls back to default double buffering if the
# running JAX/Mosaic rejects it.  (Never touches the real kernel.)
# ----------------------------------------------------------------------------
@lru_cache(maxsize=None)
def _buffered_one_supported():
    try:
        w_spec = pl.BlockSpec((8, 128), lambda i: (0, 0),
                              pipeline_mode=pl.Buffered(1))
    except Exception:
        return False

    def _probe(w_ref, x_ref, o_ref):
        o_ref[...] = x_ref[...] + w_ref[...]

    try:
        f = pl.pallas_call(
            _probe,
            out_shape=jax.ShapeDtypeStruct((16, 128), jnp.float32),
            grid_spec=pltpu.PrefetchScalarGridSpec(
                num_scalar_prefetch=0,
                grid=(2,),
                in_specs=[w_spec, pl.BlockSpec((8, 128), lambda i: (i, 0))],
                out_specs=pl.BlockSpec((8, 128), lambda i: (i, 0)),
            ),
        )
        w = jnp.zeros((8, 128), jnp.float32)
        x = jnp.zeros((16, 128), jnp.float32)
        jax.jit(f).lower(w, x).compile()
        return True
    except Exception:
        return False


def _vmem_limit_bytes():
    # ~3/4 of physical VMEM: <=48 MiB on v7x (64 MiB), 96 MiB on v5e/v6e (128 MiB)
    try:
        cap = int(pltpu.get_tpu_info().vmem_capacity_bytes)
    except Exception:
        cap = 64 * 1024 * 1024
    return int(min(cap * 3 // 4, 96 * 1024 * 1024))


# ----------------------------------------------------------------------------
# Pallas kernel: full ResBlock1 forward for one (batch, time-tile) block.
# ----------------------------------------------------------------------------
def _resblock1_kernel(x_ref, lh_ref, rh_ref, w1_ref, b1_ref, w2_ref, b2_ref,
                      *rest, dilations, K, slope, tile_t, halo, pad_max,
                      t_valid, use_gamma):
    if use_gamma:
        gamma_ref, o_ref, buf_ref = rest
    else:
        gamma_ref = None
        o_ref, buf_ref = rest

    C = x_ref.shape[-1]
    H = halo                       # halo rows each side (multiple of 8)
    PM = pad_max                   # zero margin for per-conv 'same' padding (mult of 8)
    L = tile_t + 2 * H             # halo'd working length (multiple of 8)
    f32 = jnp.float32
    bf16 = jnp.bfloat16

    # zero the conv 'same'-padding margins of the bf16 staging buffer once per tile
    buf_ref[0:PM, :] = jnp.zeros((PM, C), bf16)
    buf_ref[PM + L:PM + L + PM, :] = jnp.zeros((PM, C), bf16)

    # assemble [left halo | centre | right halo] as values (all 8-row aligned)
    x = jnp.concatenate([lh_ref[...], x_ref[...], rh_ref[...]],
                        axis=0).astype(f32)

    # global-position validity mask, built ONCE (JAX does not CSE iotas)
    t = pl.program_id(1)
    pos = t * tile_t - H + lax.broadcasted_iota(jnp.int32, (L, 1), 0)
    valid = (pos >= 0) & (pos < t_valid)

    # zero halo garbage (clamped neighbour fetches at the true sequence ends)
    # and tail padding so the in-buffer zero padding semantics are exact
    x = jnp.where(valid, x, 0.0)

    def dilated_conv(act, w_ref, b_ref, i, d):
        """'same' dilated conv via pad-and-slice: stage the bf16 activation once
        (aligned store), take K statically-offset (L, C) tap slices, sum of K
        MXU dots with f32 accumulation."""
        buf_ref[PM:PM + L, :] = act.astype(bf16)
        p = d * (K - 1) // 2
        y = jnp.dot(buf_ref[PM - p:PM - p + L, :], w_ref[i, 0],
                    preferred_element_type=f32)
        for k in range(1, K):
            off = PM - p + k * d
            y = y + jnp.dot(buf_ref[off:off + L, :], w_ref[i, k],
                            preferred_element_type=f32)
        return y + b_ref[i]

    for i, d in enumerate(dilations):
        xt = jnp.where(x >= 0.0, x, slope * x)                      # LeakyReLU
        xt = dilated_conv(xt, w1_ref, b1_ref, i, d)
        xt = jnp.where(valid, xt, 0.0)
        xt = jnp.where(xt >= 0.0, xt, slope * xt)                   # LeakyReLU
        xt = dilated_conv(xt, w2_ref, b2_ref, i, 1)
        if use_gamma:
            xt = gamma_ref[i] * xt                                  # (1,C)*(L,C)
        xt = jnp.where(valid, xt, 0.0)
        x = x + xt

    o_ref[...] = x[H:H + tile_t, :].astype(o_ref.dtype)             # aligned slice


# ----------------------------------------------------------------------------
# Wrapper
# ----------------------------------------------------------------------------
def resblock1_forward(x_nct, w1, b1, w2, b2, *, dilations=(1, 3, 5),
                      lrelu_slope=0.1, gamma=None, tile_t=None, out_dtype=None):
    """
    x_nct : (B, C, T)              activations, PyTorch NCL layout
    w1,w2 : (3, C_out, C_in, K)    effective conv weights (convs1 / convs2)
    b1,b2 : (3, C)                 conv biases
    gamma : optional (3, C)        layer scale (None -> no scaling)
    returns (B, C, T) in out_dtype (default: dtype of x_nct)
    """
    B, C, T = map(int, x_nct.shape)
    K = int(w1.shape[-1])          # odd K assumed (matches get_padding for odd K)
    nb = len(dilations)
    out_dtype = x_nct.dtype if out_dtype is None else out_dtype

    # cumulative receptive-field halo of the fused chain, rounded up to a
    # sublane multiple so staging stores / output slices are 8-row aligned
    halo_raw = sum(int(d) * (K - 1) // 2 + (K - 1) // 2 for d in dilations)
    halo = max(_round_up(halo_raw, 8), 8)
    pad_raw = max([int(d) for d in dilations] + [1]) * (K - 1) // 2
    pad_max = max(_round_up(pad_raw, 8), 8)

    # time tile: multiple of halo (so neighbour-halo block indices are exact);
    # large by default, shrunk for short sequences so the grid still has enough
    # steps to feed 2 TensorCores on v7x.
    if tile_t is None:
        n_t_target = max(1, pl.cdiv(16, max(B, 1)))
        tile_t = max(min(1024, pl.cdiv(T, n_t_target)), 2 * halo)
    tile_t = max(halo, min(int(tile_t), _round_up(T, halo)))
    tile_t = _round_up(tile_t, halo)
    n_t = pl.cdiv(T, tile_t)
    R = tile_t // halo             # halo-sized blocks per centre tile
    n_hb = pl.cdiv(T, halo)        # halo-sized blocks covering T

    # channels-last for the kernel (time in sublanes, channels in lanes).
    # TODO(synk): keep activations channels-last across the whole model to drop
    # this NCL<->NTC transpose pair (the only remaining wrapper HBM round trips).
    x_btc = jnp.transpose(x_nct, (0, 2, 1)).astype(jnp.float32)      # (B, T, C)

    # per-tap weights: (nb, Co, Ci, K) -> (nb, K, Ci, Co), bf16 for the MXU
    w1_k = jnp.transpose(w1, (0, 3, 2, 1)).astype(jnp.bfloat16)
    w2_k = jnp.transpose(w2, (0, 3, 2, 1)).astype(jnp.bfloat16)
    b1_k = jnp.asarray(b1, jnp.float32).reshape(nb, 1, C)
    b2_k = jnp.asarray(b2, jnp.float32).reshape(nb, 1, C)

    use_gamma = gamma is not None
    L_buf = tile_t + 2 * halo + 2 * pad_max

    kernel = partial(_resblock1_kernel,
                     dilations=tuple(int(d) for d in dilations), K=K,
                     slope=float(lrelu_slope), tile_t=tile_t, halo=halo,
                     pad_max=pad_max, t_valid=T, use_gamma=use_gamma)

    # grid-invariant operands: single-buffer them in VMEM when supported
    const_kw = dict(pipeline_mode=pl.Buffered(1)) if _buffered_one_supported() else {}

    def const_spec(shape):
        nd = len(shape)
        return pl.BlockSpec(shape, lambda b, t, _n=nd: (0,) * _n, **const_kw)

    in_specs = [
        # centre tile
        pl.BlockSpec((None, tile_t, C), lambda b, t: (b, t, 0)),
        # left / right halos: clamped neighbour views of the SAME activation
        # array; out-of-range halos are zeroed in-kernel by the validity mask.
        pl.BlockSpec((None, halo, C),
                     lambda b, t: (b, jnp.maximum(t * R - 1, 0), 0)),
        pl.BlockSpec((None, halo, C),
                     lambda b, t: (b, jnp.minimum((t + 1) * R, n_hb - 1), 0)),
        const_spec((nb, K, C, C)),
        const_spec((nb, 1, C)),
        const_spec((nb, K, C, C)),
        const_spec((nb, 1, C)),
    ]
    inputs = [x_btc, x_btc, x_btc, w1_k, b1_k, w2_k, b2_k]
    if use_gamma:
        in_specs.append(const_spec((nb, 1, C)))
        inputs.append(jnp.asarray(gamma, jnp.float32).reshape(nb, 1, C))

    out_btc = pl.pallas_call(
        kernel,
        out_shape=jax.ShapeDtypeStruct((B, T, C), out_dtype),
        grid_spec=pltpu.PrefetchScalarGridSpec(
            num_scalar_prefetch=0,
            grid=(B, n_t),
            in_specs=in_specs,
            out_specs=pl.BlockSpec((None, tile_t, C), lambda b, t: (b, t, 0)),
            scratch_shapes=[pltpu.VMEM((L_buf, C), jnp.bfloat16)],
        ),
        compiler_params=pltpu.CompilerParams(
            dimension_semantics=("parallel", "parallel"),
            vmem_limit_bytes=_vmem_limit_bytes(),
        ),
    )(*inputs)

    return jnp.transpose(out_btc, (0, 2, 1))          # back to (B, C, T)


# ----------------------------------------------------------------------------
# Pure-JAX reference (lax.conv_general_dilated) for correctness checking.
# ----------------------------------------------------------------------------
def _ref_conv1d(x, w, b, d):
    K = w.shape[-1]
    pad = d * (K - 1) // 2
    y = lax.conv_general_dilated(
        x, w, window_strides=(1,), padding=[(pad, pad)],
        rhs_dilation=(d,), dimension_numbers=("NCH", "OIH", "NCH"))
    return y + b[None, :, None]


def resblock1_reference(x, w1, b1, w2, b2, *, dilations=(1, 3, 5),
                        lrelu_slope=0.1, gamma=None):
    for i, d in enumerate(dilations):
        xt = jnp.where(x >= 0, x, lrelu_slope * x)
        xt = _ref_conv1d(xt, w1[i], b1[i], d)
        xt = jnp.where(xt >= 0, xt, lrelu_slope * xt)
        xt = _ref_conv1d(xt, w2[i], b2[i], 1)
        if gamma is not None:
            xt = gamma[i][None, :, None] * xt
        x = xt + x
    return x


# ----------------------------------------------------------------------------
if __name__ == "__main__":
    def run_case(case, B, C, T, K, dilations, tile_t, layer_scale):
        key = jax.random.fold_in(jax.random.PRNGKey(0), case)
        ks = jax.random.split(key, 5)
        nb = len(dilations)
        x = jax.random.normal(ks[0], (B, C, T), dtype=jnp.float32)
        scale = 1.0 / (C * K) ** 0.5
        w1 = jax.random.normal(ks[1], (nb, C, C, K), dtype=jnp.float32) * scale
        b1 = jax.random.normal(ks[2], (nb, C), dtype=jnp.float32) * 0.1
        w2 = jax.random.normal(ks[3], (nb, C, C, K), dtype=jnp.float32) * scale
        b2 = jax.random.normal(ks[4], (nb, C), dtype=jnp.float32) * 0.1
        gamma = None
        if layer_scale is not None:
            gamma = layer_scale * jnp.ones((nb, C), dtype=jnp.float32)

        out = resblock1_forward(x, w1, b1, w2, b2, dilations=dilations,
                                lrelu_slope=0.1, gamma=gamma, tile_t=tile_t)
        out = jax.block_until_ready(out)
        ref = resblock1_reference(x, w1, b1, w2, b2, dilations=dilations,
                                  lrelu_slope=0.1, gamma=gamma)
        assert out.shape == (B, C, T)
        # bf16 matmuls with f32 accumulation -> relaxed tolerance vs f32 reference
        assert jnp.allclose(out, ref, atol=3e-2, rtol=3e-2), "mismatch vs reference"

    # main config: auto tile (-> 32), T not a multiple of the tile
    # (3 tiles -> exercises left/interior/right halos and tail masking)
    run_case(0, B=2, C=128, T=72, K=3, dilations=(1, 3, 5), tile_t=None,
             layer_scale=None)
    # layer-scale (gamma) variant, explicit minimal tile (tile_t == halo)
    run_case(1, B=1, C=128, T=40, K=3, dilations=(1, 3, 5), tile_t=16,
             layer_scale=1e-2)

    print("KERNEL_OK")
</pallas_src>

<mosaic_0001>
module attributes {stable_mosaic.version = 11 : i64} {
  func.func @_resblock1_kernel(%arg0: i32, %arg1: i32, %arg2: memref<1x32x128xf32, #tpu.memory_space<vmem>>, %arg3: memref<1x16x128xf32, #tpu.memory_space<vmem>>, %arg4: memref<1x16x128xf32, #tpu.memory_space<vmem>>, %arg5: memref<3x3x128x128xbf16, #tpu.memory_space<vmem>>, %arg6: memref<3x1x128xf32, #tpu.memory_space<vmem>>, %arg7: memref<3x3x128x128xbf16, #tpu.memory_space<vmem>>, %arg8: memref<3x1x128xf32, #tpu.memory_space<vmem>>, %arg9: memref<1x32x128xf32, #tpu.memory_space<vmem>>, %arg10: memref<80x128xbf16, #tpu.memory_space<vmem>>) attributes {dimension_semantics = [#tpu.dimension_semantics<parallel>, #tpu.dimension_semantics<parallel>], iteration_bounds = array<i64: 2, 3>, scalar_prefetch = 0 : i64, scratch_operands = 1 : i64, tpu.core_type = #tpu.core_type<tc>, window_params = [{transform_indices = @transform_0, window_bounds = array<i64: 1, 32, 128>}, {transform_indices = @transform_1, window_bounds = array<i64: 1, 16, 128>}, {transform_indices = @transform_2, window_bounds = array<i64: 1, 16, 128>}, {pipeline_mode = #tpu.pipeline_mode<synchronous>, transform_indices = @transform_3, window_bounds = array<i64: 3, 3, 128, 128>}, {pipeline_mode = #tpu.pipeline_mode<synchronous>, transform_indices = @transform_4, window_bounds = array<i64: 3, 1, 128>}, {pipeline_mode = #tpu.pipeline_mode<synchronous>, transform_indices = @transform_5, window_bounds = array<i64: 3, 3, 128, 128>}, {pipeline_mode = #tpu.pipeline_mode<synchronous>, transform_indices = @transform_6, window_bounds = array<i64: 3, 1, 128>}, {transform_indices = @transform_7, window_bounds = array<i64: 1, 32, 128>}]} {
    %cst = arith.constant 0.000000e+00 : bf16
    %0 = vector.broadcast %cst : bf16 to vector<8x128xbf16>
    %c0 = arith.constant 0 : index
    %c0_0 = arith.constant 0 : index
    %1 = vector.load %arg10[%c0, %c0_0] : memref<80x128xbf16, #tpu.memory_space<vmem>>, vector<8x128xbf16>
    tpu.vector_store %arg10[%c0, %c0_0], %0 {strides = array<i32>} : memref<80x128xbf16, #tpu.memory_space<vmem>>, vector<8x128xbf16>,
    %cst_1 = arith.constant 0.000000e+00 : bf16
    %2 = vector.broadcast %cst_1 : bf16 to vector<8x128xbf16>
    %c72 = arith.constant 72 : index
    %c0_2 = arith.constant 0 : index
    %3 = vector.load %arg10[%c72, %c0_2] : memref<80x128xbf16, #tpu.memory_space<vmem>>, vector<8x128xbf16>
    tpu.vector_store %arg10[%c72, %c0_2], %2 {strides = array<i32>} : memref<80x128xbf16, #tpu.memory_space<vmem>>, vector<8x128xbf16>,
    %c0_3 = arith.constant 0 : index
    %c0_4 = arith.constant 0 : index
    %c0_5 = arith.constant 0 : index
    %4 = vector.load %arg3[%c0_3, %c0_4, %c0_5] : memref<1x16x128xf32, #tpu.memory_space<vmem>>, vector<1x16x128xf32>
    %5 = vector.shape_cast %4 : vector<1x16x128xf32> to vector<16x128xf32>
    %c0_6 = arith.constant 0 : index
    %c0_7 = arith.constant 0 : index
    %c0_8 = arith.constant 0 : index
    %6 = vector.load %arg2[%c0_6, %c0_7, %c0_8] : memref<1x32x128xf32, #tpu.memory_space<vmem>>, vector<1x32x128xf32>
    %7 = vector.shape_cast %6 : vector<1x32x128xf32> to vector<32x128xf32>
    %c0_9 = arith.constant 0 : index
    %c0_10 = arith.constant 0 : index
    %c0_11 = arith.constant 0 : index
    %8 = vector.load %arg4[%c0_9, %c0_10, %c0_11] : memref<1x16x128xf32, #tpu.memory_space<vmem>>, vector<1x16x128xf32>
    %9 = vector.shape_cast %8 : vector<1x16x128xf32> to vector<16x128xf32>
    %10 = tpu.concatenate %5, %7, %9 in 0 : vector<16x128xf32>, vector<32x128xf32>, vector<16x128xf32> -> vector<64x128xf32>
    %c32_i32 = arith.constant 32 : i32
    %11 = arith.muli %arg1, %c32_i32 : i32
    %c16_i32 = arith.constant 16 : i32
    %12 = arith.subi %11, %c16_i32 : i32
    %13 = tpu.iota {dimensions = array<i32: 0>} : vector<64x1xi32>
    %14 = vector.broadcast %12 : i32 to vector<64x1xi32>
    %15 = arith.addi %14, %13 : vector<64x1xi32>
    %c0_i32 = arith.constant 0 : i32
    %16 = vector.broadcast %c0_i32 : i32 to vector<64x1xi32>
    %17 = arith.cmpi sge, %15, %16 : vector<64x1xi32>
    %c72_i32 = arith.constant 72 : i32
    %18 = vector.broadcast %c72_i32 : i32 to vector<64x1xi32>
    %19 = arith.cmpi slt, %15, %18 : vector<64x1xi32>
    %20 = arith.andi %17, %19 : vector<64x1xi1>
    %cst_12 = arith.constant 0.000000e+00 : f32
    %21 = vector.shape_cast %20 : vector<64x1xi1> to vector<64x1xi1>
    %22 = vector.broadcast %21 : vector<64x1xi1> to vector<64x128xi1>
    %23 = vector.broadcast %cst_12 : f32 to vector<64x128xf32>
    %24 = arith.select %22, %10, %23 : vector<64x128xi1>, vector<64x128xf32>
    %cst_13 = arith.constant 0.000000e+00 : f32
    %25 = vector.broadcast %cst_13 : f32 to vector<64x128xf32>
    %26 = arith.cmpf oge, %24, %25 : vector<64x128xf32>
    %cst_14 = arith.constant 1.000000e-01 : f32
    %27 = vector.broadcast %cst_14 : f32 to vector<64x128xf32>
    %28 = arith.mulf %27, %24 : vector<64x128xf32>
    %29 = arith.select %26, %24, %28 : vector<64x128xi1>, vector<64x128xf32>
    %30 = arith.truncf %29 : vector<64x128xf32> to vector<64x128xbf16>
    %c8 = arith.constant 8 : index
    %c0_15 = arith.constant 0 : index
    %31 = vector.load %arg10[%c8, %c0_15] : memref<80x128xbf16, #tpu.memory_space<vmem>>, vector<64x128xbf16>
    tpu.vector_store %arg10[%c8, %c0_15], %30 {strides = array<i32>} : memref<80x128xbf16, #tpu.memory_space<vmem>>, vector<64x128xbf16>,
    %c7 = arith.constant 7 : index
    %c0_16 = arith.constant 0 : index
    %32 = vector.load %arg10[%c7, %c0_16] : memref<80x128xbf16, #tpu.memory_space<vmem>>, vector<64x128xbf16>
    %c0_17 = arith.constant 0 : index
    %c0_18 = arith.constant 0 : index
    %c0_19 = arith.constant 0 : index
    %c0_20 = arith.constant 0 : index
    %33 = vector.load %arg5[%c0_17, %c0_18, %c0_19, %c0_20] : memref<3x3x128x128xbf16, #tpu.memory_space<vmem>>, vector<1x1x128x128xbf16>
    %34 = vector.shape_cast %33 : vector<1x1x128x128xbf16> to vector<128x128xbf16>
    %cst_21 = arith.constant dense<0.000000e+00> : vector<64x128xf32>
    %35 = tpu.matmul %32, %34, %cst_21 {dimension_numbers = #tpu.dot_dimension_numbers<[1], [0], [0], [1], [0, 0, 1, 1], [], []>} : vector<64x128xbf16>, vector<128x128xbf16>, vector<64x128xf32> -> vector<64x128xf32>
    %c8_22 = arith.constant 8 : index
    %c0_23 = arith.constant 0 : index
    %36 = vector.load %arg10[%c8_22, %c0_23] : memref<80x128xbf16, #tpu.memory_space<vmem>>, vector<64x128xbf16>
    %c0_24 = arith.constant 0 : index
    %c1 = arith.constant 1 : index
    %c0_25 = arith.constant 0 : index
    %c0_26 = arith.constant 0 : index
    %37 = vector.load %arg5[%c0_24, %c1, %c0_25, %c0_26] : memref<3x3x128x128xbf16, #tpu.memory_space<vmem>>, vector<1x1x128x128xbf16>
    %38 = vector.shape_cast %37 : vector<1x1x128x128xbf16> to vector<128x128xbf16>
    %cst_27 = arith.constant dense<0.000000e+00> : vector<64x128xf32>
    %39 = tpu.matmul %36, %38, %cst_27 {dimension_numbers = #tpu.dot_dimension_numbers<[1], [0], [0], [1], [0, 0, 1, 1], [], []>} : vector<64x128xbf16>, vector<128x128xbf16>, vector<64x128xf32> -> vector<64x128xf32>
    %40 = arith.addf %35, %39 : vector<64x128xf32>
    %c9 = arith.constant 9 : index
    %c0_28 = arith.constant 0 : index
    %41 = vector.load %arg10[%c9, %c0_28] : memref<80x128xbf16, #tpu.memory_space<vmem>>, vector<64x128xbf16>
    %c0_29 = arith.constant 0 : index
    %c2 = arith.constant 2 : index
    %c0_30 = arith.constant 0 : index
    %c0_31 = arith.constant 0 : index
    %42 = vector.load %arg5[%c0_29, %c2, %c0_30, %c0_31] : memref<3x3x128x128xbf16, #tpu.memory_space<vmem>>, vector<1x1x128x128xbf16>
    %43 = vector.shape_cast %42 : vector<1x1x128x128xbf16> to vector<128x128xbf16>
    %cst_32 = arith.constant dense<0.000000e+00> : vector<64x128xf32>
    %44 = tpu.matmul %41, %43, %cst_32 {dimension_numbers = #tpu.dot_dimension_numbers<[1], [0], [0], [1], [0, 0, 1, 1], [], []>} : vector<64x128xbf16>, vector<128x128xbf16>, vector<64x128xf32> -> vector<64x128xf32>
    %45 = arith.addf %40, %44 : vector<64x128xf32>
    %c0_33 = arith.constant 0 : index
    %c0_34 = arith.constant 0 : index
    %c0_35 = arith.constant 0 : index
    %46 = vector.load %arg6[%c0_33, %c0_34, %c0_35] : memref<3x1x128xf32, #tpu.memory_space<vmem>>, vector<1x1x128xf32>
    %47 = vector.shape_cast %46 : vector<1x1x128xf32> to vector<1x128xf32>
    %48 = vector.broadcast %47 : vector<1x128xf32> to vector<64x128xf32>
    %49 = arith.addf %45, %48 : vector<64x128xf32>
    %cst_36 = arith.constant 0.000000e+00 : f32
    %50 = vector.shape_cast %20 : vector<64x1xi1> to vector<64x1xi1>
    %51 = vector.broadcast %50 : vector<64x1xi1> to vector<64x128xi1>
    %52 = vector.broadcast %cst_36 : f32 to vector<64x128xf32>
    %53 = arith.select %51, %49, %52 : vector<64x128xi1>, vector<64x128xf32>
    %cst_37 = arith.constant 0.000000e+00 : f32
    %54 = vector.broadcast %cst_37 : f32 to vector<64x128xf32>
    %55 = arith.cmpf oge, %53, %54 : vector<64x128xf32>
    %cst_38 = arith.constant 1.000000e-01 : f32
    %56 = vector.broadcast %cst_38 : f32 to vector<64x128xf32>
    %57 = arith.mulf %56, %53 : vector<64x128xf32>
    %58 = arith.select %55, %53, %57 : vector<64x128xi1>, vector<64x128xf32>
    %59 = arith.truncf %58 : vector<64x128xf32> to vector<64x128xbf16>
    %c8_39 = arith.constant 8 : index
    %c0_40 = arith.constant 0 : index
    %60 = vector.load %arg10[%c8_39, %c0_40] : memref<80x128xbf16, #tpu.memory_space<vmem>>, vector<64x128xbf16>
    tpu.vector_store %arg10[%c8_39, %c0_40], %59 {strides = array<i32>} : memref<80x128xbf16, #tpu.memory_space<vmem>>, vector<64x128xbf16>,
    %c7_41 = arith.constant 7 : index
    %c0_42 = arith.constant 0 : index
    %61 = vector.load %arg10[%c7_41, %c0_42] : memref<80x128xbf16, #tpu.memory_space<vmem>>, vector<64x128xbf16>
    %c0_43 = arith.constant 0 : index
    %c0_44 = arith.constant 0 : index
    %c0_45 = arith.constant 0 : index
    %c0_46 = arith.constant 0 : index
    %62 = vector.load %arg7[%c0_43, %c0_44, %c0_45, %c0_46] : memref<3x3x128x128xbf16, #tpu.memory_space<vmem>>, vector<1x1x128x128xbf16>
    %63 = vector.shape_cast %62 : vector<1x1x128x128xbf16> to vector<128x128xbf16>
    %cst_47 = arith.constant dense<0.000000e+00> : vector<64x128xf32>
    %64 = tpu.matmul %61, %63, %cst_47 {dimension_numbers = #tpu.dot_dimension_numbers<[1], [0], [0], [1], [0, 0, 1, 1], [], []>} : vector<64x128xbf16>, vector<128x128xbf16>, vector<64x128xf32> -> vector<64x128xf32>
    %c8_48 = arith.constant 8 : index
    %c0_49 = arith.constant 0 : index
    %65 = vector.load %arg10[%c8_48, %c0_49] : memref<80x128xbf16, #tpu.memory_space<vmem>>, vector<64x128xbf16>
    %c0_50 = arith.constant 0 : index
    %c1_51 = arith.constant 1 : index
    %c0_52 = arith.constant 0 : index
    %c0_53 = arith.constant 0 : index
    %66 = vector.load %arg7[%c0_50, %c1_51, %c0_52, %c0_53] : memref<3x3x128x128xbf16, #tpu.memory_space<vmem>>, vector<1x1x128x128xbf16>
    %67 = vector.shape_cast %66 : vector<1x1x128x128xbf16> to vector<128x128xbf16>
    %cst_54 = arith.constant dense<0.000000e+00> : vector<64x128xf32>
    %68 = tpu.matmul %65, %67, %cst_54 {dimension_numbers = #tpu.dot_dimension_numbers<[1], [0], [0], [1], [0, 0, 1, 1], [], []>} : vector<64x128xbf16>, vector<128x128xbf16>, vector<64x128xf32> -> vector<64x128xf32>
    %69 = arith.addf %64, %68 : vector<64x128xf32>
    %c9_55 = arith.constant 9 : index
    %c0_56 = arith.constant 0 : index
    %70 = vector.load %arg10[%c9_55, %c0_56] : memref<80x128xbf16, #tpu.memory_space<vmem>>, vector<64x128xbf16>
    %c0_57 = arith.constant 0 : index
    %c2_58 = arith.constant 2 : index
    %c0_59 = arith.constant 0 : index
    %c0_60 = arith.constant 0 : index
    %71 = vector.load %arg7[%c0_57, %c2_58, %c0_59, %c0_60] : memref<3x3x128x128xbf16, #tpu.memory_space<vmem>>, vector<1x1x128x128xbf16>
    %72 = vector.shape_cast %71 : vector<1x1x128x128xbf16> to vector<128x128xbf16>
    %cst_61 = arith.constant dense<0.000000e+00> : vector<64x128xf32>
    %73 = tpu.matmul %70, %72, %cst_61 {dimension_numbers = #tpu.dot_dimension_numbers<[1], [0], [0], [1], [0, 0, 1, 1], [], []>} : vector<64x128xbf16>, vector<128x128xbf16>, vector<64x128xf32> -> vector<64x128xf32>
    %74 = arith.addf %69, %73 : vector<64x128xf32>
    %c0_62 = arith.constant 0 : index
    %c0_63 = arith.constant 0 : index
    %c0_64 = arith.constant 0 : index
    %75 = vector.load %arg8[%c0_62, %c0_63, %c0_64] : memref<3x1x128xf32, #tpu.memory_space<vmem>>, vector<1x1x128xf32>
    %76 = vector.shape_cast %75 : vector<1x1x128xf32> to vector<1x128xf32>
    %77 = vector.broadcast %76 : vector<1x128xf32> to vector<64x128xf32>
    %78 = arith.addf %74, %77 : vector<64x128xf32>
    %cst_65 = arith.constant 0.000000e+00 : f32
    %79 = vector.shape_cast %20 : vector<64x1xi1> to vector<64x1xi1>
    %80 = vector.broadcast %79 : vector<64x1xi1> to vector<64x128xi1>
    %81 = vector.broadcast %cst_65 : f32 to vector<64x128xf32>
    %82 = arith.select %80, %78, %81 : vector<64x128xi1>, vector<64x128xf32>
    %83 = arith.addf %24, %82 : vector<64x128xf32>
    %cst_66 = arith.constant 0.000000e+00 : f32
    %84 = vector.broadcast %cst_66 : f32 to vector<64x128xf32>
    %85 = arith.cmpf oge, %83, %84 : vector<64x128xf32>
    %cst_67 = arith.constant 1.000000e-01 : f32
    %86 = vector.broadcast %cst_67 : f32 to vector<64x128xf32>
    %87 = arith.mulf %86, %83 : vector<64x128xf32>
    %88 = arith.select %85, %83, %87 : vector<64x128xi1>, vector<64x128xf32>
    %89 = arith.truncf %88 : vector<64x128xf32> to vector<64x128xbf16>
    %c8_68 = arith.constant 8 : index
    %c0_69 = arith.constant 0 : index
    %90 = vector.load %arg10[%c8_68, %c0_69] : memref<80x128xbf16, #tpu.memory_space<vmem>>, vector<64x128xbf16>
    tpu.vector_store %arg10[%c8_68, %c0_69], %89 {strides = array<i32>} : memref<80x128xbf16, #tpu.memory_space<vmem>>, vector<64x128xbf16>,
    %c5 = arith.constant 5 : index
    %c0_70 = arith.constant 0 : index
    %91 = vector.load %arg10[%c5, %c0_70] : memref<80x128xbf16, #tpu.memory_space<vmem>>, vector<64x128xbf16>
    %c1_71 = arith.constant 1 : index
    %c0_72 = arith.constant 0 : index
    %c0_73 = arith.constant 0 : index
    %c0_74 = arith.constant 0 : index
    %92 = vector.load %arg5[%c1_71, %c0_72, %c0_73, %c0_74] : memref<3x3x128x128xbf16, #tpu.memory_space<vmem>>, vector<1x1x128x128xbf16>
    %93 = vector.shape_cast %92 : vector<1x1x128x128xbf16> to vector<128x128xbf16>
    %cst_75 = arith.constant dense<0.000000e+00> : vector<64x128xf32>
    %94 = tpu.matmul %91, %93, %cst_75 {dimension_numbers = #tpu.dot_dimension_numbers<[1], [0], [0], [1], [0, 0, 1, 1], [], []>} : vector<64x128xbf16>, vector<128x128xbf16>, vector<64x128xf32> -> vector<64x128xf32>
    %c8_76 = arith.constant 8 : index
    %c0_77 = arith.constant 0 : index
    %95 = vector.load %arg10[%c8_76, %c0_77] : memref<80x128xbf16, #tpu.memory_space<vmem>>, vector<64x128xbf16>
    %c1_78 = arith.constant 1 : index
    %c1_79 = arith.constant 1 : index
    %c0_80 = arith.constant 0 : index
    %c0_81 = arith.constant 0 : index
    %96 = vector.load %arg5[%c1_78, %c1_79, %c0_80, %c0_81] : memref<3x3x128x128xbf16, #tpu.memory_space<vmem>>, vector<1x1x128x128xbf16>
    %97 = vector.shape_cast %96 : vector<1x1x128x128xbf16> to vector<128x128xbf16>
    %cst_82 = arith.constant dense<0.000000e+00> : vector<64x128xf32>
    %98 = tpu.matmul %95, %97, %cst_82 {dimension_numbers = #tpu.dot_dimension_numbers<[1], [0], [0], [1], [0, 0, 1, 1], [], []>} : vector<64x128xbf16>, vector<128x128xbf16>, vector<64x128xf32> -> vector<64x128xf32>
    %99 = arith.addf %94, %98 : vector<64x128xf32>
    %c11 = arith.constant 11 : index
    %c0_83 = arith.constant 0 : index
    %100 = vector.load %arg10[%c11, %c0_83] : memref<80x128xbf16, #tpu.memory_space<vmem>>, vector<64x128xbf16>
    %c1_84 = arith.constant 1 : index
    %c2_85 = arith.constant 2 : index
    %c0_86 = arith.constant 0 : index
    %c0_87 = arith.constant 0 : index
    %101 = vector.load %arg5[%c1_84, %c2_85, %c0_86, %c0_87] : memref<3x3x128x128xbf16, #tpu.memory_space<vmem>>, vector<1x1x128x128xbf16>
    %102 = vector.shape_cast %101 : vector<1x1x128x128xbf16> to vector<128x128xbf16>
    %cst_88 = arith.constant dense<0.000000e+00> : vector<64x128xf32>
    %103 = tpu.matmul %100, %102, %cst_88 {dimension_numbers = #tpu.dot_dimension_numbers<[1], [0], [0], [1], [0, 0, 1, 1], [], []>} : vector<64x128xbf16>, vector<128x128xbf16>, vector<64x128xf32> -> vector<64x128xf32>
    %104 = arith.addf %99, %103 : vector<64x128xf32>
    %c1_89 = arith.constant 1 : index
    %c0_90 = arith.constant 0 : index
    %c0_91 = arith.constant 0 : index
    %105 = vector.load %arg6[%c1_89, %c0_90, %c0_91] : memref<3x1x128xf32, #tpu.memory_space<vmem>>, vector<1x1x128xf32>
    %106 = vector.shape_cast %105 : vector<1x1x128xf32> to vector<1x128xf32>
    %107 = vector.broadcast %106 : vector<1x128xf32> to vector<64x128xf32>
    %108 = arith.addf %104, %107 : vector<64x128xf32>
    %cst_92 = arith.constant 0.000000e+00 : f32
    %109 = vector.shape_cast %20 : vector<64x1xi1> to vector<64x1xi1>
    %110 = vector.broadcast %109 : vector<64x1xi1> to vector<64x128xi1>
    %111 = vector.broadcast %cst_92 : f32 to vector<64x128xf32>
    %112 = arith.select %110, %108, %111 : vector<64x128xi1>, vector<64x128xf32>
    %cst_93 = arith.constant 0.000000e+00 : f32
    %113 = vector.broadcast %cst_93 : f32 to vector<64x128xf32>
    %114 = arith.cmpf oge, %112, %113 : vector<64x128xf32>
    %cst_94 = arith.constant 1.000000e-01 : f32
    %115 = vector.broadcast %cst_94 : f32 to vector<64x128xf32>
    %116 = arith.mulf %115, %112 : vector<64x128xf32>
    %117 = arith.select %114, %112, %116 : vector<64x128xi1>, vector<64x128xf32>
    %118 = arith.truncf %117 : vector<64x128xf32> to vector<64x128xbf16>
    %c8_95 = arith.constant 8 : index
    %c0_96 = arith.constant 0 : index
    %119 = vector.load %arg10[%c8_95, %c0_96] : memref<80x128xbf16, #tpu.memory_space<vmem>>, vector<64x128xbf16>
    tpu.vector_store %arg10[%c8_95, %c0_96], %118 {strides = array<i32>} : memref<80x128xbf16, #tpu.memory_space<vmem>>, vector<64x128xbf16>,
    %c7_97 = arith.constant 7 : index
    %c0_98 = arith.constant 0 : index
    %120 = vector.load %arg10[%c7_97, %c0_98] : memref<80x128xbf16, #tpu.memory_space<vmem>>, vector<64x128xbf16>
    %c1_99 = arith.constant 1 : index
    %c0_100 = arith.constant 0 : index
    %c0_101 = arith.constant 0 : index
    %c0_102 = arith.constant 0 : index
    %121 = vector.load %arg7[%c1_99, %c0_100, %c0_101, %c0_102] : memref<3x3x128x128xbf16, #tpu.memory_space<vmem>>, vector<1x1x128x128xbf16>
    %122 = vector.shape_cast %121 : vector<1x1x128x128xbf16> to vector<128x128xbf16>
    %cst_103 = arith.constant dense<0.000000e+00> : vector<64x128xf32>
    %123 = tpu.matmul %120, %122, %cst_103 {dimension_numbers = #tpu.dot_dimension_numbers<[1], [0], [0], [1], [0, 0, 1, 1], [], []>} : vector<64x128xbf16>, vector<128x128xbf16>, vector<64x128xf32> -> vector<64x128xf32>
    %c8_104 = arith.constant 8 : index
    %c0_105 = arith.constant 0 : index
    %124 = vector.load %arg10[%c8_104, %c0_105] : memref<80x128xbf16, #tpu.memory_space<vmem>>, vector<64x128xbf16>
    %c1_106 = arith.constant 1 : index
    %c1_107 = arith.constant 1 : index
    %c0_108 = arith.constant 0 : index
    %c0_109 = arith.constant 0 : index
    %125 = vector.load %arg7[%c1_106, %c1_107, %c0_108, %c0_109] : memref<3x3x128x128xbf16, #tpu.memory_space<vmem>>, vector<1x1x128x128xbf16>
    %126 = vector.shape_cast %125 : vector<1x1x128x128xbf16> to vector<128x128xbf16>
    %cst_110 = arith.constant dense<0.000000e+00> : vector<64x128xf32>
    %127 = tpu.matmul %124, %126, %cst_110 {dimension_numbers = #tpu.dot_dimension_numbers<[1], [0], [0], [1], [0, 0, 1, 1], [], []>} : vector<64x128xbf16>, vector<128x128xbf16>, vector<64x128xf32> -> vector<64x128xf32>
    %128 = arith.addf %123, %127 : vector<64x128xf32>
    %c9_111 = arith.constant 9 : index
    %c0_112 = arith.constant 0 : index
    %129 = vector.load %arg10[%c9_111, %c0_112] : memref<80x128xbf16, #tpu.memory_space<vmem>>, vector<64x128xbf16>
    %c1_113 = arith.constant 1 : index
    %c2_114 = arith.constant 2 : index
    %c0_115 = arith.constant 0 : index
    %c0_116 = arith.constant 0 : index
    %130 = vector.load %arg7[%c1_113, %c2_114, %c0_115, %c0_116] : memref<3x3x128x128xbf16, #tpu.memory_space<vmem>>, vector<1x1x128x128xbf16>
    %131 = vector.shape_cast %130 : vector<1x1x128x128xbf16> to vector<128x128xbf16>
    %cst_117 = arith.constant dense<0.000000e+00> : vector<64x128xf32>
    %132 = tpu.matmul %129, %131, %cst_117 {dimension_numbers = #tpu.dot_dimension_numbers<[1], [0], [0], [1], [0, 0, 1, 1], [], []>} : vector<64x128xbf16>, vector<128x128xbf16>, vector<64x128xf32> -> vector<64x128xf32>
    %133 = arith.addf %128, %132 : vector<64x128xf32>
    %c1_118 = arith.constant 1 : index
    %c0_119 = arith.constant 0 : index
    %c0_120 = arith.constant 0 : index
    %134 = vector.load %arg8[%c1_118, %c0_119, %c0_120] : memref<3x1x128xf32, #tpu.memory_space<vmem>>, vector<1x1x128xf32>
    %135 = vector.shape_cast %134 : vector<1x1x128xf32> to vector<1x128xf32>
    %136 = vector.broadcast %135 : vector<1x128xf32> to vector<64x128xf32>
    %137 = arith.addf %133, %136 : vector<64x128xf32>
    %cst_121 = arith.constant 0.000000e+00 : f32
    %138 = vector.shape_cast %20 : vector<64x1xi1> to vector<64x1xi1>
    %139 = vector.broadcast %138 : vector<64x1xi1> to vector<64x128xi1>
    %140 = vector.broadcast %cst_121 : f32 to vector<64x128xf32>
    %141 = arith.select %139, %137, %140 : vector<64x128xi1>, vector<64x128xf32>
    %142 = arith.addf %83, %141 : vector<64x128xf32>
    %cst_122 = arith.constant 0.000000e+00 : f32
    %143 = vector.broadcast %cst_122 : f32 to vector<64x128xf32>
    %144 = arith.cmpf oge, %142, %143 : vector<64x128xf32>
    %cst_123 = arith.constant 1.000000e-01 : f32
    %145 = vector.broadcast %cst_123 : f32 to vector<64x128xf32>
    %146 = arith.mulf %145, %142 : vector<64x128xf32>
    %147 = arith.select %144, %142, %146 : vector<64x128xi1>, vector<64x128xf32>
    %148 = arith.truncf %147 : vector<64x128xf32> to vector<64x128xbf16>
    %c8_124 = arith.constant 8 : index
    %c0_125 = arith.constant 0 : index
    %149 = vector.load %arg10[%c8_124, %c0_125] : memref<80x128xbf16, #tpu.memory_space<vmem>>, vector<64x128xbf16>
    tpu.vector_store %arg10[%c8_124, %c0_125], %148 {strides = array<i32>} : memref<80x128xbf16, #tpu.memory_space<vmem>>, vector<64x128xbf16>,
    %c3 = arith.constant 3 : index
    %c0_126 = arith.constant 0 : index
    %150 = vector.load %arg10[%c3, %c0_126] : memref<80x128xbf16, #tpu.memory_space<vmem>>, vector<64x128xbf16>
    %c2_127 = arith.constant 2 : index
    %c0_128 = arith.constant 0 : index
    %c0_129 = arith.constant 0 : index
    %c0_130 = arith.constant 0 : index
    %151 = vector.load %arg5[%c2_127, %c0_128, %c0_129, %c0_130] : memref<3x3x128x128xbf16, #tpu.memory_space<vmem>>, vector<1x1x128x128xbf16>
    %152 = vector.shape_cast %151 : vector<1x1x128x128xbf16> to vector<128x128xbf16>
    %cst_131 = arith.constant dense<0.000000e+00> : vector<64x128xf32>
    %153 = tpu.matmul %150, %152, %cst_131 {dimension_numbers = #tpu.dot_dimension_numbers<[1], [0], [0], [1], [0, 0, 1, 1], [], []>} : vector<64x128xbf16>, vector<128x128xbf16>, vector<64x128xf32> -> vector<64x128xf32>
    %c8_132 = arith.constant 8 : index
    %c0_133 = arith.constant 0 : index
    %154 = vector.load %arg10[%c8_132, %c0_133] : memref<80x128xbf16, #tpu.memory_space<vmem>>, vector<64x128xbf16>
    %c2_134 = arith.constant 2 : index
    %c1_135 = arith.constant 1 : index
    %c0_136 = arith.constant 0 : index
    %c0_137 = arith.constant 0 : index
    %155 = vector.load %arg5[%c2_134, %c1_135, %c0_136, %c0_137] : memref<3x3x128x128xbf16, #tpu.memory_space<vmem>>, vector<1x1x128x128xbf16>
    %156 = vector.shape_cast %155 : vector<1x1x128x128xbf16> to vector<128x128xbf16>
    %cst_138 = arith.constant dense<0.000000e+00> : vector<64x128xf32>
    %157 = tpu.matmul %154, %156, %cst_138 {dimension_numbers = #tpu.dot_dimension_numbers<[1], [0], [0], [1], [0, 0, 1, 1], [], []>} : vector<64x128xbf16>, vector<128x128xbf16>, vector<64x128xf32> -> vector<64x128xf32>
    %158 = arith.addf %153, %157 : vector<64x128xf32>
    %c13 = arith.constant 13 : index
    %c0_139 = arith.constant 0 : index
    %159 = vector.load %arg10[%c13, %c0_139] : memref<80x128xbf16, #tpu.memory_space<vmem>>, vector<64x128xbf16>
    %c2_140 = arith.constant 2 : index
    %c2_141 = arith.constant 2 : index
    %c0_142 = arith.constant 0 : index
    %c0_143 = arith.constant 0 : index
    %160 = vector.load %arg5[%c2_140, %c2_141, %c0_142, %c0_143] : memref<3x3x128x128xbf16, #tpu.memory_space<vmem>>, vector<1x1x128x128xbf16>
    %161 = vector.shape_cast %160 : vector<1x1x128x128xbf16> to vector<128x128xbf16>
    %cst_144 = arith.constant dense<0.000000e+00> : vector<64x128xf32>
    %162 = tpu.matmul %159, %161, %cst_144 {dimension_numbers = #tpu.dot_dimension_numbers<[1], [0], [0], [1], [0, 0, 1, 1], [], []>} : vector<64x128xbf16>, vector<128x128xbf16>, vector<64x128xf32> -> vector<64x128xf32>
    %163 = arith.addf %158, %162 : vector<64x128xf32>
    %c2_145 = arith.constant 2 : index
    %c0_146 = arith.constant 0 : index
    %c0_147 = arith.constant 0 : index
    %164 = vector.load %arg6[%c2_145, %c0_146, %c0_147] : memref<3x1x128xf32, #tpu.memory_space<vmem>>, vector<1x1x128xf32>
    %165 = vector.shape_cast %164 : vector<1x1x128xf32> to vector<1x128xf32>
    %166 = vector.broadcast %165 : vector<1x128xf32> to vector<64x128xf32>
    %167 = arith.addf %163, %166 : vector<64x128xf32>
    %cst_148 = arith.constant 0.000000e+00 : f32
    %168 = vector.shape_cast %20 : vector<64x1xi1> to vector<64x1xi1>
    %169 = vector.broadcast %168 : vector<64x1xi1> to vector<64x128xi1>
    %170 = vector.broadcast %cst_148 : f32 to vector<64x128xf32>
    %171 = arith.select %169, %167, %170 : vector<64x128xi1>, vector<64x128xf32>
    %cst_149 = arith.constant 0.000000e+00 : f32
    %172 = vector.broadcast %cst_149 : f32 to vector<64x128xf32>
    %173 = arith.cmpf oge, %171, %172 : vector<64x128xf32>
    %cst_150 = arith.constant 1.000000e-01 : f32
    %174 = vector.broadcast %cst_150 : f32 to vector<64x128xf32>
    %175 = arith.mulf %174, %171 : vector<64x128xf32>
    %176 = arith.select %173, %171, %175 : vector<64x128xi1>, vector<64x128xf32>
    %177 = arith.truncf %176 : vector<64x128xf32> to vector<64x128xbf16>
    %c8_151 = arith.constant 8 : index
    %c0_152 = arith.constant 0 : index
    %178 = vector.load %arg10[%c8_151, %c0_152] : memref<80x128xbf16, #tpu.memory_space<vmem>>, vector<64x128xbf16>
    tpu.vector_store %arg10[%c8_151, %c0_152], %177 {strides = array<i32>} : memref<80x128xbf16, #tpu.memory_space<vmem>>, vector<64x128xbf16>,
    %c7_153 = arith.constant 7 : index
    %c0_154 = arith.constant 0 : index
    %179 = vector.load %arg10[%c7_153, %c0_154] : memref<80x128xbf16, #tpu.memory_space<vmem>>, vector<64x128xbf16>
    %c2_155 = arith.constant 2 : index
    %c0_156 = arith.constant 0 : index
    %c0_157 = arith.constant 0 : index
    %c0_158 = arith.constant 0 : index
    %180 = vector.load %arg7[%c2_155, %c0_156, %c0_157, %c0_158] : memref<3x3x128x128xbf16, #tpu.memory_space<vmem>>, vector<1x1x128x128xbf16>
    %181 = vector.shape_cast %180 : vector<1x1x128x128xbf16> to vector<128x128xbf16>
    %cst_159 = arith.constant dense<0.000000e+00> : vector<64x128xf32>
    %182 = tpu.matmul %179, %181, %cst_159 {dimension_numbers = #tpu.dot_dimension_numbers<[1], [0], [0], [1], [0, 0, 1, 1], [], []>} : vector<64x128xbf16>, vector<128x128xbf16>, vector<64x128xf32> -> vector<64x128xf32>
    %c8_160 = arith.constant 8 : index
    %c0_161 = arith.constant 0 : index
    %183 = vector.load %arg10[%c8_160, %c0_161] : memref<80x128xbf16, #tpu.memory_space<vmem>>, vector<64x128xbf16>
    %c2_162 = arith.constant 2 : index
    %c1_163 = arith.constant 1 : index
    %c0_164 = arith.constant 0 : index
    %c0_165 = arith.constant 0 : index
    %184 = vector.load %arg7[%c2_162, %c1_163, %c0_164, %c0_165] : memref<3x3x128x128xbf16, #tpu.memory_space<vmem>>, vector<1x1x128x128xbf16>
    %185 = vector.shape_cast %184 : vector<1x1x128x128xbf16> to vector<128x128xbf16>
    %cst_166 = arith.constant dense<0.000000e+00> : vector<64x128xf32>
    %186 = tpu.matmul %183, %185, %cst_166 {dimension_numbers = #tpu.dot_dimension_numbers<[1], [0], [0], [1], [0, 0, 1, 1], [], []>} : vector<64x128xbf16>, vector<128x128xbf16>, vector<64x128xf32> -> vector<64x128xf32>
    %187 = arith.addf %182, %186 : vector<64x128xf32>
    %c9_167 = arith.constant 9 : index
    %c0_168 = arith.constant 0 : index
    %188 = vector.load %arg10[%c9_167, %c0_168] : memref<80x128xbf16, #tpu.memory_space<vmem>>, vector<64x128xbf16>
    %c2_169 = arith.constant 2 : index
    %c2_170 = arith.constant 2 : index
    %c0_171 = arith.constant 0 : index
    %c0_172 = arith.constant 0 : index
    %189 = vector.load %arg7[%c2_169, %c2_170, %c0_171, %c0_172] : memref<3x3x128x128xbf16, #tpu.memory_space<vmem>>, vector<1x1x128x128xbf16>
    %190 = vector.shape_cast %189 : vector<1x1x128x128xbf16> to vector<128x128xbf16>
    %cst_173 = arith.constant dense<0.000000e+00> : vector<64x128xf32>
    %191 = tpu.matmul %188, %190, %cst_173 {dimension_numbers = #tpu.dot_dimension_numbers<[1], [0], [0], [1], [0, 0, 1, 1], [], []>} : vector<64x128xbf16>, vector<128x128xbf16>, vector<64x128xf32> -> vector<64x128xf32>
    %192 = arith.addf %187, %191 : vector<64x128xf32>
    %c2_174 = arith.constant 2 : index
    %c0_175 = arith.constant 0 : index
    %c0_176 = arith.constant 0 : index
    %193 = vector.load %arg8[%c2_174, %c0_175, %c0_176] : memref<3x1x128xf32, #tpu.memory_space<vmem>>, vector<1x1x128xf32>
    %194 = vector.shape_cast %193 : vector<1x1x128xf32> to vector<1x128xf32>
    %195 = vector.broadcast %194 : vector<1x128xf32> to vector<64x128xf32>
    %196 = arith.addf %192, %195 : vector<64x128xf32>
    %cst_177 = arith.constant 0.000000e+00 : f32
    %197 = vector.shape_cast %20 : vector<64x1xi1> to vector<64x1xi1>
    %198 = vector.broadcast %197 : vector<64x1xi1> to vector<64x128xi1>
    %199 = vector.broadcast %cst_177 : f32 to vector<64x128xf32>
    %200 = arith.select %198, %196, %199 : vector<64x128xi1>, vector<64x128xf32>
    %201 = arith.addf %142, %200 : vector<64x128xf32>
    %202 = vector.extract_strided_slice %201 {offsets = [16, 0], sizes = [32, 128], strides = [1, 1]} : vector<64x128xf32> to vector<32x128xf32>
    %c0_178 = arith.constant 0 : index
    %c0_179 = arith.constant 0 : index
    %c0_180 = arith.constant 0 : index
    %203 = vector.load %arg9[%c0_178, %c0_179, %c0_180] : memref<1x32x128xf32, #tpu.memory_space<vmem>>, vector<1x32x128xf32>
    %204 = vector.shape_cast %203 : vector<1x32x128xf32> to vector<32x128xf32>
    %205 = vector.shape_cast %202 : vector<32x128xf32> to vector<1x32x128xf32>
    tpu.vector_store %arg9[%c0_178, %c0_179, %c0_180], %205 {strides = array<i32>} : memref<1x32x128xf32, #tpu.memory_space<vmem>>, vector<1x32x128xf32>,
    return
  }
  func.func @transform_0(%arg0: i32, %arg1: i32) -> (i32, i32, i32) {
    %c0_i32 = arith.constant 0 : i32
    %c0_i32_0 = arith.constant 0 : i32
    return %arg0, %arg1, %c0_i32 : i32, i32, i32
  }
  func.func @transform_1(%arg0: i32, %arg1: i32) -> (i32, i32, i32) {
    %c2_i32 = arith.constant 2 : i32
    %0 = arith.muli %arg1, %c2_i32 : i32
    %c1_i32 = arith.constant 1 : i32
    %1 = arith.subi %0, %c1_i32 : i32
    %c0_i32 = arith.constant 0 : i32
    %2 = arith.maxsi %1, %c0_i32 : i32
    %c0_i32_0 = arith.constant 0 : i32
    %c0_i32_1 = arith.constant 0 : i32
    return %arg0, %2, %c0_i32_0 : i32, i32, i32
  }
  func.func @transform_2(%arg0: i32, %arg1: i32) -> (i32, i32, i32) {
    %c1_i32 = arith.constant 1 : i32
    %0 = arith.addi %arg1, %c1_i32 : i32
    %c2_i32 = arith.constant 2 : i32
    %1 = arith.muli %0, %c2_i32 : i32
    %c4_i32 = arith.constant 4 : i32
    %2 = arith.minsi %1, %c4_i32 : i32
    %c0_i32 = arith.constant 0 : i32
    %c0_i32_0 = arith.constant 0 : i32
    return %arg0, %2, %c0_i32 : i32, i32, i32
  }
  func.func @transform_3(%arg0: i32, %arg1: i32) -> (i32, i32, i32, i32) {
    %c0_i32 = arith.constant 0 : i32
    %c0_i32_0 = arith.constant 0 : i32
    %c0_i32_1 = arith.constant 0 : i32
    %c0_i32_2 = arith.constant 0 : i32
    %c0_i32_3 = arith.constant 0 : i32
    return %c0_i32, %c0_i32_0, %c0_i32_1, %c0_i32_2 : i32, i32, i32, i32
  }
  func.func @transform_4(%arg0: i32, %arg1: i32) -> (i32, i32, i32) {
    %c0_i32 = arith.constant 0 : i32
    %c0_i32_0 = arith.constant 0 : i32
    %c0_i32_1 = arith.constant 0 : i32
    %c0_i32_2 = arith.constant 0 : i32
    return %c0_i32, %c0_i32_0, %c0_i32_1 : i32, i32, i32
  }
  func.func @transform_5(%arg0: i32, %arg1: i32) -> (i32, i32, i32, i32) {
    %c0_i32 = arith.constant 0 : i32
    %c0_i32_0 = arith.constant 0 : i32
    %c0_i32_1 = arith.constant 0 : i32
    %c0_i32_2 = arith.constant 0 : i32
    %c0_i32_3 = arith.constant 0 : i32
    return %c0_i32, %c0_i32_0, %c0_i32_1, %c0_i32_2 : i32, i32, i32, i32
  }
  func.func @transform_6(%arg0: i32, %arg1: i32) -> (i32, i32, i32) {
    %c0_i32 = arith.constant 0 : i32
    %c0_i32_0 = arith.constant 0 : i32
    %c0_i32_1 = arith.constant 0 : i32
    %c0_i32_2 = arith.constant 0 : i32
    return %c0_i32, %c0_i32_0, %c0_i32_1 : i32, i32, i32
  }
  func.func @transform_7(%arg0: i32, %arg1: i32) -> (i32, i32, i32) {
    %c0_i32 = arith.constant 0 : i32
    %c0_i32_0 = arith.constant 0 : i32
    return %arg0, %arg1, %c0_i32 : i32, i32, i32
  }
}

</mosaic_0001>

<bundles_post_ra>
// kernel: tpu_custom_call.1
= control target key start
LH: loop header
LB: loop body
LE: loop exit
PB: predicated region body
PF: predicated region fallthrough
CT: control target
= control target key end

     0   :  { %s6840_s0 = inlined_call_operand.hbm [shape: f32[2,72,128], index: 0, kind: input, shape index: {}]   ;;  %s6841_s1 = inlined_call_operand.hbm [shape: f32[2,72,128], index: 1, kind: input, shape index: {}]   ;;  %s6842_s2 = inlined_call_operand.hbm [shape: f32[2,72,128], index: 2, kind: input, shape index: {}]   ;;  %s6843_s3 = inlined_call_operand.hbm [shape: bf16[3,3,128,128], index: 3, kind: input, shape index: {}]   ;;  %s6844_s4 = inlined_call_operand.vmem [shape: f32[3,1,128], index: 4, kind: input, shape index: {}]   ;;  %s6845_s5 = inlined_call_operand.hbm [shape: bf16[3,3,128,128], index: 5, kind: input, shape index: {}]   ;;  %s6846_s6 = inlined_call_operand.vmem [shape: f32[3,1,128], index: 6, kind: input, shape index: {}]   ;;  %s6847_s7 = inlined_call_operand.hbm [shape: f32[2,72,128], index: 7, kind: output, shape index: {}]  }
   0x1   :  { %6874 = sst [smem:[#allocation35_spill]] %s6844_s4 }
   0x2   :  { %6875 = sst [smem:[#allocation36_spill]] %s6846_s6 }
   0x3   :  { %6876 = sst [smem:[#allocation37_spill]] %s6847_s7 }
   0x4   :  { %12 = vsyncpa [#allocation4], 0 }
   0x5   :  { %14 = vsyncpa [#allocation4 + $0x1], 0 }
   0x6   :  { %15 = vsyncpa [#allocation7], 0 }
   0x7   :  { %17 = vsyncpa [#allocation7 + $0x1], 0 }
   0x8   :  { %18 = vsyncpa [#allocation10], 0 }
   0x9   :  { %19 = vsyncpa [#allocation5], 0 }
   0xa   :  { %21 = vsyncpa [#allocation5 + $0x1], 0  ;;  %s5829_s24 = smov 0   ;;  %s5831_s25 = smov 0  }
   0xb   :  { %s5833_s26 = smov 0   ;;  %s5835_s27 = smov 0  }
   0xc   :  { %s5837_s28 = smov 0   ;;  %s5839_s29 = smov 0  }
   0xd   :  { %s5841_s30 = smov 0   ;;  %s5843_s8 = smov 0  }
   0xe   :  { %s5845_s9 = smov 0   ;;  %s5847_s10 = smov 0  }
   0xf   :  { %s5849_s11 = smov 0   ;;  %s5851_s12 = smov 0  }
  0x10   :  { %s5853_s13 = smov 0   ;;  %s5855_s14 = smov 0  }
  0x11 LB: > { %6877 = sst [smem:[#allocation18_spill]] %s5722_s25  ;;  %s5900_s15 = sadd.s32 4294967295, %s5770_s14   ;;  %s5770_s14 = sphi %s5855_s14, %s27_s14   ;;  %s5766_s13 = sphi %s5853_s13, %s6974_s13   ;;  %s5762_s12 = sphi %s5851_s12, %s6973_s12   ;;  %s5758_s11 = sphi %s5849_s11, %s6972_s11   ;;  %s5754_s10 = sphi %s5847_s10, %s6971_s10   ;;  %s5750_s9 = sphi %s5845_s9, %s6970_s9   ;;  %s5746_s8 = sphi %s5843_s8, %s6969_s8   ;;  %s5742_s30 = sphi %s5841_s30, %s6968_s30   ;;  %s5738_s29 = sphi %s5839_s29, %s6967_s29   ;;  %s5734_s28 = sphi %s5837_s28, %s6966_s28   ;;  %s5730_s27 = sphi %s5835_s27, %s6957_s27   ;;  %s5726_s26 = sphi %s5833_s26, %s6965_s26   ;;  %s5722_s25 = sphi %s5831_s25, %s6964_s25   ;;  %s5718_s24 = sphi %s5829_s24, %s6955_s24  }
  0x12   : > { %6878 = sst [smem:[#allocation19_spill]] %s5734_s28  ;;  %s36_s17 = sadd.s32 1, %s5762_s12 }
  0x13   : > { %6879 = sst [smem:[#allocation20_spill]] %s5742_s30  ;;  %s39_s18 = sadd.s32 1, %s5766_s13 }
  0x14   : > { %6880 = sst [smem:[#allocation21_spill]] %s5746_s8  ;;  %p37_p0 = scmp.ge.s32.totalorder %s36_s17, 3 }
  0x15   : > { %6881 = sst [smem:[#allocation22_spill]] %s5754_s10  ;;  %s48_s19 = sadd.s32 1, %s5750_s9 }
  0x16   : > { %6882 = sst [smem:[#allocation23_spill]] %s5758_s11  ;;  %p6856_p1 = scmp.ne.s32.totalorder %s5750_s9, %s5746_s8 }
  0x17   : > { %6883 = sst [smem:[#allocation24_spill]] %s5900_s15  ;;  %p56_p2 = scmp.eq.s32.totalorder %s5770_s14, 0 }
  0x18   : > { %s6976_s17 = smov (%p37_p0, %s36_s17), 0  ;;  %s6978_s18 = smov (!%p37_p0, %s39_s18), %s5766_s13 }
  0x19   : > { %6884 = sst [smem:[#allocation25_spill]] %s6976_s17  ;;  %s44_s20 = ssub.s32 %s5762_s12, %s6976_s17 }
  0x1a   : > { %p5919_p3 = por %p56_p2, %p6856_p1  ;;  %p41_p4 = scmp.ge.s32.totalorder %s6978_s18, 2 }
  0x1b   : > { %p6855_p5 = scmp.ne.s32.totalorder %s5746_s8, %s5742_s30  ;;  %p6860_p6 = scmp.eq.s32.totalorder %s5900_s15, 0 }
  0x1c   : > { %s6885_s21 = scalar_select %p5919_p3, 1, 0 }
  0x1d   : > { %s4229_s22 = sshll.u32 %s5762_s12, 1  ;;  %s6980_s18 = smov (%p41_p4, %s6978_s18), 0 }
  0x1e   : > { %6886 = sst [smem:[#allocation26_spill]] %s6980_s18  ;;  %p5934_p7 = por %p6860_p6, %p6855_p5 }
  0x1f   : > { %s4230_s16 = sadd.s32 4294967295, %s4229_s22  ;;  %s5940_s7 = ssub.s32 %s5766_s13, %s6980_s18 }
  0x20   : > { %s6887_s23 = scalar_select %p5934_p7, 1, 0 }
  0x21   : > { %p73_p8 = scmp.gt.s32.totalorder %s4230_s16, 0  ;;  %s45_s11 = sor.u32 %s44_s20, %s5940_s7 }
  0x22   : > { %6888 = sst [smem:[#allocation27_spill]] %s6887_s23  ;;  %s4231_s6 = sshll.u32 %s6976_s17, 1 }
  0x23   : > { %p46_p9 = scmp.eq.s32.totalorder %s45_s11, 0  ;;  %s4232_s4 = sadd.s32 4294967295, %s4231_s6 }
  0x24   : > { %s6982_s16 = smov (!%p73_p8, %s4230_s16), 0  ;;  %p77_p10 = scmp.gt.s32.totalorder %s4232_s4, 0 }
  0x25   : > { %s5947_s10 = scalar_select %p46_p9, %s5750_s9, %s48_s19  }
  0x26   : > { %s84_s23 = sadd.s32 1, %s5738_s29  ;;  %p91_p11 = scmp.ne.s32.totalorder %s5738_s29, %s5734_s28 }
  0x27   : > { %6889 = sst [smem:[#allocation28_spill]] %s5947_s10  ;;  %p97_p12 = scmp.ne.s32.totalorder %s5734_s28, %s5730_s27 }
  0x28   : > { %s6984_s4 = smov (!%p77_p10, %s4232_s4), 0  ;;  %p5956_p13 = por %p91_p11, %p56_p2 }
  0x29   : > { %p5962_p0 = por %p97_p12, %p6860_p6  ;;  %s80_s20 = ssub.s32 %s6982_s16, %s6984_s4 }
  0x2a   : > { %s6890_s11 = scalar_select %p5956_p13, 1, 0 }
  0x2b   : > { %s6891_s19 = scalar_select %p5962_p0, 1, 0 }
  0x2c   : > { %s4436_s18 = sadd.s32 2, %s4229_s22  ;;  %s81_s17 = sor.u32 %s80_s20, %s5940_s7 }
  0x2d   : > { %6892 = sst [smem:[#allocation29_spill]] %s6891_s19  ;;  %p109_p4 = scmp.lt.s32.totalorder %s4436_s18, 4 }
  0x2e   : > { %p82_p8 = scmp.eq.s32.totalorder %s81_s17, 0  ;;  %s4438_s27 = sadd.s32 2, %s4231_s6 }
  0x2f   : > { %s6986_s18 = smov (!%p109_p4, %s4436_s18), 4  ;;  %p113_p9 = scmp.lt.s32.totalorder %s4438_s27, 4 }
  0x30   : > { %s5971_s10 = scalar_select %p82_p8, %s5738_s29, %s84_s23  }
  0x31   : > { %s120_s4 = sadd.s32 1, %s5726_s26  ;;  %p127_p10 = scmp.ne.s32.totalorder %s5726_s26, %s5722_s25 }
  0x32   : > { %6893 = sst [smem:[#allocation30_spill]] %s5971_s10  ;;  %p133_p11 = scmp.ne.s32.totalorder %s5722_s25, %s5718_s24 }
  0x33   : > { %s6988_s27 = smov (!%p113_p9, %s4438_s27), 4  ;;  %p5980_p12 = por %p127_p10, %p56_p2 }
  0x34   : > { %p5986_p5 = por %p133_p11, %p6860_p6  ;;  %s116_s22 = ssub.s32 %s6986_s18, %s6988_s27 }
  0x35   : > { %s6894_s17 = scalar_select %p5980_p12, 1, 0 }
  0x36   : > { %s6895_s6 = scalar_select %p5986_p5, 1, 0 }
  0x37   : > { %p243_p4 = scmp.eq.s32.totalorder %s5900_s15, 5  ;;  %s117_s23 = sor.u32 %s116_s22, %s5940_s7 }
  0x38   : > { %6896 = sst [smem:[#allocation31_spill]] %s6895_s6  ;;  %s6897_s20 = sadd.s32 4294967294, %s5770_s14  }
  0x39   : > { %p249_p8 = scmp.eq.s32.totalorder %s6897_s20, 5  ;;  %p118_p1 = scmp.eq.s32.totalorder %s117_s23, 0 }
  0x3a   : > { %p6898_p0 = scmp.ne.s32.totalorder %s5750_s9, %s5746_s8  ;;  %p6901_p2 = scmp.ne.s32.totalorder %s5746_s8, %s5742_s30 }
  0x3b   : > { %p4235_p10 = scmp.ge.s32.totalorder %s5770_s14, 1  ;;  %p256_p11 = scmp.lt.s32.totalorder %s5770_s14, 7 }
  0x3c   : > { %p5998_p7 = por %p243_p4, %p6898_p0  ;;  %p6005_p9 = por %p249_p8, %p6901_p2 }
  0x3d   : > { %s6011_s25 = scalar_select %p118_p1, %s5726_s26, %s120_s4  }
  0x3e   : > { %s6899_s24 = scalar_select %p5998_p7, 1, 0 }
  0x3f   : > { %s6902_s10 = scalar_select %p6005_p9, 1, 0 }
  0x40   : > { %6900 = sst [smem:[#allocation32_spill]] %s6899_s24  ;;  %p6014_p6 = pnand %p4235_p10, %p256_p11 }
  0x41   : > { %6903 = sst [smem:[#allocation33_spill]] %s6902_s10  ;;  %s5772_s7 = smov [#allocation9]  }
  0x42   : > { %6904 = sst [smem:[#allocation34_spill]] %s6011_s25  ;;  %s268_s22 = sshll.u32 %s5772_s7, 4  ;;  %s269_s22 = int_to_ptr.vmem [resolvable:$true] %s268_s22 }
  0x43   : > { %s6905_s27 = scalar_select %p6014_p6, 1, 0 }
  0x44   : > { %p5185_p0 = pneg %p6014_p6  ;;  %s5773_s23 = smov [#allocation11]  }
  0x45   : > { %s284_s20 = sshll.u32 %s5773_s23, 4  ;;  %p6906_p4 = scmp.eq.s32.totalorder %s5900_s15, 0  ;;  %s6026_s20 = int_to_ptr.vmem [resolvable:$true] %s284_s20 }
  0x46   : > { %s5470_s10 = scalar_lea.hbm %s6843_s3, 9216 }
  0x47   : > { %p6022_p8 = pnand %p5185_p0, %p6906_p4  ;;  %p5471_p1 = scmp.ne.s32.totalorder %s6843_s3, %s5470_s10 }
  0x48   : > { %p5477_p0 = scmp.lt.u32.totalorder %s5470_s10, %s6843_s3 }
  0x49   : > { %p5472_p2 = pneg %p6022_p8 }
  0x4b   : > { %p5473_p10 = pnand %p5472_p2, %p5471_p1 }
  0x4d   : > { %p5474_p11 = pneg %p5473_p10 }
  0x4f   : > { %p5479_p4 = pnand %p5477_p0, %p5474_p11 }
  0x51   : > { %5482 = shalt.err (!%p5479_p4)
}
  0x52   : > { %s5483_s19 = scalar_lea.vmem %s269_s22, 9216  ;;  %p5491_p6 = scmp.lt.s32.totalorder %s269_s22, %s269_s22 }
  0x53   : > { %p5484_p9 = scmp.ne.s32.totalorder %s269_s22, %s5483_s19  ;;  %p5492_p12 = scmp.lt.s32.totalorder %s5483_s19, %s5483_s19 }
  0x55   : > { %p5486_p7 = pnand %p5484_p9, %p5472_p2  ;;  %p5493_p13 = por %p5492_p12, %p5491_p6 }
  0x57   : > { %p5487_p5 = pneg %p5486_p7 }
  0x59   : > { %p5494_p3 = pnand %p5493_p13, %p5487_p5 }
  0x5b   : > { %5497 = shalt.err (!%p5494_p3)
}
  0x5c   : > { %s5774_s25 = smov 64   ;;  %s5775_s24 = smov 4  }
  0x5d   : > { %5188 = dma.hbm_to_vmem [thread:$0]  (!%p6022_p8), %s6843_s3, 9216, %s269_s22, [#allocation10], %s5774_s25, %s5774_s25, %s5775_s24  }
  0x5e   : > { %s5498_s23 = scalar_lea.hbm %s6845_s5, 9216 }
  0x5f   : > { %p5499_p7 = scmp.ne.s32.totalorder %s6845_s5, %s5498_s23  ;;  %p5505_p6 = scmp.lt.u32.totalorder %s5498_s23, %s6845_s5 }
  0x61   : > { %p5501_p3 = pnand %p5499_p7, %p5472_p2 }
  0x63   : > { %p5502_p5 = pneg %p5501_p3 }
  0x65   : > { %p5507_p13 = pnand %p5505_p6, %p5502_p5 }
  0x67   : > { %5510 = shalt.err (!%p5507_p13)
}
  0x68   : > { %s5511_s22 = scalar_lea.vmem %s6026_s20, 9216  ;;  %p5519_p10 = scmp.lt.s32.totalorder %s6026_s20, %s6026_s20 }
  0x69   : > { %p5512_p12 = scmp.ne.s32.totalorder %s6026_s20, %s5511_s22  ;;  %p5520_p11 = scmp.lt.s32.totalorder %s5511_s22, %s5511_s22 }
  0x6b   : > { %p5514_p9 = pnand %p5512_p12, %p5472_p2  ;;  %p5521_p0 = por %p5520_p11, %p5519_p10 }
  0x6d   : > { %p5515_p1 = pneg %p5514_p9 }
  0x6f   : > { %p5522_p4 = pnand %p5521_p0, %p5515_p1 }
  0x71   : > { %5525 = shalt.err (!%p5522_p4)
}
  0x72   : > { %5191 = dma.hbm_to_vmem [thread:$0]  (!%p6022_p8), %s6845_s5, 9216, %s6026_s20, [#allocation10], %s5774_s25, %s5774_s25, %s5775_s24  }
  0x73   : > { %p4238_p7 = scmp.ge.s32.totalorder %s5770_s14, 6 }
  0x74   : > { %p6908_p3 = scmp.ne.s32.totalorder (!%p4238_p7), %s6885_s21, 0 }
  0x75   : > { %297 = sbr.rel (%p4238_p7) target bundleno = 231 (0xe7), region = 32 }
  0x7c   : > { %300 = sbr.rel (!%p6908_p3) target bundleno = 161 (0xa1), region = 36  ;;  %s301_s15 = sand.u32 (%p6908_p3), 1, %s5750_s9  }
  0x7d   : > { %s4240_s10 = sshll.u32 (%p6908_p3), %s5762_s12, 2  ;;  %s4239_s6 = sshll.u32 (%p6908_p3), %s301_s15, 5 }
  0x7e   : > { %s307_s4 = ssub.s32 (%p6908_p3), 9, %s4240_s10  ;;  %s6083_s23 = scalar_lea.sflag (%p6908_p3), [#allocation4], %s301_s15 }
  0x7f   : > { %p308_p2 = scmp.lt.s32.totalorder (%p6908_p3), %s307_s4, 4  ;;  %s305_s20 = scalar_lea.vmem (%p6908_p3), [#allocation3], %s4239_s6 }
  0x83   : > { %s6990_s4 = smov (!%p308_p2, %s307_s4), 4 }
  0x84   : > { %s6080_s30 = sshll.u32 %s6990_s4, 7 }
  0x85   : > { %s312_s7 = ssub.s32 512, %s6080_s30 }
  0x86   : > { %313 = vsyncadd %s6083_s23, %s312_s7  ;;  %p4242_p8 = scmp.ne.s32.totalorder %s6080_s30, 0  ;;  %s5169_s21 = smul.u32 9, %s5766_s13 }
  0x87   : > { %s320_s25 = sshll.u32 %s305_s20, 4  ;;  %s6088_s25 = int_to_ptr.vmem [resolvable:$true] %s320_s25 }
  0x88   : > { %s316_s24 = sadd.s32 %s5169_s21, %s4240_s10  ;;  %s5530_s10 = scalar_lea.hbm %s6840_s0, 2304 }
  0x89   : > { %s4243_s19 = sshll.u32 %s316_s24, 7 }
  0x8a   : > { %s6093_s8 = scalar_lea.hbm %s6840_s0, %s4243_s19 }
  0x8b   : > { %s5526_s15 = scalar_lea.hbm %s6093_s8, %s6080_s30  ;;  %p5531_p12 = scmp.lt.u32.totalorder %s6093_s8, %s6840_s0 }
  0x8c   : > { %p5527_p5 = scmp.ne.s32.totalorder %s6093_s8, %s5526_s15  ;;  %p5532_p9 = scmp.lt.u32.totalorder %s5530_s10, %s5526_s15 }
  0x8d   : > { %p5534_p10 = scmp.lt.u32.totalorder %s5526_s15, %s6093_s8 }
  0x8e   : > { %p5528_p6 = pnand %p5527_p5, %p4242_p8  ;;  %p5533_p1 = por %p5532_p9, %p5531_p12 }
  0x90   : > { %p5529_p13 = pneg %p5528_p6  ;;  %p5535_p11 = por %p5534_p10, %p5533_p1 }
  0x92   : > { %p5536_p0 = pnand %p5535_p11, %p5529_p13 }
  0x94   : > { %5539 = shalt.err (!%p5536_p0)
}
  0x95   : > { %s5540_s21 = scalar_lea.vmem %s6088_s25, %s6080_s30  ;;  %s5776_s24 = smov [#allocation3]  }
  0x96   : > { %p5541_p4 = scmp.ne.s32.totalorder %s6088_s25, %s5540_s21  ;;  %s5544_s19 = sshll.u32 %s5776_s24, 4  ;;  %s5545_s19 = int_to_ptr.vmem [resolvable:$false] %s5544_s19 }
  0x97   : > { %s5546_s22 = scalar_lea.vmem %s5545_s19, 1024  ;;  %p5547_p2 = scmp.lt.s32.totalorder %s6088_s25, %s5545_s19 }
  0x98   : > { %p5542_p7 = pnand %p5541_p4, %p4242_p8  ;;  %p5548_p5 = scmp.lt.s32.totalorder %s5546_s22, %s5540_s21 }
  0x9a   : > { %p5543_p3 = pneg %p5542_p7  ;;  %p5549_p6 = por %p5548_p5, %p5547_p2 }
  0x9c   : > { %p5550_p12 = pnand %p5549_p6, %p5543_p3 }
  0x9e   : > { %5553 = shalt.err (!%p5550_p12)
}
  0x9f   : > { %s5777_s28 = smov 128   ;;  %s5778_s15 = smov 8  }
  0xa0   : > { %326 = dma.hbm_to_vmem [thread:$0]  (%p4242_p8), %s6093_s8, %s6080_s30, %s6088_s25, %s6083_s23, %s5777_s28, %s5777_s28, %s5778_s15  }
  0xa1 PF: > { %p6909_p13 = scmp.ne.s32.totalorder %s6890_s11, 0 }
  0xa2   : > { %s330_s6 = sand.u32 (%p6909_p13), 1, %s5770_s14   ;;  %s332_s4 = sand.u32 (%p6909_p13), 1, %s5738_s29  }
  0xa3   : > { %329 = sbr.rel (!%p6909_p13) target bundleno = 192 (0xc0), region = 40  ;;  %s4246_s10 = sshll.u32 (%p6909_p13), %s332_s4, 4 }
  0xa4   : > { %s4249_s7 = sshll.u32 (%p6909_p13), %s6982_s16, 1  ;;  %s6125_s20 = scalar_lea.sflag (%p6909_p13), [#allocation7], %s330_s6 }
  0xa5   : > { %s334_s21 = scalar_lea.vmem (%p6909_p13), [#allocation6], %s4246_s10  ;;  %s5170_s24 = smul.u32 (%p6909_p13), 9, %s5766_s13 }
  0xa6   : > { %s353_s19 = sshll.u32 (%p6909_p13), %s334_s21, 4  ;;  %s5558_s4 = scalar_lea.hbm (%p6909_p13), %s6841_s1, 2304  ;;  %s6128_s19 = int_to_ptr.vmem [resolvable:$true] %s353_s19 }
  0xa7   : > { %s349_s22 = sadd.s32 (%p6909_p13), %s5170_s24, %s4249_s7 }
  0xa8   : > { %s4252_s30 = sshll.u32 (%p6909_p13), %s349_s22, 7 }
  0xa9   : > { %s351_s25 = scalar_lea.hbm (%p6909_p13), %s6841_s1, %s4252_s30 }
  0xaa   : > { %s5554_s8 = scalar_lea.hbm %s351_s25, 256  ;;  %p5559_p9 = scmp.lt.u32.totalorder %s351_s25, %s6841_s1 }
  0xab   : > { %p5555_p8 = scmp.ne.s32.totalorder %s351_s25, %s5554_s8  ;;  %p5560_p1 = scmp.lt.u32.totalorder %s5558_s4, %s5554_s8 }
  0xac   : > { %p5562_p11 = scmp.lt.u32.totalorder %s5554_s8, %s351_s25 }
  0xad   : > { %p5561_p10 = por %p5560_p1, %p5559_p9 }
  0xaf   : > { %p5563_p0 = por %p5562_p11, %p5561_p10 }
  0xb1   : > { %p5564_p4 = pnand %p5563_p0, %p5555_p8 }
  0xb3   : > { %5567 = shalt.err (!%p5564_p4)
}
  0xb4   : > { %s5568_s10 = scalar_lea.vmem %s6128_s19, 256  ;;  %s5779_s7 = smov [#allocation6]  }
  0xb5   : > { %p5569_p7 = scmp.ne.s32.totalorder %s6128_s19, %s5568_s10  ;;  %s5572_s21 = sshll.u32 %s5779_s7, 4  ;;  %s5573_s21 = int_to_ptr.vmem [resolvable:$false] %s5572_s21 }
  0xb6   : > { %s5574_s24 = scalar_lea.vmem %s5573_s21, 512  ;;  %p5575_p3 = scmp.lt.s32.totalorder %s6128_s19, %s5573_s21 }
  0xb7   : > { %p5576_p2 = scmp.lt.s32.totalorder %s5574_s24, %s5568_s10 }
  0xb9   : > { %p5577_p5 = por %p5576_p2, %p5575_p3 }
  0xbb   : > { %p5578_p6 = pnand %p5577_p5, %p5569_p7 }
  0xbd   : > { %5581 = shalt.err (!%p5578_p6)
}
  0xbe   : > { %s5780_s22 = smov 128   ;;  %s5781_s30 = smov 8  }
  0xbf   : > { %359 = dma.hbm_to_vmem [thread:$0]  %s351_s25, 256, %s6128_s19, %s6125_s20, %s5780_s22, %s5780_s22, %s5781_s30  }
  0xc0 PF: > { %p6910_p12 = scmp.ne.s32.totalorder %s6894_s17, 0 }
  0xc1   : > { %s363_s23 = sand.u32 (%p6910_p12), 1, %s5770_s14   ;;  %s365_s11 = sand.u32 (%p6910_p12), 1, %s5726_s26  }
  0xc2   : > { %362 = sbr.rel (!%p6910_p12) target bundleno = 231 (0xe7), region = 44  ;;  %s4255_s8 = sshll.u32 (%p6910_p12), %s365_s11, 4 }
  0xc3   : > { %s4257_s28 = sshll.u32 (%p6910_p12), %s6986_s18, 1  ;;  %s6152_s6 = scalar_lea.sflag (%p6910_p12), [#allocation7], %s363_s23 }
  0xc4   : > { %s373_s15 = ssub.s32 (%p6910_p12), 9, %s4257_s28  ;;  %s367_s20 = scalar_lea.vmem (%p6910_p12), [#allocation8], %s4255_s8 }
  0xc5   : > { %p374_p13 = scmp.lt.s32.totalorder (%p6910_p12), %s373_s15, 2 }
  0xc9   : > { %s6992_s15 = smov (!%p374_p13, %s373_s15), 2 }
  0xca   : > { %s6149_s4 = sshll.u32 %s6992_s15, 7 }
  0xcb   : > { %s378_s16 = ssub.s32 256, %s6149_s4 }
  0xcc   : > { %379 = vsyncadd %s6152_s6, %s378_s16  ;;  %p4259_p8 = scmp.ne.s32.totalorder %s6149_s4, 0  ;;  %s5171_s17 = smul.u32 9, %s5766_s13 }
  0xcd   : > { %s386_s19 = sshll.u32 %s367_s20, 4  ;;  %s5586_s23 = scalar_lea.hbm %s6842_s2, 2304  ;;  %s6157_s19 = int_to_ptr.vmem [resolvable:$true] %s386_s19 }
  0xce   : > { %s382_s18 = sadd.s32 %s5171_s17, %s4257_s28 }
  0xcf   : > { %s4260_s25 = sshll.u32 %s382_s18, 7 }
  0xd0   : > { %s6162_s21 = scalar_lea.hbm %s6842_s2, %s4260_s25 }
  0xd1   : > { %s5582_s24 = scalar_lea.hbm %s6162_s21, %s6149_s4  ;;  %p5587_p11 = scmp.lt.u32.totalorder %s6162_s21, %s6842_s2 }
  0xd2   : > { %p5583_p9 = scmp.ne.s32.totalorder %s6162_s21, %s5582_s24  ;;  %p5588_p0 = scmp.lt.u32.totalorder %s5586_s23, %s5582_s24 }
  0xd3   : > { %p5590_p7 = scmp.lt.u32.totalorder %s5582_s24, %s6162_s21 }
  0xd4   : > { %p5584_p1 = pnand %p5583_p9, %p4259_p8  ;;  %p5589_p4 = por %p5588_p0, %p5587_p11 }
  0xd6   : > { %p5585_p10 = pneg %p5584_p1  ;;  %p5591_p3 = por %p5590_p7, %p5589_p4 }
  0xd8   : > { %p5592_p2 = pnand %p5591_p3, %p5585_p10 }
  0xda   : > { %5595 = shalt.err (!%p5592_p2)
}
  0xdb   : > { %s5596_s28 = scalar_lea.vmem %s6157_s19, %s6149_s4  ;;  %s5782_s15 = smov [#allocation8]  }
  0xdc   : > { %p5597_p5 = scmp.ne.s32.totalorder %s6157_s19, %s5596_s28  ;;  %s5600_s16 = sshll.u32 %s5782_s15, 4  ;;  %s5601_s16 = int_to_ptr.vmem [resolvable:$false] %s5600_s16 }
  0xdd   : > { %s5602_s20 = scalar_lea.vmem %s5601_s16, 512  ;;  %p5603_p13 = scmp.lt.s32.totalorder %s6157_s19, %s5601_s16 }
  0xde   : > { %p5598_p6 = pnand %p5597_p5, %p4259_p8  ;;  %p5604_p9 = scmp.lt.s32.totalorder %s5602_s20, %s5596_s28 }
  0xe0   : > { %p5599_p12 = pneg %p5598_p6  ;;  %p5605_p1 = por %p5604_p9, %p5603_p13 }
  0xe2   : > { %p5606_p11 = pnand %p5605_p1, %p5599_p12 }
  0xe4   : > { %5609 = shalt.err (!%p5606_p11)
}
  0xe5   : > { %s5783_s17 = smov 128   ;;  %s5784_s18 = smov 8  }
  0xe6   : > { %392 = dma.hbm_to_vmem [thread:$0]  (%p4259_p8), %s6162_s21, %s6149_s4, %s6157_s19, %s6152_s6, %s5783_s17, %s5783_s17, %s5784_s18  }
  0xe7 PF: > { %p6911_p10 = scmp.ne.s32.totalorder %s6905_s27, 0 }
  0xe8   : > { %s6912_s25 = sld [smem:[#allocation21_spill]] (!%p6911_p10)  ;;  %s6913_s10 = sld [smem:[#allocation27_spill]] (!%p6911_p10) }
  0xe9   : > { %398 = sbr.rel (%p6911_p10) target bundleno = 2138 (0x85a), region = 48 }
  0xee   : > { %s6192_s7 = sand.u32 (!%p6911_p10), 1, %s6912_s25   ;;  %p6914_p0 = scmp.ne.s32.totalorder (!%p6911_p10), %s6913_s10, 0 }
  0xef   : > { %s4264_s24 = sshll.u32 (!%p6911_p10), %s6192_s7, 5  ;;  %s401_s22 = scalar_lea.sflag (!%p6911_p10), [#allocation4], %s6192_s7 }
  0xf0   : > { %s6198_s30 = scalar_lea.vmem [#allocation3], %s4264_s24 }
  0xf1   : > { %5695 = dma.done.wait (%p6914_p0), %s401_s22, 512  }
  0xf2   : > { %5697 = vsyncadd (%p6914_p0), %s401_s22, 4294966784  ;;  %s6915_s4 = sld [smem:[#allocation24_spill]]  ;;  %s6916_s27 = sld [smem:[#allocation19_spill]] }
  0xf3   : > { %s6917_s6 = sld [smem:[#allocation29_spill]] }
  0xf8   : > { %s409_s19 = sand.u32 1, %s6915_s4   ;;  %s411_s21 = sand.u32 1, %s6916_s27  }
  0xf9   : > { %s6206_s23 = sshll.u32 %s411_s21, 4  ;;  %s410_s11 = scalar_lea.sflag [#allocation7], %s409_s19 }
  0xfa   : > { %s413_s8 = scalar_lea.vmem [#allocation6], %s6206_s23  ;;  %p6918_p8 = scmp.ne.s32.totalorder %s6917_s6, 0 }
  0xfc   : > { %5699 = dma.done.wait (%p6918_p8), %s410_s11, 256  }
  0xfd   : > { %5701 = vsyncadd (%p6918_p8), %s410_s11, 4294967040  ;;  %s6919_s28 = sld [smem:[#allocation18_spill]]  ;;  %s6920_s15 = sld [smem:[#allocation31_spill]] }
 0x103   : > { %s420_s16 = sand.u32 1, %s6919_s28   ;;  %p6921_p4 = scmp.ne.s32.totalorder %s6920_s15, 0 }
 0x104   : > { %s6214_s20 = sshll.u32 %s420_s16, 4 }
 0x105   : > { %s422_s17 = scalar_lea.vmem [#allocation8], %s6214_s20 }
 0x106   : > { %5703 = dma.done.wait (%p6921_p4), %s410_s11, 256  }
 0x107   : > { %5705 = vsyncadd (%p6921_p4), %s410_s11, 4294967040  ;;  %p6922_p7 = scmp.eq.s32.totalorder %s6915_s4, 0 }
 0x109   : > { %5707 = dma.done.wait (%p6922_p7), [#allocation10], 18432   ;;  %p6923_p3 = pmov %p6922_p7 }
 0x10a   : > { %s6924_s18 = sld [smem:[#allocation22_spill]]  ;;  %v512_v0 = vlaneseq  ;;  %v5785_v1 = vmov 0   ;;  %v5326_v9 = vld [vmem:[#allocation9 + $0x40] sm:$0xff]   ;;  %v5327_v11 = vld [vmem:[#allocation9 + $0x48] sm:$0xff]   ;;  %v5328_v17 = vld [vmem:[#allocation9 + $0x50] sm:$0xff]   ;;  %s6944_s4 = sld [smem:[#allocation35_spill]] }
 0x10b   : > { %5709 = vsyncadd (%p6923_p3), [#allocation10], 4294948864  ;;  %500 = vst [vmem:[#allocation2] sm:$0xf] %v5785_v1  ;;  %4657 = vmatprep.subr.bf16.mxu0 %v5326_v9  ;;  %v5329_v21 = vld [vmem:[#allocation9 + $0x58] sm:$0xff]   ;;  %v502_v23 = vld [vmem:[%s413_s8] sm:$0xff] }
 0x10c   : > { %501 = vst [vmem:[#allocation2 + $0x20] sm:$0xf0] %v5785_v1  ;;  %v513_v2 = vshrl.u32 %v512_v0, 7  ;;  %4658 = vmatpush3.bf16.msra.mxu0 %v5326_v9  ;;  %v503_v24 = vld [vmem:[%s413_s8 + $0x8] sm:$0xff]  ;;  %v504_v25 = vld [vmem:[%s6198_s30] sm:$0xff]  ;;  %v506_v34 = vld [vmem:[%s6198_s30 + $0x10] sm:$0xff] }
 0x10d   : > { %4659 = vmatprep.subr.bf16.mxu0 %v5327_v11  ;;  %v505_v26 = vld [vmem:[%s6198_s30 + $0x8] sm:$0xff]  ;;  %v5330_v28 = vld [vmem:[#allocation9 + $0x60] sm:$0xff]   ;;  %v507_v35 = vld [vmem:[%s6198_s30 + $0x18] sm:$0xff]  ;;  %s6945_s19 = sld [smem:[#allocation36_spill]] }
 0x10e   : > { %v514_v4 = vadd.s32 8, %v513_v2  ;;  %v515_v5 = vadd.s32 16, %v513_v2  ;;  %v516_v6 = vadd.s32 24, %v513_v2  ;;  %v517_v8 = vadd.s32 32, %v513_v2  ;;  %v5331_v50 = vld [vmem:[#allocation9 + $0x68] sm:$0xff]   ;;  %v5332_v60 = vld [vmem:[#allocation9 + $0x70] sm:$0xff]  }
 0x10f   : > { %v518_v10 = vadd.s32 40, %v513_v2  ;;  %v519_v14 = vadd.s32 48, %v513_v2  ;;  %v520_v16 = vadd.s32 56, %v513_v2  ;;  %v508_v63 = vld [vmem:[%s422_s17] sm:$0xff]  ;;  %v509_v0 = vld [vmem:[%s422_s17 + $0x8] sm:$0xff]  ;;  %s6730_s17 = scalar_lea.vmem [#allocation12], %s4264_s24 }
 0x110   : > { %s4270_s25 = sshll.u32 %s6924_s18, 5  ;;  %4660 = vmatpush3.bf16.msra.mxu0 %v5327_v11  ;;  %s4048_s24 = scalar_lea.sflag [#allocation5], %s6192_s7 }
 0x111   : > { %s4271_s10 = sadd.s32 4294967280, %s4270_s25  ;;  %4661 = vmatprep.subr.bf16.mxu0 %v5328_v17  ;;  %s6946_s18 = sld [smem:[#allocation32_spill]] }
 0x112   : > { %v521_v3 = vstv %s4271_s10 }
 0x113   : > { %v522_v7 = vadd.s32 %v521_v3, %v513_v2  ;;  %v523_v12 = vadd.s32 %v521_v3, %v514_v4  ;;  %v524_v13 = vadd.s32 %v521_v3, %v515_v5  ;;  %v525_v15 = vadd.s32 %v521_v3, %v516_v6 }
 0x114   : > { %v526_v18 = vadd.s32 %v521_v3, %v517_v8  ;;  %v527_v19 = vadd.s32 %v521_v3, %v518_v10  ;;  %v528_v20 = vadd.s32 %v521_v3, %v519_v14  ;;  %v529_v22 = vadd.s32 %v521_v3, %v520_v16  ;;  %4662 = vmatpush3.bf16.msra.mxu0 %v5328_v17  ;;  %v5334_v16 = vld [vmem:[#allocation9] sm:$0xff]  }
 0x115   : > { %vm530_vm0 = vcmp.ge.s32.totalorder %v522_v7, 0  ;;  %vm538_vm1 = vcmp.lt.s32.totalorder %v522_v7, 72  ;;  %vm531_vm2 = vcmp.ge.s32.totalorder %v523_v12, 0  ;;  %vm532_vm3 = vcmp.ge.s32.totalorder %v524_v13, 0  ;;  %4663 = vmatprep.subr.bf16.mxu0 %v5329_v21  ;;  %v5333_v7 = vld [vmem:[#allocation9 + $0x78] sm:$0xff]  }
 0x116   : > { %vm533_vm4 = vcmp.ge.s32.totalorder %v525_v15, 0  ;;  %vm539_vm5 = vcmp.lt.s32.totalorder %v523_v12, 72  ;;  %vm540_vm6 = vcmp.lt.s32.totalorder %v524_v13, 72  ;;  %vm541_vm7 = vcmp.lt.s32.totalorder %v525_v15, 72  ;;  %vm6234_vm10 = vmand %vm530_vm0, %vm538_vm1 }
 0x117   : > { %vm534_vm8 = vcmp.ge.s32.totalorder %v526_v18, 0  ;;  %vm542_vm11 = vcmp.lt.s32.totalorder %v526_v18, 72  ;;  %vm543_vm12 = vcmp.lt.s32.totalorder %v527_v19, 72  ;;  %vm536_vm13 = vcmp.ge.s32.totalorder %v528_v20, 0  ;;  %vm6240_vm14 = vmand %vm531_vm2, %vm539_vm5  ;;  %p6947_p2 = scmp.ne.s32.totalorder %s6946_s18, 0 }
 0x118   : > { %v6246_v30 = vsel %vm6234_vm10, %v502_v23, 0.0  ;;  %vm544_vm0 = vcmp.lt.s32.totalorder %v528_v20, 72  ;;  %vm6250_vm9 = vmand %vm532_vm3, %vm540_vm6  ;;  %v6256_v32 = vsel %vm6240_vm14, %v503_v24, 0.0  ;;  %vm6935_vm15 = vcmp.ge.s32.totalorder %v527_v19, 0  ;;  %4664 = vmatpush3.bf16.msra.mxu0 %v5329_v21  ;;  %s6948_s25 = sld [smem:[#allocation22_spill]] (%p6947_p2) }
 0x119   : > { %vm578_vm2 = vcmp.ge.f32.partialorder %v6246_v30, 0.0  ;;  %v586_v33 = vmul.f32 0.1, %v6246_v30  ;;  %vm6264_vm5 = vmand %vm533_vm4, %vm541_vm7  ;;  %v6270_v37 = vsel %vm6250_vm9, %v504_v25, 0.0  ;;  %vm579_vm3 = vcmp.ge.f32.partialorder %v6256_v32, 0.0  ;;  %4665 = vmatprep.subr.bf16.mxu0 %v5330_v28 }
 0x11a   : > { %v587_v38 = vmul.f32 0.1, %v6256_v32  ;;  %v6276_v39 = vsel %vm6264_vm5, %v505_v26, 0.0  ;;  %vm580_vm6 = vcmp.ge.f32.partialorder %v6270_v37, 0.0  ;;  %v588_v40 = vmul.f32 0.1, %v6270_v37  ;;  %vm6283_vm4 = vmand %vm534_vm8, %vm542_vm11 }
 0x11b   : > { %v594_v41 = vsel %vm578_vm2, %v6246_v30, %v586_v33  ;;  %vm581_vm7 = vcmp.ge.f32.partialorder %v6276_v39, 0.0  ;;  %v589_v43 = vmul.f32 0.1, %v6276_v39  ;;  %vm6292_vm1 = vmand %vm6935_vm15, %vm543_vm12  ;;  %v6298_v46 = vsel %vm6283_vm4, %v506_v34, 0.0 }
 0x11c   : > { %v595_v44 = vsel %vm579_vm3, %v6256_v32, %v587_v38  ;;  %v596_v47 = vsel %vm580_vm6, %v6270_v37, %v588_v40  ;;  %v6303_v49 = vsel %vm6292_vm1, %v507_v35, 0.0  ;;  %vm582_vm8 = vcmp.ge.f32.partialorder %v6298_v46, 0.0  ;;  %vm6312_vm12 = vmand %vm536_vm13, %vm544_vm0  ;;  %4666 = vmatpush3.bf16.msra.mxu0 %v5330_v28 }
 0x11d   : > { %v602_v48 = vpack.c.bf16 %v595_v44, %v594_v41  ;;  %v597_v51 = vsel %vm581_vm7, %v6276_v39, %v589_v43  ;;  %vm583_vm11 = vcmp.ge.f32.partialorder %v6303_v49, 0.0  ;;  %v590_v52 = vmul.f32 0.1, %v6298_v46  ;;  %4667 = vmatprep.subr.bf16.mxu0 %v5331_v50  ;;  %v5335_v43 = vld [vmem:[#allocation9 + $0x8] sm:$0xff]  }
 0x11e   : > { %v591_v53 = vmul.f32 0.1, %v6303_v49  ;;  %v603_v55 = vpack.c.bf16 %v597_v51, %v596_v47  ;;  %vm6940_vm15 = vcmp.lt.s32.totalorder %v529_v22, 72  ;;  %vm6941_vm2 = vcmp.ge.s32.totalorder %v529_v22, 0  ;;  %s4427_s10 = sshll.u32 (%p6947_p2), %s6948_s25, 2 }
 0x11f   : > { %v611_v56 = vrot.slane %v602_v48, 4  ;;  %vm6318_vm3 = vmand %vm6941_vm2, %vm6940_vm15  ;;  %v598_v58 = vsel %vm582_vm8, %v6298_v46, %v590_v52  ;;  %vm610_vm6 = vcmask 1043456   ;;  %v6330_v1 = vsel %vm6312_vm12, %v508_v63, 0.0  ;;  %v5336_v48 = vld [vmem:[#allocation9 + $0x10] sm:$0xff]   ;;  %s4056_s22 = ssub.s32 (%p6947_p2), 9, %s4427_s10 }
 0x120   : > { %v599_v59 = vsel %vm583_vm11, %v6303_v49, %v591_v53  ;;  %v612_v61 = vrot.slane %v603_v55, 4  ;;  %v6334_v3 = vsel %vm6318_vm3, %v509_v0, 0.0  ;;  %vm584_vm13 = vcmp.ge.f32.partialorder %v6330_v1, 0.0  ;;  %4668 = vmatpush3.bf16.msra.mxu0 %v5331_v50  ;;  %p4057_p5 = scmp.lt.s32.totalorder (%p6947_p2), %s4056_s22, 4 }
 0x121   : > { %623 = vst [vmem:[#allocation2] sm:$0xf0] %v611_v56  ;;  %v604_v62 = vpack.c.bf16 %v599_v59, %v598_v58  ;;  %vm585_vm0 = vcmp.ge.f32.partialorder %v6334_v3, 0.0  ;;  %v592_v5 = vmul.f32 0.1, %v6330_v1  ;;  %4669 = vmatprep.subr.bf16.mxu0 %v5332_v60 }
 0x122   : > { %v613_v4 = vsel %vm610_vm6, %v611_v56, %v612_v61  ;;  %v593_v6 = vmul.f32 0.1, %v6334_v3  ;;  %vm798_vm7 = vsmask.f32 4352  ;;  %vm978_vm8 = vsmask.f32 3328 }
 0x123   : > { %v614_v2 = vrot.slane %v604_v62, 4  ;;  %v600_v9 = vsel %vm584_vm13, %v6330_v1, %v592_v5  ;;  %v808_v11 = vshrl.u32 %v613_v4, 16  ;;  %v811_v12 = vshll.u32 %v613_v4, 16 }
 0x124   : > { %v601_v10 = vsel %vm585_vm0, %v6334_v3, %v593_v6  ;;  %v673_v13 = vrot.slane %v613_v4, 4  ;;  %4670 = vmatpush3.bf16.msra.mxu0 %v5332_v60 }
 0x125   : > { %v615_v8 = vsel %vm610_vm6, %v612_v61, %v614_v2  ;;  %v605_v14 = vpack.c.bf16 %v601_v10, %v600_v9  ;;  %4671 = vmatprep.subr.bf16.mxu0 %v5333_v7  ;;  %v810_v24 = vrot.slane %v808_v11, 3  ;;  %v813_v25 = vrot.slane %v811_v12, 4 }
 0x126   : > { %v675_v17 = vrot.slane %v615_v8, 4  ;;  %v817_v19 = vshrl.u32 %v615_v8, 16  ;;  %v820_v34 = vshll.u32 %v615_v8, 16  ;;  %v987_v61 = vrot.slane %v808_v11, 4  ;;  %v5337_v8 = vld [vmem:[#allocation9 + $0x18] sm:$0xff]  }
 0x127   : > { %v616_v21 = vrot.slane %v605_v14, 4  ;;  %v814_v51 = vor.u32 %v813_v25, %v810_v24  ;;  %v988_v62 = vrot.slane %v811_v12, 5  ;;  %v5342_v24 = vld [vmem:[#allocation9 + $0x80] sm:$0xff]  }
 0x128   : > { %v649_v15 = vld [vmem:[#allocation2] sm:$0xf0]  ;;  %4672 = vmatpush3.bf16.msra.mxu0 %v5333_v7  ;;  %v676_v40 = vsel %vm610_vm6, %v673_v13, %v675_v17  ;;  %v819_v52 = vrot.slane %v817_v19, 3  ;;  %v822_v53 = vrot.slane %v820_v34, 4  ;;  %v6348_v63 = vrot.slane %v817_v19, 4 }
 0x129   : > { %v628_v18 = vld [vmem:[#allocation2] sm:$0xf8]  ;;  %v672_v20 = vrot.slane %v649_v15, 4  ;;  %v617_v28 = vsel %vm610_vm6, %v614_v2, %v616_v21  ;;  %627 = vst [vmem:[#allocation2 + $0x20] sm:$0xf] %v616_v21  ;;  %4681 = vmatprep.subr.bf16.mxu0 %v5334_v16  ;;  %v980_v58 = vshrl.u32 %v649_v15, 16 }
 0x12a   : > { %v800_v22 = vshrl.u32 %v628_v18, 16  ;;  %v803_v23 = vshll.u32 %v628_v18, 16  ;;  %v677_v35 = vrot.slane %v617_v28, 4  ;;  %v826_v41 = vshrl.u32 %v617_v28, 16  ;;  %v5338_v18 = vld [vmem:[#allocation9 + $0x20] sm:$0xff]   ;;  %v5339_v21 = vld [vmem:[#allocation9 + $0x28] sm:$0xff]  }
 0x12b   : > { %v674_v26 = vsel %vm610_vm6, %v672_v20, %v673_v13  ;;  %v829_v47 = vshll.u32 %v617_v28, 16  ;;  %v983_v59 = vshll.u32 %v649_v15, 16  ;;  %v6350_v0 = vrot.slane %v820_v34, 5  ;;  %v5343_v28 = vld [vmem:[#allocation9 + $0x88] sm:$0xff]  }
 0x12c   : > { %v802_v33 = vrot.slane %v800_v22, 3  ;;  %4673 = vmatprep.mubr.bf16.mxu0 %v674_v26  ;;  %v805_v38 = vrot.slane %v803_v23, 4  ;;  %v678_v44 = vsel %vm610_vm6, %v675_v17, %v677_v35  ;;  %v828_v55 = vrot.slane %v826_v41, 3  ;;  %v5340_v22 = vld [vmem:[#allocation9 + $0x30] sm:$0xff]   ;;  %v5341_v23 = vld [vmem:[#allocation9 + $0x38] sm:$0xff]  }
 0x12d   : > { %4674 = vmatmul.mubr.bf16.vlgmr.msra.gmra.mrb[0].mxu0 %v676_v40  ;;  %v831_v56 = vrot.slane %v829_v47, 4  ;;  %v6352_v6 = vrot.slane %v826_v41, 4  ;;  %v982_v10 = vrot.slane %v980_v58, 4  ;;  %v985_v13 = vrot.slane %v983_v59, 5 }
 0x12e   : > { %v806_v50 = vor.u32 %v805_v38, %v802_v33  ;;  %4682 = vmatpush3.bf16.msra.mxu0 %v5334_v16  ;;  %4677 = vmatprep.mubr.bf16.mxu0 %v678_v44  ;;  %v996_v12 = vrot.slane %v829_v47, 5  ;;  %v823_v25 = vor.u32 %v822_v53, %v819_v52  ;;  %v989_v41 = vor.u32 %v988_v62, %v987_v61  ;;  %v5349_v52 = vld [vmem:[#allocation9 + $0xb8] sm:$0xff]   ;;  %v5350_v61 = vld [vmem:[#allocation11 + $0x40] sm:$0xff]   ;;  %v5351_v62 = vld [vmem:[#allocation11 + $0x48] sm:$0xff]  }
 0x12f   : > { %4683 = vmatprep.subr.bf16.mxu0 %v5335_v43  ;;  %v832_v26 = vor.u32 %v831_v56, %v828_v55  ;;  %v986_v40 = vor.u32 %v985_v13, %v982_v10  ;;  %v993_v53 = vor.u32 %v6350_v0, %v6348_v63  ;;  %4729 = vmatprep.subr.bf16.mxu1 %v5350_v61  ;;  %v5352_v63 = vld [vmem:[#allocation11 + $0x50] sm:$0xff]   ;;  %v5353_v0 = vld [vmem:[#allocation11 + $0x58] sm:$0xff]  }
 0x130   : > { %v632_v60 = vld [vmem:[#allocation2 + $0x20] sm:$0xf]  ;;  %v815_v11 = vsel %vm798_vm7, %v806_v50, %v814_v51  ;;  %v824_v33 = vsel %vm798_vm7, %v814_v51, %v823_v25  ;;  %v5347_v50 = vld [vmem:[#allocation9 + $0xa8] sm:$0xff]   ;;  %v5348_v51 = vld [vmem:[#allocation9 + $0xb0] sm:$0xff]   ;;  %v997_v55 = vor.u32 %v996_v12, %v6352_v6  ;;  %4730 = vmatpush3.bf16.msra.mxu1 %v5350_v61 }
 0x131   : > { %v679_v2 = vrot.slane %v632_v60, 4  ;;  %v835_v4 = vshrl.u32 %v632_v60, 16  ;;  %v838_v5 = vshll.u32 %v632_v60, 16  ;;  %v960_v7 = vld [vmem:[#allocation2 + $0x20] sm:$0x1f]  ;;  %v833_v34 = vsel %vm798_vm7, %v823_v25, %v832_v26  ;;  %4731 = vmatprep.subr.bf16.mxu1 %v5351_v62 }
 0x132   : > { %4684 = vmatpush3.bf16.msra.mxu0 %v5335_v43  ;;  %v1000_v14 = vshrl.u32 %v960_v7, 16  ;;  %v1003_v15 = vshll.u32 %v960_v7, 16  ;;  %v5345_v43 = vld [vmem:[#allocation9 + $0x98] sm:$0xff]   ;;  %v990_v47 = vsel %vm978_vm8, %v986_v40, %v989_v41  ;;  %v994_v56 = vsel %vm978_vm8, %v989_v41, %v993_v53  ;;  %v6372_v7 = vld [vmem:[#allocation11] sm:$0xff]  }
 0x133   : > { %v680_v9 = vsel %vm610_vm6, %v677_v35, %v679_v2  ;;  %4685 = vmatprep.subr.bf16.mxu0 %v5336_v48  ;;  %v837_v16 = vrot.slane %v835_v4, 3  ;;  %v840_v17 = vrot.slane %v838_v5, 4  ;;  %v5344_v35 = vld [vmem:[#allocation9 + $0x90] sm:$0xff]   ;;  %v998_v58 = vsel %vm978_vm8, %v993_v53, %v997_v55  ;;  %v5354_v2 = vld [vmem:[#allocation11 + $0x60] sm:$0xff]   ;;  %v5355_v4 = vld [vmem:[#allocation11 + $0x68] sm:$0xff]  }
 0x134   : > { %v6356_v19 = vrot.slane %v1000_v14, 4  ;;  %v6358_v20 = vrot.slane %v1003_v15, 5  ;;  %4732 = vmatpush3.bf16.msra.mxu1 %v5351_v62  ;;  %v5356_v5 = vld [vmem:[#allocation11 + $0x70] sm:$0xff]   ;;  %v5357_v6 = vld [vmem:[#allocation11 + $0x78] sm:$0xff]  }
 0x135   : > { %4678 = vmatmul.mubr.bf16.gmra.mrb[4].mxu0 %v680_v9  ;;  %v841_v38 = vor.u32 %v840_v17, %v837_v16  ;;  %4733 = vmatprep.subr.bf16.mxu1 %v5352_v63 }
 0x136   : > { %4686 = vmatpush3.bf16.msra.mxu0 %v5336_v48  ;;  %4697 = vmatprep.mubr.bf16.mxu0 %v815_v11  ;;  %v5346_v48 = vld [vmem:[#allocation9 + $0xa0] sm:$0xff]   ;;  %v1006_v59 = vor.u32 %v6358_v20, %v6356_v19 }
 0x137   : > { %4687 = vmatprep.subr.bf16.mxu0 %v5337_v8  ;;  %v842_v44 = vsel %vm798_vm7, %v832_v26, %v841_v38 }
 0x138   : > { %v1007_v60 = vsel %vm978_vm8, %v997_v55, %v1006_v59  ;;  %4734 = vmatpush3.bf16.msra.mxu1 %v5352_v63 }
 0x139   : > { %4735 = vmatprep.subr.bf16.mxu1 %v5353_v0 }
 0x13a   : > { %4688 = vmatpush3.bf16.msra.mxu0 %v5337_v8  ;;  %v4296_v8 = vld [vmem:[%s6944_s4] ss:$0 sm:$0xff] }
 0x13b   : > { %4689 = vmatprep.subr.bf16.mxu0 %v5338_v18 }
 0x13c   : > { %4736 = vmatpush3.bf16.msra.mxu1 %v5353_v0 }
 0x13d   : > { %4737 = vmatprep.subr.bf16.mxu1 %v5354_v2 }
 0x13e   : > { %4690 = vmatpush3.bf16.msra.mxu0 %v5338_v18 }
 0x13f   : > { %4691 = vmatprep.subr.bf16.mxu0 %v5339_v21 }
 0x140   : > { %4738 = vmatpush3.bf16.msra.mxu1 %v5354_v2 }
 0x141   : > { %4739 = vmatprep.subr.bf16.mxu1 %v5355_v4 }
 0x142   : > { %4692 = vmatpush3.bf16.msra.mxu0 %v5339_v21 }
 0x143   : > { %4693 = vmatprep.subr.bf16.mxu0 %v5340_v22 }
 0x144   : > { %4740 = vmatpush3.bf16.msra.mxu1 %v5355_v4 }
 0x145   : > { %4741 = vmatprep.subr.bf16.mxu1 %v5356_v5 }
 0x146   : > { %4694 = vmatpush3.bf16.msra.mxu0 %v5340_v22 }
 0x147   : > { %4695 = vmatprep.subr.bf16.mxu0 %v5341_v23 }
 0x148   : > { %4742 = vmatpush3.bf16.msra.mxu1 %v5356_v5 }
 0x149   : > { %4743 = vmatprep.subr.bf16.mxu1 %v5357_v6 }
 0x14a   : > { %4696 = vmatpush3.bf16.msra.mxu0 %v5341_v23 }
 0x14b   : > { %4705 = vmatprep.subr.bf16.mxu0 %v5342_v24 }
 0x14c   : > { %4744 = vmatpush3.bf16.msra.mxu1 %v5357_v6 }
 0x14d   : > { %4698 = vmatmul.mubr.bf16.vlgmr.msra.gmra.mrb[0].mxu0 %v824_v33  ;;  %4753 = vmatprep.subr.bf16.mxu1 %v6372_v7 }
 0x14e   : > { %4706 = vmatpush3.bf16.msra.mxu0 %v5342_v24  ;;  %4701 = vmatprep.mubr.bf16.mxu0 %v833_v34 }
 0x14f   : > { %4707 = vmatprep.subr.bf16.mxu0 %v5343_v28 }
 0x152   : > { %4708 = vmatpush3.bf16.msra.mxu0 %v5343_v28 }
 0x153   : > { %4709 = vmatprep.subr.bf16.mxu0 %v5344_v35 }
 0x155   : > { %4702 = vmatmul.mubr.bf16.gmra.mrb[4].mxu0 %v842_v44 }
 0x156   : > { %4710 = vmatpush3.bf16.msra.mxu0 %v5344_v35  ;;  %4721 = vmatprep.mubr.bf16.mxu0 %v990_v47 }
 0x157   : > { %4711 = vmatprep.subr.bf16.mxu0 %v5345_v43 }
 0x15a   : > { %4712 = vmatpush3.bf16.msra.mxu0 %v5345_v43 }
 0x15b   : > { %4713 = vmatprep.subr.bf16.mxu0 %v5346_v48 }
 0x15e   : > { %4714 = vmatpush3.bf16.msra.mxu0 %v5346_v48 }
 0x15f   : > { %4715 = vmatprep.subr.bf16.mxu0 %v5347_v50 }
 0x162   : > { %4716 = vmatpush3.bf16.msra.mxu0 %v5347_v50 }
 0x163   : > { %4717 = vmatprep.subr.bf16.mxu0 %v5348_v51 }
 0x166   : > { %4718 = vmatpush3.bf16.msra.mxu0 %v5348_v51 }
 0x167   : > { %4719 = vmatprep.subr.bf16.mxu0 %v5349_v52 }
 0x16a   : > { %4720 = vmatpush3.bf16.msra.mxu0 %v5349_v52 }
 0x16d   : > { %4722 = vmatmul.mubr.bf16.vlgmr.msra.gmra.mrb[0].mxu0 %v994_v56 }
 0x16e   : > { %4725 = vmatprep.mubr.bf16.mxu0 %v998_v58 }
 0x175   : > { %4726 = vmatmul.mubr.bf16.gmra.mrb[4].mxu0 %v1007_v60 }
 0x240   : > { %v4723_v9 = vpop.f32.mrb[0].mxu0 }
 0x241   : > { %v1142_v10 = vadd.f32 %v4723_v9, %v4296_v8  ;;  %v1094_v13 = vpop.f32.mrb[1].mxu0 }
 0x242   : > { %v1140_v14 = vadd.f32 %v4296_v8, %v1094_v13  ;;  %v4724_v11 = vpop.f32.mrb[2].mxu0 }
 0x243   : > { %v1150_v12 = vsel %vm6250_vm9, %v1142_v10, 0.0  ;;  %v1143_v15 = vadd.f32 %v4724_v11, %v4296_v8  ;;  %v1097_v16 = vpop.f32.mrb[3].mxu0 }
 0x244   : > { %v1166_v17 = vmul.f32 0.1, %v1150_v12  ;;  %v1148_v18 = vsel %vm6234_vm10, %v1140_v14, 0.0  ;;  %v1141_v19 = vadd.f32 %v4296_v8, %v1097_v16  ;;  %vm1158_vm11 = vcmp.ge.f32.partialorder %v1150_v12, 0.0 }
 0x245   : > { %v1164_v20 = vmul.f32 0.1, %v1148_v18  ;;  %v1151_v21 = vsel %vm6264_vm5, %v1143_v15, 0.0  ;;  %vm1156_vm15 = vcmp.ge.f32.partialorder %v1148_v18, 0.0 }
 0x246   : > { %vm1159_vm2 = vcmp.ge.f32.partialorder %v1151_v21, 0.0  ;;  %v1167_v22 = vmul.f32 0.1, %v1151_v21  ;;  %v1149_v23 = vsel %vm6240_vm14, %v1141_v19, 0.0  ;;  %v1174_v25 = vsel %vm1158_vm11, %v1150_v12, %v1166_v17 }
 0x247   : > { %vm1157_vm13 = vcmp.ge.f32.partialorder %v1149_v23, 0.0  ;;  %v1165_v24 = vmul.f32 0.1, %v1149_v23  ;;  %v1172_v33 = vsel %vm1156_vm15, %v1148_v18, %v1164_v20 }
 0x248   : > { %v1175_v26 = vsel %vm1159_vm2, %v1151_v21, %v1167_v22  ;;  %v4727_v28 = vpop.f32.mrb[4].mxu0 }
 0x249   : > { %v1181_v34 = vpack.c.bf16 %v1175_v26, %v1174_v25  ;;  %v1173_v35 = vsel %vm1157_vm13, %v1149_v23, %v1165_v24  ;;  %v1146_v38 = vadd.f32 %v4727_v28, %v4296_v8  ;;  %v1110_v40 = vpop.f32.mrb[5].mxu0  ;;  %v5359_v28 = vld [vmem:[#allocation11 + $0x8] sm:$0xff]  }
 0x24a   : > { %v1180_v41 = vpack.c.bf16 %v1173_v35, %v1172_v33  ;;  %v1144_v43 = vadd.f32 %v4296_v8, %v1110_v40  ;;  %v4728_v44 = vpop.f32.mrb[6].mxu0 }
 0x24b   : > { %v1189_v47 = vrot.slane %v1181_v34, 4  ;;  %v1154_v48 = vsel %vm6312_vm12, %v1146_v38, 0.0  ;;  %v1147_v50 = vadd.f32 %v4728_v44, %v4296_v8  ;;  %v1113_v51 = vpop.f32.mrb[7].mxu0 }
 0x24c   : > { %v1188_v52 = vrot.slane %v1180_v41, 4  ;;  %v1170_v53 = vmul.f32 0.1, %v1154_v48  ;;  %v1152_v55 = vsel %vm6283_vm4, %v1144_v43, 0.0  ;;  %vm1162_vm0 = vcmp.ge.f32.partialorder %v1154_v48, 0.0 }
 0x24d   : > { %v1155_v56 = vsel %vm6318_vm3, %v1147_v50, 0.0  ;;  %v1145_v58 = vadd.f32 %v4296_v8, %v1113_v51  ;;  %v1168_v60 = vmul.f32 0.1, %v1152_v55  ;;  %vm1160_vm15 = vcmp.ge.f32.partialorder %v1152_v55, 0.0 }
 0x24e   : > { %v1190_v59 = vsel %vm610_vm6, %v1188_v52, %v1189_v47  ;;  %1200 = vst [vmem:[#allocation2] sm:$0xf0] %v1188_v52  ;;  %vm1163_vm11 = vcmp.ge.f32.partialorder %v1155_v56, 0.0  ;;  %v1171_v61 = vmul.f32 0.1, %v1155_v56  ;;  %v1178_v63 = vsel %vm1162_vm0, %v1154_v48, %v1170_v53 }
 0x24f   : > { %v1153_v62 = vsel %vm6292_vm1, %v1145_v58, 0.0  ;;  %v1176_v5 = vsel %vm1160_vm15, %v1152_v55, %v1168_v60  ;;  %v1384_v9 = vshrl.u32 %v1190_v59, 16  ;;  %v1387_v13 = vshll.u32 %v1190_v59, 16  ;;  %v5360_v58 = vld [vmem:[#allocation11 + $0x10] sm:$0xff]  }
 0x250   : > { %v1179_v0 = vsel %vm1163_vm11, %v1155_v56, %v1171_v61  ;;  %vm1161_vm2 = vcmp.ge.f32.partialorder %v1153_v62, 0.0  ;;  %v1169_v2 = vmul.f32 0.1, %v1153_v62  ;;  %v1250_v16 = vrot.slane %v1190_v59, 4 }
 0x251   : > { %v1183_v4 = vpack.c.bf16 %v1179_v0, %v1178_v63  ;;  %v1386_v18 = vrot.slane %v1384_v9, 3  ;;  %v1562_v22 = vrot.slane %v1384_v9, 4  ;;  %v1389_v26 = vrot.slane %v1387_v13, 4  ;;  %v5361_v9 = vld [vmem:[#allocation11 + $0x18] sm:$0xff]  }
 0x252   : > { %v1177_v6 = vsel %vm1161_vm2, %v1153_v62, %v1169_v2  ;;  %v1563_v38 = vrot.slane %v1387_v13, 5 }
 0x253   : > { %v1193_v10 = vrot.slane %v1183_v4, 4  ;;  %v1182_v8 = vpack.c.bf16 %v1177_v6, %v1176_v5  ;;  %v1390_v59 = vor.u32 %v1389_v26, %v1386_v18  ;;  %v5365_v18 = vld [vmem:[#allocation11 + $0x38] sm:$0xff]  }
 0x254   : > { %v1564_v63 = vor.u32 %v1563_v38, %v1562_v22 }
 0x255   : > { %1204 = vst [vmem:[#allocation2 + $0x20] sm:$0xf] %v1193_v10  ;;  %v1191_v14 = vrot.slane %v1182_v8, 4  ;;  %v6395_v11 = vld [vmem:[#allocation2] sm:$0xf0] }
 0x256   : > { %v1205_v12 = vld [vmem:[#allocation2] sm:$0xf8]  ;;  %v1249_v15 = vrot.slane %v6395_v11, 4  ;;  %v1555_v22 = vshrl.u32 %v6395_v11, 16 }
 0x257   : > { %v1376_v17 = vshrl.u32 %v1205_v12, 16  ;;  %v1192_v19 = vsel %vm610_vm6, %v1189_v47, %v1191_v14  ;;  %v1194_v20 = vsel %vm610_vm6, %v1191_v14, %v1193_v10  ;;  %v1379_v21 = vshll.u32 %v1205_v12, 16  ;;  %v5362_v12 = vld [vmem:[#allocation11 + $0x20] sm:$0xff]  }
 0x258   : > { %v1251_v23 = vsel %vm610_vm6, %v1249_v15, %v1250_v16  ;;  %v1252_v24 = vrot.slane %v1192_v19, 4  ;;  %v1254_v25 = vrot.slane %v1194_v20, 4  ;;  %v1393_v33 = vshrl.u32 %v1192_v19, 16 }
 0x259   : > { %4745 = vmatprep.mubr.bf16.mxu1 %v1251_v23  ;;  %v1396_v34 = vshll.u32 %v1192_v19, 16  ;;  %v1402_v35 = vshrl.u32 %v1194_v20, 16  ;;  %v1378_v43 = vrot.slane %v1376_v17, 3  ;;  %v1405_v44 = vshll.u32 %v1194_v20, 16  ;;  %v5364_v17 = vld [vmem:[#allocation11 + $0x30] sm:$0xff]   ;;  %v5366_v19 = vld [vmem:[#allocation11 + $0x80] sm:$0xff]  }
 0x25a   : > { %v1253_v40 = vsel %vm610_vm6, %v1250_v16, %v1252_v24  ;;  %v1255_v41 = vsel %vm610_vm6, %v1252_v24, %v1254_v25  ;;  %v1381_v47 = vrot.slane %v1379_v21, 4  ;;  %v1395_v48 = vrot.slane %v1393_v33, 3  ;;  %v5363_v16 = vld [vmem:[#allocation11 + $0x28] sm:$0xff]  }
 0x25b   : > { %4746 = vmatmul.mubr.bf16.vlgmr.msra.gmra.mrb[0].mxu1 %v1253_v40  ;;  %v1398_v50 = vrot.slane %v1396_v34, 4  ;;  %v1404_v51 = vrot.slane %v1402_v35, 3  ;;  %v1407_v53 = vrot.slane %v1405_v44, 4  ;;  %v1566_v55 = vrot.slane %v1393_v33, 4  ;;  %v5367_v24 = vld [vmem:[#allocation11 + $0x88] sm:$0xff]   ;;  %v5369_v40 = vld [vmem:[#allocation11 + $0x98] sm:$0xff]  }
 0x25c   : > { %4754 = vmatpush3.bf16.msra.mxu1 %v6372_v7  ;;  %4749 = vmatprep.mubr.bf16.mxu1 %v1255_v41  ;;  %v1209_v52 = vld [vmem:[#allocation2 + $0x20] sm:$0xf]  ;;  %v1567_v56 = vrot.slane %v1396_v34, 5  ;;  %v1382_v2 = vor.u32 %v1381_v47, %v1378_v43  ;;  %v1570_v5 = vrot.slane %v1402_v35, 4  ;;  %v1571_v10 = vrot.slane %v1405_v44, 5  ;;  %v5368_v34 = vld [vmem:[#allocation11 + $0x90] sm:$0xff]  }
 0x25d   : > { %4755 = vmatprep.subr.bf16.mxu1 %v5359_v28  ;;  %v1399_v60 = vor.u32 %v1398_v50, %v1395_v48  ;;  %v1256_v61 = vrot.slane %v1209_v52, 4  ;;  %v1408_v62 = vor.u32 %v1407_v53, %v1404_v51  ;;  %v1411_v20 = vshrl.u32 %v1209_v52, 16  ;;  %v5370_v43 = vld [vmem:[#allocation11 + $0xa0] sm:$0xff]   ;;  %v5371_v44 = vld [vmem:[#allocation11 + $0xa8] sm:$0xff]   ;;  %v5372_v47 = vld [vmem:[#allocation11 + $0xb0] sm:$0xff]  }
 0x25e   : > { %v1568_v0 = vor.u32 %v1567_v56, %v1566_v55  ;;  %v1391_v13 = vsel %vm798_vm7, %v1382_v2, %v1390_v59  ;;  %v6411_v14 = vor.u32 %v1571_v10, %v1570_v5  ;;  %v1414_v21 = vshll.u32 %v1209_v52, 16  ;;  %v5373_v48 = vld [vmem:[#allocation11 + $0xb8] sm:$0xff]   ;;  %v5380_v2 = vld [vmem:[#allocation9 + $0x130] sm:$0xff]   ;;  %v6422_v5 = vld [vmem:[#allocation9 + $0xc0] sm:$0xff]  }
 0x25f   : > { %v1400_v4 = vsel %vm798_vm7, %v1390_v59, %v1399_v60  ;;  %v1409_v7 = vsel %vm798_vm7, %v1399_v60, %v1408_v62  ;;  %v1257_v8 = vsel %vm610_vm6, %v1254_v25, %v1256_v61  ;;  %v1558_v23 = vshll.u32 %v6395_v11, 16  ;;  %v1536_v50 = vld [vmem:[#allocation2 + $0x20] sm:$0x1f]  ;;  %v5374_v59 = vld [vmem:[#allocation9 + $0x100] sm:$0xff]   ;;  %v5375_v60 = vld [vmem:[#allocation9 + $0x108] sm:$0xff]  }
 0x260   : > { %4756 = vmatpush3.bf16.msra.mxu1 %v5359_v28  ;;  %v6407_v6 = vsel %vm978_vm8, %v1564_v63, %v1568_v0  ;;  %v1573_v15 = vsel %vm978_vm8, %v1568_v0, %v6411_v14  ;;  %v1413_v25 = vrot.slane %v1411_v20, 3  ;;  %v1416_v26 = vrot.slane %v1414_v21, 4  ;;  %4801 = vmatprep.subr.bf16.mxu0 %v5374_v59  ;;  %v5376_v61 = vld [vmem:[#allocation9 + $0x110] sm:$0xff]   ;;  %v5379_v0 = vld [vmem:[#allocation9 + $0x128] sm:$0xff]  }
 0x261   : > { %4757 = vmatprep.subr.bf16.mxu1 %v5360_v58  ;;  %v1557_v28 = vrot.slane %v1555_v22, 4  ;;  %v1560_v33 = vrot.slane %v1558_v23, 5  ;;  %v1575_v51 = vshrl.u32 %v1536_v50, 16  ;;  %v1578_v52 = vshll.u32 %v1536_v50, 16  ;;  %4802 = vmatpush3.bf16.msra.mxu0 %v5374_v59 }
 0x262   : > { %v1417_v35 = vor.u32 %v1416_v26, %v1413_v25  ;;  %4803 = vmatprep.subr.bf16.mxu0 %v5375_v60 }
 0x263   : > { %4750 = vmatmul.mubr.bf16.gmra.mrb[4].mxu1 %v1257_v8  ;;  %v1561_v38 = vor.u32 %v1560_v33, %v1557_v28  ;;  %v1577_v53 = vrot.slane %v1575_v51, 4  ;;  %v1580_v55 = vrot.slane %v1578_v52, 5 }
 0x264   : > { %4758 = vmatpush3.bf16.msra.mxu1 %v5360_v58  ;;  %4769 = vmatprep.mubr.bf16.mxu1 %v1391_v13  ;;  %v1418_v41 = vsel %vm798_vm7, %v1408_v62, %v1417_v35  ;;  %v5377_v62 = vld [vmem:[#allocation9 + $0x118] sm:$0xff]  }
 0x265   : > { %4759 = vmatprep.subr.bf16.mxu1 %v5361_v9  ;;  %v1565_v11 = vsel %vm978_vm8, %v1561_v38, %v1564_v63  ;;  %v1581_v56 = vor.u32 %v1580_v55, %v1577_v53  ;;  %4804 = vmatpush3.bf16.msra.mxu0 %v5375_v60  ;;  %v5378_v63 = vld [vmem:[#allocation9 + $0x120] sm:$0xff]  }
 0x266   : > { %4805 = vmatprep.subr.bf16.mxu0 %v5376_v61 }
 0x267   : > { %v1582_v58 = vsel %vm978_vm8, %v6411_v14, %v1581_v56 }
 0x268   : > { %4760 = vmatpush3.bf16.msra.mxu1 %v5361_v9 }
 0x269   : > { %4761 = vmatprep.subr.bf16.mxu1 %v5362_v12  ;;  %4806 = vmatpush3.bf16.msra.mxu0 %v5376_v61 }
 0x26a   : > { %4807 = vmatprep.subr.bf16.mxu0 %v5377_v62 }
 0x26c   : > { %4762 = vmatpush3.bf16.msra.mxu1 %v5362_v12 }
 0x26d   : > { %4763 = vmatprep.subr.bf16.mxu1 %v5363_v16  ;;  %4808 = vmatpush3.bf16.msra.mxu0 %v5377_v62 }
 0x26e   : > { %4809 = vmatprep.subr.bf16.mxu0 %v5378_v63 }
 0x270   : > { %4764 = vmatpush3.bf16.msra.mxu1 %v5363_v16 }
 0x271   : > { %4765 = vmatprep.subr.bf16.mxu1 %v5364_v17  ;;  %4810 = vmatpush3.bf16.msra.mxu0 %v5378_v63 }
 0x272   : > { %4811 = vmatprep.subr.bf16.mxu0 %v5379_v0 }
 0x274   : > { %4766 = vmatpush3.bf16.msra.mxu1 %v5364_v17 }
 0x275   : > { %4767 = vmatprep.subr.bf16.mxu1 %v5365_v18  ;;  %4812 = vmatpush3.bf16.msra.mxu0 %v5379_v0 }
 0x276   : > { %4813 = vmatprep.subr.bf16.mxu0 %v5380_v2 }
 0x278   : > { %4768 = vmatpush3.bf16.msra.mxu1 %v5365_v18 }
 0x279   : > { %4777 = vmatprep.subr.bf16.mxu1 %v5366_v19  ;;  %4814 = vmatpush3.bf16.msra.mxu0 %v5380_v2 }
 0x27b   : > { %4770 = vmatmul.mubr.bf16.vlgmr.msra.gmra.mrb[0].mxu1 %v1400_v4  ;;  %v5381_v4 = vld [vmem:[#allocation9 + $0x138] sm:$0xff]  }
 0x27c   : > { %4773 = vmatprep.mubr.bf16.mxu1 %v1409_v7  ;;  %4778 = vmatpush3.bf16.msra.mxu1 %v5366_v19  ;;  %v4321_v7 = vld [vmem:[%s6945_s19] ss:$0 sm:$0xff] }
 0x27d   : > { %4779 = vmatprep.subr.bf16.mxu1 %v5367_v24  ;;  %4815 = vmatprep.subr.bf16.mxu0 %v5381_v4 }
 0x27e   : > { %4816 = vmatpush3.bf16.msra.mxu0 %v5381_v4 }
 0x27f   : > { %4825 = vmatprep.subr.bf16.mxu0 %v6422_v5 }
 0x280   : > { %4780 = vmatpush3.bf16.msra.mxu1 %v5367_v24 }
 0x281   : > { %4781 = vmatprep.subr.bf16.mxu1 %v5368_v34 }
 0x283   : > { %4774 = vmatmul.mubr.bf16.gmra.mrb[4].mxu1 %v1418_v41 }
 0x284   : > { %4782 = vmatpush3.bf16.msra.mxu1 %v5368_v34  ;;  %4793 = vmatprep.mubr.bf16.mxu1 %v1565_v11 }
 0x285   : > { %4783 = vmatprep.subr.bf16.mxu1 %v5369_v40 }
 0x288   : > { %4784 = vmatpush3.bf16.msra.mxu1 %v5369_v40 }
 0x289   : > { %4785 = vmatprep.subr.bf16.mxu1 %v5370_v43 }
 0x28c   : > { %4786 = vmatpush3.bf16.msra.mxu1 %v5370_v43 }
 0x28d   : > { %4787 = vmatprep.subr.bf16.mxu1 %v5371_v44 }
 0x290   : > { %4788 = vmatpush3.bf16.msra.mxu1 %v5371_v44 }
 0x291   : > { %4789 = vmatprep.subr.bf16.mxu1 %v5372_v47 }
 0x294   : > { %4790 = vmatpush3.bf16.msra.mxu1 %v5372_v47 }
 0x295   : > { %4791 = vmatprep.subr.bf16.mxu1 %v5373_v48 }
 0x298   : > { %4792 = vmatpush3.bf16.msra.mxu1 %v5373_v48 }
 0x29b   : > { %4794 = vmatmul.mubr.bf16.vlgmr.msra.gmra.mrb[0].mxu1 %v6407_v6 }
 0x29c   : > { %4797 = vmatprep.mubr.bf16.mxu1 %v1573_v15 }
 0x2a3   : > { %4798 = vmatmul.mubr.bf16.gmra.mrb[4].mxu1 %v1582_v58 }
 0x36e   : > { %v4795_v6 = vpop.f32.mrb[0].mxu1 }
 0x36f   : > { %v1717_v9 = vadd.f32 %v4795_v6, %v4321_v7  ;;  %v1669_v10 = vpop.f32.mrb[1].mxu1 }
 0x370   : > { %v1715_v8 = vadd.f32 %v4321_v7, %v1669_v10  ;;  %v4796_v13 = vpop.f32.mrb[2].mxu1 }
 0x371   : > { %v1725_v14 = vsel %vm6250_vm9, %v1717_v9, 0.0  ;;  %v1718_v12 = vadd.f32 %v4796_v13, %v4321_v7  ;;  %v1672_v15 = vpop.f32.mrb[3].mxu1 }
 0x372   : > { %v6431_v16 = vadd.f32 %v1725_v14, %v6270_v37  ;;  %v1723_v17 = vsel %vm6234_vm10, %v1715_v8, 0.0  ;;  %v1716_v18 = vadd.f32 %v4321_v7, %v1672_v15 }
 0x373   : > { %v6436_v19 = vadd.f32 %v1723_v17, %v6246_v30  ;;  %v1726_v20 = vsel %vm6264_vm5, %v1718_v12, 0.0 }
 0x374   : > { %v1749_v21 = vmul.f32 0.1, %v6431_v16  ;;  %v6442_v22 = vadd.f32 %v1726_v20, %v6276_v39  ;;  %v1724_v23 = vsel %vm6240_vm14, %v1716_v18, 0.0  ;;  %vm1741_vm13 = vcmp.ge.f32.partialorder %v6431_v16, 0.0 }
 0x375   : > { %v1747_v37 = vmul.f32 0.1, %v6436_v19  ;;  %v6449_v24 = vadd.f32 %v1724_v23, %v6256_v32  ;;  %vm1739_vm0 = vcmp.ge.f32.partialorder %v6436_v19, 0.0 }
 0x376   : > { %vm1742_vm11 = vcmp.ge.f32.partialorder %v6442_v22, 0.0  ;;  %v1750_v30 = vmul.f32 0.1, %v6442_v22  ;;  %v4799_v25 = vpop.f32.mrb[4].mxu1  ;;  %v1757_v33 = vsel %vm1741_vm13, %v6431_v16, %v1749_v21 }
 0x377   : > { %vm1740_vm15 = vcmp.ge.f32.partialorder %v6449_v24, 0.0  ;;  %v1748_v39 = vmul.f32 0.1, %v6449_v24  ;;  %v1721_v26 = vadd.f32 %v4799_v25, %v4321_v7  ;;  %v1685_v28 = vpop.f32.mrb[5].mxu1  ;;  %v1755_v38 = vsel %vm1739_vm0, %v6436_v19, %v1747_v37  ;;  %v5383_v37 = vld [vmem:[#allocation9 + $0xc8] sm:$0xff]  }
 0x378   : > { %v1758_v34 = vsel %vm1742_vm11, %v6442_v22, %v1750_v30  ;;  %v1719_v35 = vadd.f32 %v4321_v7, %v1685_v28  ;;  %v4800_v32 = vpop.f32.mrb[6].mxu1 }
 0x379   : > { %v1756_v40 = vsel %vm1740_vm15, %v6449_v24, %v1748_v39  ;;  %v1729_v41 = vsel %vm6312_vm12, %v1721_v26, 0.0  ;;  %v1722_v11 = vadd.f32 %v4800_v32, %v4321_v7  ;;  %v1688_v43 = vpop.f32.mrb[7].mxu1  ;;  %v1764_v51 = vpack.c.bf16 %v1758_v34, %v1757_v33 }
 0x37a   : > { %v1763_v44 = vpack.c.bf16 %v1756_v40, %v1755_v38  ;;  %v6463_v47 = vadd.f32 %v1729_v41, %v6330_v1  ;;  %v1727_v48 = vsel %vm6283_vm4, %v1719_v35, 0.0  ;;  %v1720_v50 = vadd.f32 %v4321_v7, %v1688_v43  ;;  %v5384_v35 = vld [vmem:[#allocation9 + $0xd0] sm:$0xff]   ;;  %v5385_v43 = vld [vmem:[#allocation9 + $0xd8] sm:$0xff]  }
 0x37b   : > { %v6468_v52 = vadd.f32 %v1727_v48, %v6298_v46  ;;  %v1730_v53 = vsel %vm6318_vm3, %v1722_v11, 0.0  ;;  %v1772_v59 = vrot.slane %v1764_v51, 4  ;;  %vm1960_vm15 = vsmask.f32 5376  ;;  %v5386_v48 = vld [vmem:[#allocation9 + $0xe0] sm:$0xff]   ;;  %v5388_v51 = vld [vmem:[#allocation9 + $0xf0] sm:$0xff]  }
 0x37c   : > { %v1771_v55 = vrot.slane %v1763_v44, 4  ;;  %v1753_v56 = vmul.f32 0.1, %v6463_v47  ;;  %v6474_v58 = vadd.f32 %v1730_v53, %v6334_v3  ;;  %vm1745_vm2 = vcmp.ge.f32.partialorder %v6463_v47, 0.0 }
 0x37d   : > { %v1728_v1 = vsel %vm6292_vm1, %v1720_v50, 0.0  ;;  %v1751_v60 = vmul.f32 0.1, %v6468_v52  ;;  %vm1743_vm0 = vcmp.ge.f32.partialorder %v6468_v52, 0.0  ;;  %v5387_v50 = vld [vmem:[#allocation9 + $0xe8] sm:$0xff]  }
 0x37e   : > { %1783 = vst [vmem:[#allocation2] sm:$0xf0] %v1771_v55  ;;  %vm1746_vm13 = vcmp.ge.f32.partialorder %v6474_v58, 0.0  ;;  %v1754_v46 = vmul.f32 0.1, %v6474_v58  ;;  %v6483_v61 = vadd.f32 %v1728_v1, %v6303_v49  ;;  %v1761_v62 = vsel %vm1745_vm2, %v6463_v47, %v1753_v56 }
 0x37f   : > { %v6491_v2 = vsel %vm610_vm6, %v1771_v55, %v1772_v59  ;;  %v1759_v4 = vsel %vm1743_vm0, %v6468_v52, %v1751_v60  ;;  %vm2141_vm2 = vsmask.f32 2304 }
 0x380   : > { %v1762_v3 = vsel %vm1746_vm13, %v6474_v58, %v1754_v46  ;;  %vm1744_vm11 = vcmp.ge.f32.partialorder %v6483_v61, 0.0  ;;  %v1752_v0 = vmul.f32 0.1, %v6483_v61  ;;  %v1835_v14 = vrot.slane %v6491_v2, 4  ;;  %v5389_v46 = vld [vmem:[#allocation9 + $0xf8] sm:$0xff]  }
 0x381   : > { %v1766_v63 = vpack.c.bf16 %v1762_v3, %v1761_v62  ;;  %v1970_v30 = vshrl.u32 %v6491_v2, 16  ;;  %v1973_v25 = vshll.u32 %v6491_v2, 16  ;;  %v5395_v2 = vld [vmem:[#allocation9 + $0x168] sm:$0xff]  }
 0x382   : > { %v1760_v49 = vsel %vm1744_vm11, %v6483_v61, %v1752_v0 }
 0x383   : > { %v1776_v7 = vrot.slane %v1766_v63, 4  ;;  %v1765_v6 = vpack.c.bf16 %v1760_v49, %v1759_v4  ;;  %v1972_v32 = vrot.slane %v1970_v30, 2  ;;  %v1975_v38 = vrot.slane %v1973_v25, 3  ;;  %v5390_v4 = vld [vmem:[#allocation9 + $0x140] sm:$0xff]  }
 0x385   : > { %1787 = vst [vmem:[#allocation2 + $0x20] sm:$0xf] %v1776_v7  ;;  %v1810_v9 = vld [vmem:[#allocation2] sm:$0xf0]  ;;  %v1774_v8 = vrot.slane %v1765_v6, 4  ;;  %v1976_v11 = vor.u32 %v1975_v38, %v1972_v32  ;;  %v5394_v32 = vld [vmem:[#allocation9 + $0x160] sm:$0xff]  }
 0x386   : > { %v1788_v10 = vld [vmem:[#allocation2] sm:$0xfc]  ;;  %v1834_v13 = vrot.slane %v1810_v9, 4 }
 0x387   : > { %v1962_v12 = vshrl.u32 %v1788_v10, 16  ;;  %v6497_v15 = vsel %vm610_vm6, %v1772_v59, %v1774_v8  ;;  %v6500_v17 = vsel %vm610_vm6, %v1774_v8, %v1776_v7  ;;  %v1965_v20 = vshll.u32 %v1788_v10, 16  ;;  %v2122_v0 = vld [vmem:[#allocation2] sm:$0xe0] }
 0x388   : > { %v1836_v18 = vsel %vm610_vm6, %v1834_v13, %v1835_v14  ;;  %v1837_v21 = vrot.slane %v6497_v15, 4  ;;  %v1839_v23 = vrot.slane %v6500_v17, 4  ;;  %v1979_v53 = vshrl.u32 %v6497_v15, 16  ;;  %v5391_v13 = vld [vmem:[#allocation9 + $0x148] sm:$0xff]  }
 0x389   : > { %4817 = vmatprep.mubr.bf16.mxu0 %v1836_v18  ;;  %v1964_v33 = vrot.slane %v1962_v12, 2  ;;  %v1967_v34 = vrot.slane %v1965_v20, 3  ;;  %v1982_v55 = vshll.u32 %v6497_v15, 16  ;;  %v1988_v56 = vshrl.u32 %v6500_v17, 16 }
 0x38a   : > { %v1838_v39 = vsel %vm610_vm6, %v1835_v14, %v1837_v21  ;;  %v1840_v26 = vsel %vm610_vm6, %v1837_v21, %v1839_v23  ;;  %v1991_v1 = vshll.u32 %v6500_v17, 16  ;;  %v1981_v59 = vrot.slane %v1979_v53, 2  ;;  %v5392_v21 = vld [vmem:[#allocation9 + $0x150] sm:$0xff]  }
 0x38b   : > { %4818 = vmatmul.mubr.bf16.vlgmr.msra.gmra.mrb[8].mxu0 %v1838_v39  ;;  %v1968_v41 = vor.u32 %v1967_v34, %v1964_v33  ;;  %v1984_v60 = vrot.slane %v1982_v55, 3  ;;  %v1990_v62 = vrot.slane %v1988_v56, 2  ;;  %v2143_v10 = vshrl.u32 %v2122_v0, 16  ;;  %v5393_v33 = vld [vmem:[#allocation9 + $0x158] sm:$0xff]  }
 0x38c   : > { %v1811_v28 = vld [vmem:[#allocation2 + $0x20] sm:$0xf]  ;;  %4826 = vmatpush3.bf16.msra.mxu0 %v6422_v5  ;;  %4821 = vmatprep.mubr.bf16.mxu0 %v1840_v26  ;;  %v1993_v3 = vrot.slane %v1991_v1, 3  ;;  %v2146_v8 = vshll.u32 %v2122_v0, 16  ;;  %v2154_v38 = vrot.slane %v1979_v53, 5  ;;  %v5403_v0 = vld [vmem:[#allocation11 + $0x128] sm:$0xff]  }
 0x38d   : > { %4827 = vmatprep.subr.bf16.mxu0 %v5383_v37  ;;  %v1841_v40 = vrot.slane %v1811_v28, 4  ;;  %v1977_v5 = vsel %vm1960_vm15, %v1968_v41, %v1976_v11  ;;  %v1792_v63 = vld [vmem:[#allocation2 + $0x20] sm:$0x7]  ;;  %v1985_v7 = vor.u32 %v1984_v60, %v1981_v59  ;;  %v2145_v18 = vrot.slane %v2143_v10, 5 }
 0x38e   : > { %v1997_v49 = vshrl.u32 %v1792_v63, 16  ;;  %v2000_v6 = vshll.u32 %v1792_v63, 16  ;;  %v1994_v9 = vor.u32 %v1993_v3, %v1990_v62  ;;  %v2148_v20 = vrot.slane %v2146_v8, 6  ;;  %v5400_v62 = vld [vmem:[#allocation11 + $0x110] sm:$0xff]   ;;  %v5401_v3 = vld [vmem:[#allocation11 + $0x118] sm:$0xff]   ;;  %v5402_v63 = vld [vmem:[#allocation11 + $0x120] sm:$0xff]  }
 0x38f   : > { %v1842_v44 = vsel %vm610_vm6, %v1839_v23, %v1841_v40  ;;  %v1986_v14 = vsel %vm1960_vm15, %v1976_v11, %v1985_v7  ;;  %v2150_v23 = vrot.slane %v1970_v30, 5  ;;  %v5396_v30 = vld [vmem:[#allocation9 + $0x170] sm:$0xff]   ;;  %v2155_v40 = vrot.slane %v1982_v55, 6 }
 0x390   : > { %4828 = vmatpush3.bf16.msra.mxu0 %v5383_v37  ;;  %v1999_v12 = vrot.slane %v1997_v49, 2  ;;  %v2002_v15 = vrot.slane %v2000_v6, 3  ;;  %v1995_v17 = vsel %vm1960_vm15, %v1985_v7, %v1994_v9  ;;  %v2151_v37 = vrot.slane %v1973_v25, 6  ;;  %v5397_v25 = vld [vmem:[#allocation9 + $0x178] sm:$0xff]   ;;  %v6531_v49 = vld [vmem:[#allocation11 + $0xc0] sm:$0xff]  }
 0x391   : > { %4829 = vmatprep.subr.bf16.mxu0 %v5384_v35  ;;  %v2149_v26 = vor.u32 %v2148_v20, %v2145_v18  ;;  %v2158_v41 = vrot.slane %v1988_v56, 5  ;;  %v2159_v11 = vrot.slane %v1991_v1, 6  ;;  %v5398_v56 = vld [vmem:[#allocation11 + $0x100] sm:$0xff]   ;;  %v5399_v1 = vld [vmem:[#allocation11 + $0x108] sm:$0xff]   ;;  %v5405_v7 = vld [vmem:[#allocation11 + $0x138] sm:$0xff]  }
 0x392   : > { %v2003_v39 = vor.u32 %v2002_v15, %v1999_v12  ;;  %v2152_v28 = vor.u32 %v2151_v37, %v2150_v23  ;;  %4873 = vmatprep.subr.bf16.mxu1 %v5398_v56  ;;  %v4347_v6 = vld [vmem:[%s6944_s4 + $0x1] ss:$0 sm:$0xff] }
 0x393   : > { %4822 = vmatmul.mubr.bf16.gmra.mrb[12].mxu0 %v1842_v44  ;;  %v2156_v44 = vor.u32 %v2155_v40, %v2154_v38  ;;  %4874 = vmatpush3.bf16.msra.mxu1 %v5398_v56 }
 0x394   : > { %4830 = vmatpush3.bf16.msra.mxu0 %v5384_v35  ;;  %4841 = vmatprep.mubr.bf16.mxu0 %v1977_v5  ;;  %v2004_v34 = vsel %vm1960_vm15, %v1994_v9, %v2003_v39  ;;  %v2153_v35 = vsel %vm2141_vm2, %v2149_v26, %v2152_v28 }
 0x395   : > { %4831 = vmatprep.subr.bf16.mxu0 %v5385_v43  ;;  %4875 = vmatprep.subr.bf16.mxu1 %v5399_v1 }
 0x397   : > { %4876 = vmatpush3.bf16.msra.mxu1 %v5399_v1 }
 0x398   : > { %4832 = vmatpush3.bf16.msra.mxu0 %v5385_v43  ;;  %v2123_v43 = vld [vmem:[#allocation2 + $0x20] sm:$0x3f]  ;;  %4877 = vmatprep.subr.bf16.mxu1 %v5400_v62 }
 0x399   : > { %4833 = vmatprep.subr.bf16.mxu0 %v5386_v48  ;;  %v2163_v5 = vshrl.u32 %v2123_v43, 16 }
 0x39b   : > { %4878 = vmatpush3.bf16.msra.mxu1 %v5400_v62 }
 0x39c   : > { %4834 = vmatpush3.bf16.msra.mxu0 %v5386_v48  ;;  %v2166_v48 = vshll.u32 %v2123_v43, 16  ;;  %4879 = vmatprep.subr.bf16.mxu1 %v5401_v3 }
 0x39d   : > { %4835 = vmatprep.subr.bf16.mxu0 %v5387_v50 }
 0x39e   : > { %v2168_v59 = vrot.slane %v2166_v48, 6 }
 0x39f   : > { %4880 = vmatpush3.bf16.msra.mxu1 %v5401_v3 }
 0x3a0   : > { %4836 = vmatpush3.bf16.msra.mxu0 %v5387_v50  ;;  %v2160_v50 = vor.u32 %v2159_v11, %v2158_v41  ;;  %4881 = vmatprep.subr.bf16.mxu1 %v5402_v63 }
 0x3a1   : > { %4837 = vmatprep.subr.bf16.mxu0 %v5388_v51 }
 0x3a2   : > { %v2161_v60 = vsel %vm2141_vm2, %v2156_v44, %v2160_v50 }
 0x3a3   : > { %4882 = vmatpush3.bf16.msra.mxu1 %v5402_v63 }
 0x3a4   : > { %4838 = vmatpush3.bf16.msra.mxu0 %v5388_v51  ;;  %v2157_v51 = vsel %vm2141_vm2, %v2152_v28, %v2156_v44  ;;  %4883 = vmatprep.subr.bf16.mxu1 %v5403_v0 }
 0x3a5   : > { %4839 = vmatprep.subr.bf16.mxu0 %v5389_v46 }
 0x3a7   : > { %4884 = vmatpush3.bf16.msra.mxu1 %v5403_v0 }
 0x3a8   : > { %4840 = vmatpush3.bf16.msra.mxu0 %v5389_v46  ;;  %v2165_v46 = vrot.slane %v2163_v5, 5 }
 0x3a9   : > { %4849 = vmatprep.subr.bf16.mxu0 %v5390_v4 }
 0x3aa   : > { %v2169_v53 = vor.u32 %v2168_v59, %v2165_v46 }
 0x3ab   : > { %4842 = vmatmul.mubr.bf16.vlgmr.msra.gmra.mrb[8].mxu0 %v1986_v14 }
 0x3ac   : > { %4845 = vmatprep.mubr.bf16.mxu0 %v1995_v17  ;;  %4850 = vmatpush3.bf16.msra.mxu0 %v5390_v4  ;;  %v2170_v55 = vsel %vm2141_vm2, %v2160_v50, %v2169_v53  ;;  %v5404_v4 = vld [vmem:[#allocation11 + $0x130] sm:$0xff]  }
 0x3ad   : > { %4851 = vmatprep.subr.bf16.mxu0 %v5391_v13  ;;  %4885 = vmatprep.subr.bf16.mxu1 %v5404_v4 }
 0x3ae   : > { %4886 = vmatpush3.bf16.msra.mxu1 %v5404_v4 }
 0x3af   : > { %4887 = vmatprep.subr.bf16.mxu1 %v5405_v7 }
 0x3b0   : > { %4852 = vmatpush3.bf16.msra.mxu0 %v5391_v13 }
 0x3b1   : > { %4853 = vmatprep.subr.bf16.mxu0 %v5392_v21 }
 0x3b2   : > { %4888 = vmatpush3.bf16.msra.mxu1 %v5405_v7 }
 0x3b3   : > { %4846 = vmatmul.mubr.bf16.gmra.mrb[12].mxu0 %v2004_v34  ;;  %4897 = vmatprep.subr.bf16.mxu1 %v6531_v49 }
 0x3b4   : > { %4854 = vmatpush3.bf16.msra.mxu0 %v5392_v21  ;;  %4865 = vmatprep.mubr.bf16.mxu0 %v2153_v35 }
 0x3b5   : > { %4855 = vmatprep.subr.bf16.mxu0 %v5393_v33 }
 0x3b8   : > { %4856 = vmatpush3.bf16.msra.mxu0 %v5393_v33 }
 0x3b9   : > { %4857 = vmatprep.subr.bf16.mxu0 %v5394_v32 }
 0x3bc   : > { %4858 = vmatpush3.bf16.msra.mxu0 %v5394_v32 }
 0x3bd   : > { %4859 = vmatprep.subr.bf16.mxu0 %v5395_v2 }
 0x3c0   : > { %4860 = vmatpush3.bf16.msra.mxu0 %v5395_v2 }
 0x3c1   : > { %4861 = vmatprep.subr.bf16.mxu0 %v5396_v30 }
 0x3c4   : > { %4862 = vmatpush3.bf16.msra.mxu0 %v5396_v30 }
 0x3c5   : > { %4863 = vmatprep.subr.bf16.mxu0 %v5397_v25 }
 0x3c8   : > { %4864 = vmatpush3.bf16.msra.mxu0 %v5397_v25 }
 0x3cb   : > { %4866 = vmatmul.mubr.bf16.vlgmr.msra.gmra.mrb[8].mxu0 %v2157_v51 }
 0x3cc   : > { %4869 = vmatprep.mubr.bf16.mxu0 %v2161_v60 }
 0x3d3   : > { %4870 = vmatmul.mubr.bf16.gmra.mrb[12].mxu0 %v2170_v55 }
 0x49e   : > { %v4867_v9 = vpop.f32.mrb[8].mxu0 }
 0x49f   : > { %v2306_v10 = vadd.f32 %v4867_v9, %v4347_v6  ;;  %v2257_v8 = vpop.f32.mrb[9].mxu0 }
 0x4a0   : > { %v2304_v13 = vadd.f32 %v4347_v6, %v2257_v8  ;;  %v4868_v14 = vpop.f32.mrb[10].mxu0 }
 0x4a1   : > { %v2314_v12 = vsel %vm6250_vm9, %v2306_v10, 0.0  ;;  %v2307_v15 = vadd.f32 %v4868_v14, %v4347_v6  ;;  %v2260_v17 = vpop.f32.mrb[11].mxu0 }
 0x4a2   : > { %v2330_v18 = vmul.f32 0.1, %v2314_v12  ;;  %v2312_v20 = vsel %vm6234_vm10, %v2304_v13, 0.0  ;;  %v2305_v21 = vadd.f32 %v4347_v6, %v2260_v17  ;;  %vm2322_vm13 = vcmp.ge.f32.partialorder %v2314_v12, 0.0 }
 0x4a3   : > { %v2328_v23 = vmul.f32 0.1, %v2312_v20  ;;  %v2315_v37 = vsel %vm6264_vm5, %v2307_v15, 0.0  ;;  %vm2320_vm0 = vcmp.ge.f32.partialorder %v2312_v20, 0.0 }
 0x4a4   : > { %vm2323_vm11 = vcmp.ge.f32.partialorder %v2315_v37, 0.0  ;;  %v2331_v39 = vmul.f32 0.1, %v2315_v37  ;;  %v2313_v26 = vsel %vm6240_vm14, %v2305_v21, 0.0  ;;  %v2338_v33 = vsel %vm2322_vm13, %v2314_v12, %v2330_v18 }
 0x4a5   : > { %vm2321_vm15 = vcmp.ge.f32.partialorder %v2313_v26, 0.0  ;;  %v2329_v28 = vmul.f32 0.1, %v2313_v26  ;;  %v2336_v32 = vsel %vm2320_vm0, %v2312_v20, %v2328_v23 }
 0x4a6   : > { %v2339_v34 = vsel %vm2323_vm11, %v2315_v37, %v2331_v39  ;;  %v4871_v35 = vpop.f32.mrb[12].mxu0 }
 0x4a7   : > { %v2345_v2 = vpack.c.bf16 %v2339_v34, %v2338_v33  ;;  %v2337_v30 = vsel %vm2321_vm15, %v2313_v26, %v2329_v28  ;;  %v2310_v25 = vadd.f32 %v4871_v35, %v4347_v6  ;;  %v2273_v38 = vpop.f32.mrb[13].mxu0  ;;  %v5407_v35 = vld [vmem:[#allocation11 + $0xc8] sm:$0xff]  }
 0x4a8   : > { %v2344_v40 = vpack.c.bf16 %v2337_v30, %v2336_v32  ;;  %v2308_v41 = vadd.f32 %v4347_v6, %v2273_v38  ;;  %v4872_v11 = vpop.f32.mrb[14].mxu0 }
 0x4a9   : > { %v2353_v43 = vrot.slane %v2345_v2, 4  ;;  %v2318_v44 = vsel %vm6312_vm12, %v2310_v25, 0.0  ;;  %v2311_v5 = vadd.f32 %v4872_v11, %v4347_v6  ;;  %v2276_v48 = vpop.f32.mrb[15].mxu0 }
 0x4aa   : > { %v2352_v50 = vrot.slane %v2344_v40, 4  ;;  %v2334_v51 = vmul.f32 0.1, %v2318_v44  ;;  %v2316_v46 = vsel %vm6283_vm4, %v2308_v41, 0.0  ;;  %vm2326_vm2 = vcmp.ge.f32.partialorder %v2318_v44, 0.0 }
 0x4ab   : > { %v2319_v59 = vsel %vm6318_vm3, %v2311_v5, 0.0  ;;  %v2309_v60 = vadd.f32 %v4347_v6, %v2276_v48  ;;  %v2332_v55 = vmul.f32 0.1, %v2316_v46  ;;  %vm2324_vm0 = vcmp.ge.f32.partialorder %v2316_v46, 0.0 }
 0x4ac   : > { %v2354_v53 = vsel %vm610_vm6, %v2352_v50, %v2353_v43  ;;  %2364 = vst [vmem:[#allocation2] sm:$0xf0] %v2352_v50  ;;  %vm2327_vm13 = vcmp.ge.f32.partialorder %v2319_v59, 0.0  ;;  %v2335_v56 = vmul.f32 0.1, %v2319_v59  ;;  %v2342_v62 = vsel %vm2326_vm2, %v2318_v44, %v2334_v51 }
 0x4ad   : > { %v2317_v1 = vsel %vm6292_vm1, %v2309_v60, 0.0  ;;  %v2340_v4 = vsel %vm2324_vm0, %v2316_v46, %v2332_v55  ;;  %v2549_v9 = vshrl.u32 %v2354_v53, 16  ;;  %v2552_v8 = vshll.u32 %v2354_v53, 16  ;;  %v5408_v60 = vld [vmem:[#allocation11 + $0xd0] sm:$0xff]  }
 0x4ae   : > { %v2343_v3 = vsel %vm2327_vm13, %v2319_v59, %v2335_v56  ;;  %vm2325_vm11 = vcmp.ge.f32.partialorder %v2317_v1, 0.0  ;;  %v2333_v63 = vmul.f32 0.1, %v2317_v1  ;;  %v2415_v17 = vrot.slane %v2354_v53, 4 }
 0x4af   : > { %v2347_v0 = vpack.c.bf16 %v2343_v3, %v2342_v62  ;;  %v2551_v20 = vrot.slane %v2549_v9, 3  ;;  %v2727_v39 = vrot.slane %v2549_v9, 4  ;;  %v2554_v34 = vrot.slane %v2552_v8, 4  ;;  %v5409_v9 = vld [vmem:[#allocation11 + $0xd8] sm:$0xff]  }
 0x4b0   : > { %v2341_v7 = vsel %vm2325_vm11, %v2317_v1, %v2333_v63  ;;  %v2728_v25 = vrot.slane %v2552_v8, 5 }
 0x4b1   : > { %v2357_v10 = vrot.slane %v2347_v0, 4  ;;  %v2346_v6 = vpack.c.bf16 %v2341_v7, %v2340_v4  ;;  %v2555_v53 = vor.u32 %v2554_v34, %v2551_v20  ;;  %v5413_v20 = vld [vmem:[#allocation11 + $0xf8] sm:$0xff]  }
 0x4b2   : > { %v2729_v62 = vor.u32 %v2728_v25, %v2727_v39 }
 0x4b3   : > { %2368 = vst [vmem:[#allocation2 + $0x20] sm:$0xf] %v2357_v10  ;;  %v2355_v13 = vrot.slane %v2346_v6, 4  ;;  %v6554_v14 = vld [vmem:[#allocation2] sm:$0xf0] }
 0x4b4   : > { %v2369_v12 = vld [vmem:[#allocation2] sm:$0xf8]  ;;  %v2414_v15 = vrot.slane %v6554_v14, 4  ;;  %v2720_v39 = vshrl.u32 %v6554_v14, 16 }
 0x4b5   : > { %v2541_v18 = vshrl.u32 %v2369_v12, 16  ;;  %v2356_v21 = vsel %vm610_vm6, %v2353_v43, %v2355_v13  ;;  %v2358_v23 = vsel %vm610_vm6, %v2355_v13, %v2357_v10  ;;  %v2544_v37 = vshll.u32 %v2369_v12, 16  ;;  %v5410_v12 = vld [vmem:[#allocation11 + $0xe0] sm:$0xff]  }
 0x4b6   : > { %v2416_v26 = vsel %vm610_vm6, %v2414_v15, %v2415_v17  ;;  %v2417_v28 = vrot.slane %v2356_v21, 4  ;;  %v2419_v33 = vrot.slane %v2358_v23, 4  ;;  %v2558_v32 = vshrl.u32 %v2356_v21, 16 }
 0x4b7   : > { %4889 = vmatprep.mubr.bf16.mxu1 %v2416_v26  ;;  %v2561_v2 = vshll.u32 %v2356_v21, 16  ;;  %v2567_v30 = vshrl.u32 %v2358_v23, 16  ;;  %v2543_v41 = vrot.slane %v2541_v18, 3  ;;  %v2570_v11 = vshll.u32 %v2358_v23, 16  ;;  %v5412_v18 = vld [vmem:[#allocation11 + $0xf0] sm:$0xff]   ;;  %v5414_v21 = vld [vmem:[#allocation11 + $0x140] sm:$0xff]  }
 0x4b8   : > { %v2418_v38 = vsel %vm610_vm6, %v2415_v17, %v2417_v28  ;;  %v2420_v40 = vsel %vm610_vm6, %v2417_v28, %v2419_v33  ;;  %v2546_v43 = vrot.slane %v2544_v37, 4  ;;  %v2560_v44 = vrot.slane %v2558_v32, 3  ;;  %v5411_v17 = vld [vmem:[#allocation11 + $0xe8] sm:$0xff]  }
 0x4b9   : > { %4890 = vmatmul.mubr.bf16.vlgmr.msra.gmra.mrb[8].mxu1 %v2418_v38  ;;  %v2563_v5 = vrot.slane %v2561_v2, 4  ;;  %v2569_v48 = vrot.slane %v2567_v30, 3  ;;  %v2572_v51 = vrot.slane %v2570_v11, 4  ;;  %v2731_v46 = vrot.slane %v2558_v32, 4  ;;  %v5415_v28 = vld [vmem:[#allocation11 + $0x148] sm:$0xff]   ;;  %v5417_v38 = vld [vmem:[#allocation11 + $0x158] sm:$0xff]  }
 0x4ba   : > { %4898 = vmatpush3.bf16.msra.mxu1 %v6531_v49  ;;  %4893 = vmatprep.mubr.bf16.mxu1 %v2420_v40  ;;  %v2373_v50 = vld [vmem:[#allocation2 + $0x20] sm:$0xf]  ;;  %v2732_v59 = vrot.slane %v2561_v2, 5  ;;  %v2547_v63 = vor.u32 %v2546_v43, %v2543_v41  ;;  %v2735_v4 = vrot.slane %v2567_v30, 4  ;;  %v2736_v10 = vrot.slane %v2570_v11, 5  ;;  %v5416_v2 = vld [vmem:[#allocation11 + $0x150] sm:$0xff]  }
 0x4bb   : > { %4899 = vmatprep.subr.bf16.mxu1 %v5407_v35  ;;  %v2564_v55 = vor.u32 %v2563_v5, %v2560_v44  ;;  %v2421_v56 = vrot.slane %v2373_v50, 4  ;;  %v2573_v1 = vor.u32 %v2572_v51, %v2569_v48  ;;  %v2576_v23 = vshrl.u32 %v2373_v50, 16  ;;  %v5418_v41 = vld [vmem:[#allocation11 + $0x160] sm:$0xff]   ;;  %v5419_v11 = vld [vmem:[#allocation11 + $0x168] sm:$0xff]   ;;  %v5420_v43 = vld [vmem:[#allocation11 + $0x170] sm:$0xff]  }
 0x4bc   : > { %v2733_v3 = vor.u32 %v2732_v59, %v2731_v46  ;;  %v2556_v8 = vsel %vm798_vm7, %v2547_v63, %v2555_v53  ;;  %v6570_v13 = vor.u32 %v2736_v10, %v2735_v4  ;;  %v2579_v37 = vshll.u32 %v2373_v50, 16  ;;  %v5421_v44 = vld [vmem:[#allocation11 + $0x178] sm:$0xff]   ;;  %v5428_v63 = vld [vmem:[#allocation9 + $0x1f0] sm:$0xff]   ;;  %v6581_v4 = vld [vmem:[#allocation9 + $0x180] sm:$0xff]  }
 0x4bd   : > { %v2565_v0 = vsel %vm798_vm7, %v2555_v53, %v2564_v55  ;;  %v2574_v49 = vsel %vm798_vm7, %v2564_v55, %v2573_v1  ;;  %v2422_v6 = vsel %vm610_vm6, %v2419_v33, %v2421_v56  ;;  %v2723_v26 = vshll.u32 %v6554_v14, 16  ;;  %v2701_v5 = vld [vmem:[#allocation2 + $0x20] sm:$0x1f]  ;;  %v5422_v53 = vld [vmem:[#allocation9 + $0x1c0] sm:$0xff]   ;;  %v5423_v55 = vld [vmem:[#allocation9 + $0x1c8] sm:$0xff]  }
 0x4be   : > { %4900 = vmatpush3.bf16.msra.mxu1 %v5407_v35  ;;  %v6566_v7 = vsel %vm978_vm8, %v2729_v62, %v2733_v3  ;;  %v2738_v15 = vsel %vm978_vm8, %v2733_v3, %v6570_v13  ;;  %v2578_v33 = vrot.slane %v2576_v23, 3  ;;  %v2581_v34 = vrot.slane %v2579_v37, 4  ;;  %4945 = vmatprep.subr.bf16.mxu0 %v5422_v53  ;;  %v5424_v56 = vld [vmem:[#allocation9 + $0x1d0] sm:$0xff]   ;;  %v5427_v3 = vld [vmem:[#allocation9 + $0x1e8] sm:$0xff]  }
 0x4bf   : > { %4901 = vmatprep.subr.bf16.mxu1 %v5408_v60  ;;  %v2722_v35 = vrot.slane %v2720_v39, 4  ;;  %v2725_v32 = vrot.slane %v2723_v26, 5  ;;  %v2740_v48 = vshrl.u32 %v2701_v5, 16  ;;  %v2743_v50 = vshll.u32 %v2701_v5, 16  ;;  %4946 = vmatpush3.bf16.msra.mxu0 %v5422_v53 }
 0x4c0   : > { %v2582_v30 = vor.u32 %v2581_v34, %v2578_v33  ;;  %4947 = vmatprep.subr.bf16.mxu0 %v5423_v55 }
 0x4c1   : > { %4894 = vmatmul.mubr.bf16.gmra.mrb[12].mxu1 %v2422_v6  ;;  %v2726_v25 = vor.u32 %v2725_v32, %v2722_v35  ;;  %v2742_v51 = vrot.slane %v2740_v48, 4  ;;  %v2745_v46 = vrot.slane %v2743_v50, 5 }
 0x4c2   : > { %4902 = vmatpush3.bf16.msra.mxu1 %v5408_v60  ;;  %4913 = vmatprep.mubr.bf16.mxu1 %v2556_v8  ;;  %v2583_v40 = vsel %vm798_vm7, %v2573_v1, %v2582_v30  ;;  %v5425_v1 = vld [vmem:[#allocation9 + $0x1d8] sm:$0xff]  }
 0x4c3   : > { %4903 = vmatprep.subr.bf16.mxu1 %v5409_v9  ;;  %v2730_v14 = vsel %vm978_vm8, %v2726_v25, %v2729_v62  ;;  %v2746_v59 = vor.u32 %v2745_v46, %v2742_v51  ;;  %4948 = vmatpush3.bf16.msra.mxu0 %v5423_v55  ;;  %v5426_v62 = vld [vmem:[#allocation9 + $0x1e0] sm:$0xff]  }
 0x4c4   : > { %4949 = vmatprep.subr.bf16.mxu0 %v5424_v56 }
 0x4c5   : > { %v2747_v60 = vsel %vm978_vm8, %v6570_v13, %v2746_v59 }
 0x4c6   : > { %4904 = vmatpush3.bf16.msra.mxu1 %v5409_v9 }
 0x4c7   : > { %4905 = vmatprep.subr.bf16.mxu1 %v5410_v12  ;;  %4950 = vmatpush3.bf16.msra.mxu0 %v5424_v56 }
 0x4c8   : > { %4951 = vmatprep.subr.bf16.mxu0 %v5425_v1 }
 0x4ca   : > { %4906 = vmatpush3.bf16.msra.mxu1 %v5410_v12 }
 0x4cb   : > { %4907 = vmatprep.subr.bf16.mxu1 %v5411_v17  ;;  %4952 = vmatpush3.bf16.msra.mxu0 %v5425_v1 }
 0x4cc   : > { %4953 = vmatprep.subr.bf16.mxu0 %v5426_v62 }
 0x4ce   : > { %4908 = vmatpush3.bf16.msra.mxu1 %v5411_v17 }
 0x4cf   : > { %4909 = vmatprep.subr.bf16.mxu1 %v5412_v18  ;;  %4954 = vmatpush3.bf16.msra.mxu0 %v5426_v62 }
 0x4d0   : > { %4955 = vmatprep.subr.bf16.mxu0 %v5427_v3 }
 0x4d2   : > { %4910 = vmatpush3.bf16.msra.mxu1 %v5412_v18 }
 0x4d3   : > { %4911 = vmatprep.subr.bf16.mxu1 %v5413_v20  ;;  %4956 = vmatpush3.bf16.msra.mxu0 %v5427_v3 }
 0x4d4   : > { %4957 = vmatprep.subr.bf16.mxu0 %v5428_v63 }
 0x4d6   : > { %4912 = vmatpush3.bf16.msra.mxu1 %v5413_v20 }
 0x4d7   : > { %4921 = vmatprep.subr.bf16.mxu1 %v5414_v21  ;;  %4958 = vmatpush3.bf16.msra.mxu0 %v5428_v63 }
 0x4d9   : > { %4914 = vmatmul.mubr.bf16.vlgmr.msra.gmra.mrb[8].mxu1 %v2565_v0  ;;  %v5429_v0 = vld [vmem:[#allocation9 + $0x1f8] sm:$0xff]  }
 0x4da   : > { %4917 = vmatprep.mubr.bf16.mxu1 %v2574_v49  ;;  %4922 = vmatpush3.bf16.msra.mxu1 %v5414_v21  ;;  %v4373_v49 = vld [vmem:[%s6945_s19 + $0x1] ss:$0 sm:$0xff] }
 0x4db   : > { %4923 = vmatprep.subr.bf16.mxu1 %v5415_v28  ;;  %4959 = vmatprep.subr.bf16.mxu0 %v5429_v0 }
 0x4dc   : > { %4960 = vmatpush3.bf16.msra.mxu0 %v5429_v0 }
 0x4dd   : > { %4969 = vmatprep.subr.bf16.mxu0 %v6581_v4 }
 0x4de   : > { %4924 = vmatpush3.bf16.msra.mxu1 %v5415_v28 }
 0x4df   : > { %4925 = vmatprep.subr.bf16.mxu1 %v5416_v2 }
 0x4e1   : > { %4918 = vmatmul.mubr.bf16.gmra.mrb[12].mxu1 %v2583_v40 }
 0x4e2   : > { %4926 = vmatpush3.bf16.msra.mxu1 %v5416_v2  ;;  %4937 = vmatprep.mubr.bf16.mxu1 %v2730_v14 }
 0x4e3   : > { %4927 = vmatprep.subr.bf16.mxu1 %v5417_v38 }
 0x4e6   : > { %4928 = vmatpush3.bf16.msra.mxu1 %v5417_v38 }
 0x4e7   : > { %4929 = vmatprep.subr.bf16.mxu1 %v5418_v41 }
 0x4ea   : > { %4930 = vmatpush3.bf16.msra.mxu1 %v5418_v41 }
 0x4eb   : > { %4931 = vmatprep.subr.bf16.mxu1 %v5419_v11 }
 0x4ee   : > { %4932 = vmatpush3.bf16.msra.mxu1 %v5419_v11 }
 0x4ef   : > { %4933 = vmatprep.subr.bf16.mxu1 %v5420_v43 }
 0x4f2   : > { %4934 = vmatpush3.bf16.msra.mxu1 %v5420_v43 }
 0x4f3   : > { %4935 = vmatprep.subr.bf16.mxu1 %v5421_v44 }
 0x4f6   : > { %4936 = vmatpush3.bf16.msra.mxu1 %v5421_v44 }
 0x4f9   : > { %4938 = vmatmul.mubr.bf16.vlgmr.msra.gmra.mrb[8].mxu1 %v6566_v7 }
 0x4fa   : > { %4941 = vmatprep.mubr.bf16.mxu1 %v2738_v15 }
 0x501   : > { %4942 = vmatmul.mubr.bf16.gmra.mrb[12].mxu1 %v2747_v60 }
 0x5cc   : > { %v4939_v7 = vpop.f32.mrb[8].mxu1 }
 0x5cd   : > { %v2883_v9 = vadd.f32 %v4939_v7, %v4373_v49  ;;  %v2834_v10 = vpop.f32.mrb[9].mxu1 }
 0x5ce   : > { %v2881_v6 = vadd.f32 %v4373_v49, %v2834_v10  ;;  %v4940_v8 = vpop.f32.mrb[10].mxu1 }
 0x5cf   : > { %v2891_v13 = vsel %vm6250_vm9, %v2883_v9, 0.0  ;;  %v2884_v12 = vadd.f32 %v4940_v8, %v4373_v49  ;;  %v2837_v15 = vpop.f32.mrb[11].mxu1 }
 0x5d0   : > { %v6590_v17 = vadd.f32 %v2891_v13, %v6431_v16  ;;  %v2889_v18 = vsel %vm6234_vm10, %v2881_v6, 0.0  ;;  %v2882_v20 = vadd.f32 %v4373_v49, %v2837_v15 }
 0x5d1   : > { %v2897_v21 = vadd.f32 %v2889_v18, %v6436_v19  ;;  %v2892_v23 = vsel %vm6264_vm5, %v2884_v12, 0.0 }
 0x5d2   : > { %v2915_v37 = vmul.f32 0.1, %v6590_v17  ;;  %v6599_v39 = vadd.f32 %v2892_v23, %v6442_v22  ;;  %v2890_v26 = vsel %vm6240_vm14, %v2882_v20, 0.0  ;;  %vm2907_vm15 = vcmp.ge.f32.partialorder %v6590_v17, 0.0 }
 0x5d3   : > { %v2913_v16 = vmul.f32 0.1, %v2897_v21  ;;  %v2898_v28 = vadd.f32 %v2890_v26, %v6449_v24  ;;  %vm2905_vm2 = vcmp.ge.f32.partialorder %v2897_v21, 0.0  ;;  %v5431_v26 = vld [vmem:[#allocation9 + $0x188] sm:$0xff]  }
 0x5d4   : > { %vm2908_vm13 = vcmp.ge.f32.partialorder %v6599_v39, 0.0  ;;  %v2916_v19 = vmul.f32 0.1, %v6599_v39  ;;  %v4943_v33 = vpop.f32.mrb[12].mxu1  ;;  %v2923_v22 = vsel %vm2907_vm15, %v6590_v17, %v2915_v37 }
 0x5d5   : > { %vm2906_vm0 = vcmp.ge.f32.partialorder %v2898_v28, 0.0  ;;  %v2914_v34 = vmul.f32 0.1, %v2898_v28  ;;  %v2887_v35 = vadd.f32 %v4943_v33, %v4373_v49  ;;  %v2850_v32 = vpop.f32.mrb[13].mxu1  ;;  %v2921_v38 = vsel %vm2905_vm2, %v2897_v21, %v2913_v16 }
 0x5d6   : > { %v2924_v2 = vsel %vm2908_vm13, %v6599_v39, %v2916_v19  ;;  %v2885_v30 = vadd.f32 %v4373_v49, %v2850_v32  ;;  %v4944_v25 = vpop.f32.mrb[14].mxu1 }
 0x5d7   : > { %v2922_v40 = vsel %vm2906_vm0, %v2898_v28, %v2914_v34  ;;  %v2895_v24 = vsel %vm6312_vm12, %v2887_v35, 0.0  ;;  %v2888_v14 = vadd.f32 %v4944_v25, %v4373_v49  ;;  %v2853_v41 = vpop.f32.mrb[15].mxu1  ;;  %v2930_v48 = vpack.c.bf16 %v2924_v2, %v2923_v22  ;;  %v5432_v22 = vld [vmem:[#allocation9 + $0x190] sm:$0xff]  }
 0x5d8   : > { %v2929_v11 = vpack.c.bf16 %v2922_v40, %v2921_v38  ;;  %v2903_v43 = vadd.f32 %v2895_v24, %v6463_v47  ;;  %v2893_v44 = vsel %vm6283_vm4, %v2885_v30, 0.0  ;;  %v2886_v5 = vadd.f32 %v4373_v49, %v2853_v41  ;;  %v5433_v24 = vld [vmem:[#allocation9 + $0x198] sm:$0xff]   ;;  %v5434_v41 = vld [vmem:[#allocation9 + $0x1a0] sm:$0xff]  }
 0x5d9   : > { %v6615_v50 = vadd.f32 %v2893_v44, %v6468_v52  ;;  %v2896_v51 = vsel %vm6318_vm3, %v2888_v14, 0.0  ;;  %v2938_v55 = vrot.slane %v2930_v48, 4  ;;  %vm3126_vm0 = vsmask.f32 6400 }
 0x5da   : > { %v2937_v46 = vrot.slane %v2929_v11, 4  ;;  %v2919_v59 = vmul.f32 0.1, %v2903_v43  ;;  %v2904_v60 = vadd.f32 %v2896_v51, %v6474_v58  ;;  %vm2911_vm11 = vcmp.ge.f32.partialorder %v2903_v43, 0.0  ;;  %v5435_v11 = vld [vmem:[#allocation9 + $0x1a8] sm:$0xff]  }
 0x5db   : > { %v2894_v53 = vsel %vm6292_vm1, %v2886_v5, 0.0  ;;  %v2917_v56 = vmul.f32 0.1, %v6615_v50  ;;  %vm2909_vm2 = vcmp.ge.f32.partialorder %v6615_v50, 0.0 }
 0x5dc   : > { %2949 = vst [vmem:[#allocation2] sm:$0xf0] %v2937_v46  ;;  %vm2912_vm15 = vcmp.ge.f32.partialorder %v2904_v60, 0.0  ;;  %v2920_v47 = vmul.f32 0.1, %v2904_v60  ;;  %v6624_v52 = vadd.f32 %v2894_v53, %v6483_v61  ;;  %v2927_v1 = vsel %vm2911_vm11, %v2903_v43, %v2919_v59  ;;  %v5436_v43 = vld [vmem:[#allocation9 + $0x1b0] sm:$0xff]  }
 0x5dd   : > { %v6630_v63 = vsel %vm610_vm6, %v2937_v46, %v2938_v55  ;;  %v2925_v0 = vsel %vm2909_vm2, %v6615_v50, %v2917_v56  ;;  %v5437_v46 = vld [vmem:[#allocation9 + $0x1b8] sm:$0xff]   ;;  %vm3307_vm11 = vsmask.f32 1280 }
 0x5de   : > { %v2928_v62 = vsel %vm2912_vm15, %v2904_v60, %v2920_v47  ;;  %vm2910_vm13 = vcmp.ge.f32.partialorder %v6624_v52, 0.0  ;;  %v2918_v58 = vmul.f32 0.1, %v6624_v52  ;;  %v3001_v13 = vrot.slane %v6630_v63, 4 }
 0x5df   : > { %v2932_v3 = vpack.c.bf16 %v2928_v62, %v2927_v1  ;;  %v3136_v16 = vshrl.u32 %v6630_v63, 16  ;;  %v3139_v28 = vshll.u32 %v6630_v63, 16  ;;  %v5438_v1 = vld [vmem:[#allocation9 + $0x200] sm:$0xff]   ;;  %v5443_v63 = vld [vmem:[#allocation9 + $0x228] sm:$0xff]  }
 0x5e0   : > { %v2926_v7 = vsel %vm2910_vm13, %v6624_v52, %v2918_v58 }
 0x5e1   : > { %v2942_v49 = vrot.slane %v2932_v3, 4  ;;  %v2931_v9 = vpack.c.bf16 %v2926_v7, %v2925_v0  ;;  %v3138_v2 = vrot.slane %v3136_v16, 1  ;;  %v3141_v30 = vrot.slane %v3139_v28, 2 }
 0x5e3   : > { %2953 = vst [vmem:[#allocation2 + $0x20] sm:$0xf] %v2942_v49  ;;  %v2976_v61 = vld [vmem:[#allocation2] sm:$0xf0]  ;;  %v2940_v6 = vrot.slane %v2931_v9, 4  ;;  %v3142_v40 = vor.u32 %v3141_v30, %v3138_v2  ;;  %v5439_v9 = vld [vmem:[#allocation9 + $0x208] sm:$0xff]  }
 0x5e4   : > { %v2954_v10 = vld [vmem:[#allocation2] sm:$0xfe]  ;;  %v3000_v8 = vrot.slane %v2976_v61, 4 }
 0x5e5   : > { %v3128_v12 = vshrl.u32 %v2954_v10, 16  ;;  %v6636_v15 = vsel %vm610_vm6, %v2938_v55, %v2940_v6  ;;  %v6639_v18 = vsel %vm610_vm6, %v2940_v6, %v2942_v49  ;;  %v3131_v21 = vshll.u32 %v2954_v10, 16  ;;  %v3288_v56 = vld [vmem:[#allocation2] sm:$0xc0] }
 0x5e6   : > { %v3002_v20 = vsel %vm610_vm6, %v3000_v8, %v3001_v13  ;;  %v3003_v23 = vrot.slane %v6636_v15, 4  ;;  %v3005_v37 = vrot.slane %v6639_v18, 4  ;;  %v3145_v44 = vshrl.u32 %v6636_v15, 16 }
 0x5e7   : > { %4961 = vmatprep.mubr.bf16.mxu0 %v3002_v20  ;;  %v3130_v35 = vrot.slane %v3128_v12, 1  ;;  %v3133_v32 = vrot.slane %v3131_v21, 2  ;;  %v3148_v5 = vshll.u32 %v6636_v15, 16  ;;  %v3154_v48 = vshrl.u32 %v6639_v18, 16  ;;  %v5440_v15 = vld [vmem:[#allocation9 + $0x210] sm:$0xff]  }
 0x5e8   : > { %v3004_v19 = vsel %vm610_vm6, %v3001_v13, %v3003_v23  ;;  %v3006_v33 = vsel %vm610_vm6, %v3003_v23, %v3005_v37  ;;  %v3157_v51 = vshll.u32 %v6639_v18, 16  ;;  %v3147_v59 = vrot.slane %v3145_v44, 1 }
 0x5e9   : > { %4962 = vmatmul.mubr.bf16.vlgmr.msra.gmra.mrb[16].mxu0 %v3004_v19  ;;  %v3134_v38 = vor.u32 %v3133_v32, %v3130_v35  ;;  %v3150_v60 = vrot.slane %v3148_v5, 2  ;;  %v3156_v53 = vrot.slane %v3154_v48, 1  ;;  %v3309_v49 = vshrl.u32 %v3288_v56, 16 }
 0x5ea   : > { %v2977_v34 = vld [vmem:[#allocation2 + $0x20] sm:$0xf]  ;;  %4970 = vmatpush3.bf16.msra.mxu0 %v6581_v4  ;;  %4965 = vmatprep.mubr.bf16.mxu0 %v3006_v33  ;;  %v3159_v47 = vrot.slane %v3157_v51, 2  ;;  %v3312_v7 = vshll.u32 %v3288_v56, 16  ;;  %v3316_v18 = vrot.slane %v3136_v16, 6  ;;  %v3317_v20 = vrot.slane %v3139_v28, 7 }
 0x5eb   : > { %4971 = vmatprep.subr.bf16.mxu0 %v5431_v26  ;;  %v3007_v25 = vrot.slane %v2977_v34, 4  ;;  %v3143_v4 = vsel %vm3126_vm0, %v3134_v38, %v3142_v40  ;;  %v2958_v55 = vld [vmem:[#allocation2 + $0x20] sm:$0x3]  ;;  %v3151_v62 = vor.u32 %v3150_v60, %v3147_v59  ;;  %v3311_v13 = vrot.slane %v3309_v49, 6  ;;  %v5442_v34 = vld [vmem:[#allocation9 + $0x220] sm:$0xff]   ;;  %v5444_v16 = vld [vmem:[#allocation9 + $0x230] sm:$0xff]  }
 0x5ec   : > { %v3163_v3 = vshrl.u32 %v2958_v55, 16  ;;  %v3166_v58 = vshll.u32 %v2958_v55, 16  ;;  %v3160_v0 = vor.u32 %v3159_v47, %v3156_v53  ;;  %v3314_v12 = vrot.slane %v3312_v7, 7  ;;  %v5445_v28 = vld [vmem:[#allocation9 + $0x238] sm:$0xff]   ;;  %v5450_v59 = vld [vmem:[#allocation11 + $0x1e0] sm:$0xff]   ;;  %v5451_v60 = vld [vmem:[#allocation11 + $0x1e8] sm:$0xff]  }
 0x5ed   : > { %v3008_v14 = vsel %vm610_vm6, %v3005_v37, %v3007_v25  ;;  %v3152_v61 = vsel %vm3126_vm0, %v3142_v40, %v3151_v62  ;;  %v3318_v37 = vor.u32 %v3317_v20, %v3316_v18  ;;  %v3320_v35 = vrot.slane %v3145_v44, 6  ;;  %v3289_v30 = vld [vmem:[#allocation2 + $0x20] sm:$0x7f]  ;;  %v5452_v53 = vld [vmem:[#allocation11 + $0x1f0] sm:$0xff]   ;;  %v6670_v55 = vld [vmem:[#allocation11 + $0x180] sm:$0xff]  }
 0x5ee   : > { %4972 = vmatpush3.bf16.msra.mxu0 %v5431_v26  ;;  %v3165_v10 = vrot.slane %v3163_v3, 1  ;;  %v3168_v6 = vrot.slane %v3166_v58, 2  ;;  %v3161_v8 = vsel %vm3126_vm0, %v3151_v62, %v3160_v0  ;;  %v3315_v23 = vor.u32 %v3314_v12, %v3311_v13  ;;  %v5441_v26 = vld [vmem:[#allocation9 + $0x218] sm:$0xff]  }
 0x5ef   : > { %4973 = vmatprep.subr.bf16.mxu0 %v5432_v22  ;;  %v3321_v32 = vrot.slane %v3148_v5, 7  ;;  %v3325_v2 = vrot.slane %v3157_v51, 7  ;;  %v3329_v38 = vshrl.u32 %v3289_v30, 16  ;;  %v3332_v40 = vshll.u32 %v3289_v30, 16  ;;  %v5446_v5 = vld [vmem:[#allocation11 + $0x1c0] sm:$0xff]   ;;  %v5448_v51 = vld [vmem:[#allocation11 + $0x1d0] sm:$0xff]  }
 0x5f0   : > { %v3169_v21 = vor.u32 %v3168_v6, %v3165_v10  ;;  %v3319_v33 = vsel %vm3307_vm11, %v3315_v23, %v3318_v37  ;;  %5017 = vmatprep.subr.bf16.mxu1 %v5446_v5  ;;  %v5453_v47 = vld [vmem:[#allocation11 + $0x1f8] sm:$0xff]  }
 0x5f1   : > { %4966 = vmatmul.mubr.bf16.gmra.mrb[20].mxu0 %v3008_v14  ;;  %v3322_v25 = vor.u32 %v3321_v32, %v3320_v35  ;;  %5018 = vmatpush3.bf16.msra.mxu1 %v5446_v5  ;;  %v4399_v56 = vld [vmem:[%s6944_s4 + $0x2] ss:$0 sm:$0xff] }
 0x5f2   : > { %4974 = vmatpush3.bf16.msra.mxu0 %v5432_v22  ;;  %4985 = vmatprep.mubr.bf16.mxu0 %v3143_v4  ;;  %v3170_v19 = vsel %vm3126_vm0, %v3160_v0, %v3169_v21  ;;  %v3324_v22 = vrot.slane %v3154_v48, 6  ;;  %v3331_v4 = vrot.slane %v3329_v38, 6  ;;  %v5447_v48 = vld [vmem:[#allocation11 + $0x1c8] sm:$0xff]  }
 0x5f3   : > { %4975 = vmatprep.subr.bf16.mxu0 %v5433_v24  ;;  %v3323_v14 = vsel %vm3307_vm11, %v3318_v37, %v3322_v25  ;;  %5019 = vmatprep.subr.bf16.mxu1 %v5447_v48 }
 0x5f5   : > { %5020 = vmatpush3.bf16.msra.mxu1 %v5447_v48 }
 0x5f6   : > { %4976 = vmatpush3.bf16.msra.mxu0 %v5433_v24  ;;  %v3326_v24 = vor.u32 %v3325_v2, %v3324_v22  ;;  %5021 = vmatprep.subr.bf16.mxu1 %v5448_v51 }
 0x5f7   : > { %4977 = vmatprep.subr.bf16.mxu0 %v5434_v41 }
 0x5f9   : > { %5022 = vmatpush3.bf16.msra.mxu1 %v5448_v51 }
 0x5fa   : > { %4978 = vmatpush3.bf16.msra.mxu0 %v5434_v41  ;;  %v3334_v41 = vrot.slane %v3332_v40, 7 }
 0x5fb   : > { %4979 = vmatprep.subr.bf16.mxu0 %v5435_v11 }
 0x5fe   : > { %4980 = vmatpush3.bf16.msra.mxu0 %v5435_v11  ;;  %v3327_v11 = vsel %vm3307_vm11, %v3322_v25, %v3326_v24 }
 0x5ff   : > { %4981 = vmatprep.subr.bf16.mxu0 %v5436_v43 }
 0x602   : > { %4982 = vmatpush3.bf16.msra.mxu0 %v5436_v43  ;;  %v3335_v43 = vor.u32 %v3334_v41, %v3331_v4 }
 0x603   : > { %4983 = vmatprep.subr.bf16.mxu0 %v5437_v46 }
 0x604   : > { %v3336_v44 = vsel %vm3307_vm11, %v3326_v24, %v3335_v43 }
 0x606   : > { %4984 = vmatpush3.bf16.msra.mxu0 %v5437_v46  ;;  %v5449_v46 = vld [vmem:[#allocation11 + $0x1d8] sm:$0xff]  }
 0x607   : > { %4993 = vmatprep.subr.bf16.mxu0 %v5438_v1  ;;  %5023 = vmatprep.subr.bf16.mxu1 %v5449_v46 }
 0x608   : > { %5024 = vmatpush3.bf16.msra.mxu1 %v5449_v46 }
 0x609   : > { %4986 = vmatmul.mubr.bf16.vlgmr.msra.gmra.mrb[16].mxu0 %v3152_v61  ;;  %5025 = vmatprep.subr.bf16.mxu1 %v5450_v59 }
 0x60a   : > { %4989 = vmatprep.mubr.bf16.mxu0 %v3161_v8  ;;  %4994 = vmatpush3.bf16.msra.mxu0 %v5438_v1 }
 0x60b   : > { %4995 = vmatprep.subr.bf16.mxu0 %v5439_v9 }
 0x60c   : > { %5026 = vmatpush3.bf16.msra.mxu1 %v5450_v59 }
 0x60d   : > { %5027 = vmatprep.subr.bf16.mxu1 %v5451_v60 }
 0x60e   : > { %4996 = vmatpush3.bf16.msra.mxu0 %v5439_v9 }
 0x60f   : > { %4997 = vmatprep.subr.bf16.mxu0 %v5440_v15 }
 0x610   : > { %5028 = vmatpush3.bf16.msra.mxu1 %v5451_v60 }
 0x611   : > { %4990 = vmatmul.mubr.bf16.gmra.mrb[20].mxu0 %v3170_v19  ;;  %5029 = vmatprep.subr.bf16.mxu1 %v5452_v53 }
 0x612   : > { %4998 = vmatpush3.bf16.msra.mxu0 %v5440_v15  ;;  %5009 = vmatprep.mubr.bf16.mxu0 %v3319_v33 }
 0x613   : > { %4999 = vmatprep.subr.bf16.mxu0 %v5441_v26 }
 0x614   : > { %5030 = vmatpush3.bf16.msra.mxu1 %v5452_v53 }
 0x615   : > { %5031 = vmatprep.subr.bf16.mxu1 %v5453_v47 }
 0x616   : > { %5000 = vmatpush3.bf16.msra.mxu0 %v5441_v26 }
 0x617   : > { %5001 = vmatprep.subr.bf16.mxu0 %v5442_v34 }
 0x618   : > { %5032 = vmatpush3.bf16.msra.mxu1 %v5453_v47 }
 0x619   : > { %5041 = vmatprep.subr.bf16.mxu1 %v6670_v55 }
 0x61a   : > { %5002 = vmatpush3.bf16.msra.mxu0 %v5442_v34 }
 0x61b   : > { %5003 = vmatprep.subr.bf16.mxu0 %v5443_v63 }
 0x61e   : > { %5004 = vmatpush3.bf16.msra.mxu0 %v5443_v63 }
 0x61f   : > { %5005 = vmatprep.subr.bf16.mxu0 %v5444_v16 }
 0x622   : > { %5006 = vmatpush3.bf16.msra.mxu0 %v5444_v16 }
 0x623   : > { %5007 = vmatprep.subr.bf16.mxu0 %v5445_v28 }
 0x626   : > { %5008 = vmatpush3.bf16.msra.mxu0 %v5445_v28 }
 0x629   : > { %5010 = vmatmul.mubr.bf16.vlgmr.msra.gmra.mrb[16].mxu0 %v3323_v14 }
 0x62a   : > { %5013 = vmatprep.mubr.bf16.mxu0 %v3327_v11 }
 0x631   : > { %5014 = vmatmul.mubr.bf16.gmra.mrb[20].mxu0 %v3336_v44 }
 0x6fc   : > { %v5011_v1 = vpop.f32.mrb[16].mxu0 }
 0x6fd   : > { %v3472_v62 = vadd.f32 %v5011_v1, %v4399_v56  ;;  %v3423_v3 = vpop.f32.mrb[17].mxu0 }
 0x6fe   : > { %v3470_v58 = vadd.f32 %v4399_v56, %v3423_v3  ;;  %v5012_v0 = vpop.f32.mrb[18].mxu0 }
 0x6ff   : > { %v3480_v49 = vsel %vm6250_vm9, %v3472_v62, 0.0  ;;  %v3473_v7 = vadd.f32 %v5012_v0, %v4399_v56  ;;  %v3426_v9 = vpop.f32.mrb[19].mxu0 }
 0x700   : > { %v3496_v61 = vmul.f32 0.1, %v3480_v49  ;;  %v3478_v10 = vsel %vm6234_vm10, %v3470_v58, 0.0  ;;  %v3471_v6 = vadd.f32 %v4399_v56, %v3426_v9  ;;  %vm3488_vm15 = vcmp.ge.f32.partialorder %v3480_v49, 0.0 }
 0x701   : > { %v3494_v8 = vmul.f32 0.1, %v3478_v10  ;;  %v3481_v13 = vsel %vm6264_vm5, %v3473_v7, 0.0  ;;  %vm3486_vm2 = vcmp.ge.f32.partialorder %v3478_v10, 0.0 }
 0x702   : > { %vm3489_vm13 = vcmp.ge.f32.partialorder %v3481_v13, 0.0  ;;  %v3497_v12 = vmul.f32 0.1, %v3481_v13  ;;  %v3479_v15 = vsel %vm6240_vm14, %v3471_v6, 0.0  ;;  %v3504_v20 = vsel %vm3488_vm15, %v3480_v49, %v3496_v61  ;;  %v5455_v6 = vld [vmem:[#allocation11 + $0x188] sm:$0xff]  }
 0x703   : > { %vm3487_vm0 = vcmp.ge.f32.partialorder %v3479_v15, 0.0  ;;  %v3495_v18 = vmul.f32 0.1, %v3479_v15  ;;  %v3502_v37 = vsel %vm3486_vm2, %v3478_v10, %v3494_v8 }
 0x704   : > { %v3505_v21 = vsel %vm3489_vm13, %v3481_v13, %v3497_v12  ;;  %v5015_v23 = vpop.f32.mrb[20].mxu0 }
 0x705   : > { %v3511_v27 = vpack.c.bf16 %v3505_v21, %v3504_v20  ;;  %v3503_v26 = vsel %vm3487_vm0, %v3479_v15, %v3495_v18  ;;  %v3476_v19 = vadd.f32 %v5015_v23, %v4399_v56  ;;  %v3439_v33 = vpop.f32.mrb[21].mxu0 }
 0x706   : > { %v3510_v34 = vpack.c.bf16 %v3503_v26, %v3502_v37  ;;  %v3474_v63 = vadd.f32 %v4399_v56, %v3439_v33  ;;  %v5016_v16 = vpop.f32.mrb[22].mxu0 }
 0x707   : > { %v3519_v28 = vrot.slane %v3511_v27, 4  ;;  %v3484_v35 = vsel %vm6312_vm12, %v3476_v19, 0.0  ;;  %v3477_v32 = vadd.f32 %v5016_v16, %v4399_v56  ;;  %v3442_v29 = vpop.f32.mrb[23].mxu0 }
 0x708   : > { %v3518_v22 = vrot.slane %v3510_v34, 4  ;;  %v3500_v2 = vmul.f32 0.1, %v3484_v35  ;;  %v3482_v30 = vsel %vm6283_vm4, %v3474_v63, 0.0  ;;  %vm3492_vm10 = vcmp.ge.f32.partialorder %v3484_v35, 0.0 }
 0x709   : > { %v3485_v25 = vsel %vm6318_vm3, %v3477_v32, 0.0  ;;  %v3475_v38 = vadd.f32 %v4399_v56, %v3442_v29  ;;  %v3498_v24 = vmul.f32 0.1, %v3482_v30  ;;  %vm3490_vm11 = vcmp.ge.f32.partialorder %v3482_v30, 0.0 }
 0x70a   : > { %v3520_v40 = vsel %vm610_vm6, %v3518_v22, %v3519_v28  ;;  %3530 = vst [vmem:[#allocation2] sm:$0xf0] %v3518_v22  ;;  %vm3493_vm14 = vcmp.ge.f32.partialorder %v3485_v25, 0.0  ;;  %v3501_v14 = vmul.f32 0.1, %v3485_v25  ;;  %v3508_v4 = vsel %vm3492_vm10, %v3484_v35, %v3500_v2 }
 0x70b   : > { %v3483_v54 = vsel %vm6292_vm1, %v3475_v38, 0.0  ;;  %v3506_v44 = vsel %vm3490_vm11, %v3482_v30, %v3498_v24  ;;  %v3711_v57 = vshrl.u32 %v3520_v40, 16  ;;  %v3714_v46 = vshll.u32 %v3520_v40, 16 }
 0x70c   : > { %v3509_v41 = vsel %vm3493_vm14, %v3485_v25, %v3501_v14  ;;  %vm3491_vm12 = vcmp.ge.f32.partialorder %v3483_v54, 0.0  ;;  %v3499_v11 = vmul.f32 0.1, %v3483_v54  ;;  %v3581_v56 = vrot.slane %v3520_v40, 4  ;;  %v5457_v14 = vld [vmem:[#allocation11 + $0x198] sm:$0xff]  }
 0x70d   : > { %v3513_v43 = vpack.c.bf16 %v3509_v41, %v3508_v4  ;;  %v3713_v62 = vrot.slane %v3711_v57, 3  ;;  %v3885_v49 = vrot.slane %v3711_v57, 4  ;;  %v3716_v10 = vrot.slane %v3714_v46, 4  ;;  %v5460_v57 = vld [vmem:[#allocation11 + $0x1b0] sm:$0xff]  }
 0x70e   : > { %v3507_v5 = vsel %vm3491_vm12, %v3483_v54, %v3499_v11  ;;  %v3886_v15 = vrot.slane %v3714_v46, 5 }
 0x70f   : > { %v3523_v48 = vrot.slane %v3513_v43, 4  ;;  %v3512_v51 = vpack.c.bf16 %v3507_v5, %v3506_v44  ;;  %v3717_v35 = vor.u32 %v3716_v10, %v3713_v62  ;;  %v5458_v43 = vld [vmem:[#allocation11 + $0x1a0] sm:$0xff]   ;;  %v5459_v5 = vld [vmem:[#allocation11 + $0x1a8] sm:$0xff]  }
 0x710   : > { %v3887_v2 = vor.u32 %v3886_v15, %v3885_v49  ;;  %v5466_v10 = vld [vmem:[#allocation11 + $0x220] sm:$0xff]  }
 0x711   : > { %3534 = vst [vmem:[#allocation2 + $0x20] sm:$0xf] %v3523_v48  ;;  %v3521_v59 = vrot.slane %v3512_v51, 4  ;;  %v6693_v60 = vld [vmem:[#allocation2] sm:$0xf0]  ;;  %v5462_v51 = vld [vmem:[#allocation11 + $0x200] sm:$0xff]  }
 0x712   : > { %v3535_v53 = vld [vmem:[#allocation2] sm:$0xf8]  ;;  %v3580_v47 = vrot.slane %v6693_v60, 4 }
 0x713   : > { %v3703_v1 = vshrl.u32 %v3535_v53, 16  ;;  %v3522_v3 = vsel %vm610_vm6, %v3519_v28, %v3521_v59  ;;  %v3524_v58 = vsel %vm610_vm6, %v3521_v59, %v3523_v48  ;;  %v3706_v0 = vshll.u32 %v3535_v53, 16  ;;  %v5456_v28 = vld [vmem:[#allocation11 + $0x190] sm:$0xff]   ;;  %v5461_v48 = vld [vmem:[#allocation11 + $0x1b8] sm:$0xff]  }
 0x714   : > { %v3582_v7 = vsel %vm610_vm6, %v3580_v47, %v3581_v56  ;;  %v3583_v9 = vrot.slane %v3522_v3, 4  ;;  %v3585_v61 = vrot.slane %v3524_v58, 4  ;;  %v3720_v8 = vshrl.u32 %v3522_v3, 16 }
 0x715   : > { %5033 = vmatprep.mubr.bf16.mxu1 %v3582_v7  ;;  %v3723_v13 = vshll.u32 %v3522_v3, 16  ;;  %v3729_v12 = vshrl.u32 %v3524_v58, 16  ;;  %v3705_v21 = vrot.slane %v3703_v1, 3  ;;  %v3732_v23 = vshll.u32 %v3524_v58, 16 }
 0x716   : > { %v3584_v18 = vsel %vm610_vm6, %v3581_v56, %v3583_v9  ;;  %v3586_v20 = vsel %vm610_vm6, %v3583_v9, %v3585_v61  ;;  %v3708_v37 = vrot.slane %v3706_v0, 4  ;;  %v3722_v27 = vrot.slane %v3720_v8, 3  ;;  %v5463_v56 = vld [vmem:[#allocation11 + $0x208] sm:$0xff]   ;;  %v5464_v0 = vld [vmem:[#allocation11 + $0x210] sm:$0xff]   ;;  %v5465_v9 = vld [vmem:[#allocation11 + $0x218] sm:$0xff]  }
 0x717   : > { %5034 = vmatmul.mubr.bf16.vlgmr.msra.gmra.mrb[16].mxu1 %v3584_v18  ;;  %v3725_v26 = vrot.slane %v3723_v13, 4  ;;  %v3731_v19 = vrot.slane %v3729_v12, 3  ;;  %v3734_v34 = vrot.slane %v3732_v23, 4  ;;  %v3889_v63 = vrot.slane %v3720_v8, 4  ;;  %v5468_v8 = vld [vmem:[#allocation11 + $0x230] sm:$0xff]  }
 0x718   : > { %5042 = vmatpush3.bf16.msra.mxu1 %v6670_v55  ;;  %5037 = vmatprep.mubr.bf16.mxu1 %v3586_v20  ;;  %v3539_v33 = vld [vmem:[#allocation2 + $0x20] sm:$0xf]  ;;  %v3890_v16 = vrot.slane %v3723_v13, 5  ;;  %v3709_v25 = vor.u32 %v3708_v37, %v3705_v21  ;;  %v3893_v40 = vrot.slane %v3729_v12, 4  ;;  %v3894_v54 = vrot.slane %v3732_v23, 5 }
 0x719   : > { %5043 = vmatprep.subr.bf16.mxu1 %v5455_v6  ;;  %v3726_v32 = vor.u32 %v3725_v26, %v3722_v27  ;;  %v3587_v29 = vrot.slane %v3539_v33, 4  ;;  %v3735_v22 = vor.u32 %v3734_v34, %v3731_v19  ;;  %v3738_v46 = vshrl.u32 %v3539_v33, 16  ;;  %v5469_v13 = vld [vmem:[#allocation11 + $0x238] sm:$0xff]  }
 0x71a   : > { %v3891_v30 = vor.u32 %v3890_v16, %v3889_v63  ;;  %v3718_v41 = vsel %vm798_vm7, %v3709_v25, %v3717_v35  ;;  %v6709_v11 = vor.u32 %v3894_v54, %v3893_v40  ;;  %v3741_v59 = vshll.u32 %v3539_v33, 16  ;;  %v3859_v12 = vld [vmem:[#allocation2 + $0x20] sm:$0x1f] }
 0x71b   : > { %v3727_v38 = vsel %vm798_vm7, %v3717_v35, %v3726_v32  ;;  %v3736_v55 = vsel %vm798_vm7, %v3726_v32, %v3735_v22  ;;  %v3588_v4 = vsel %vm610_vm6, %v3585_v61, %v3587_v29  ;;  %v3878_v53 = vshrl.u32 %v6693_v60, 16 }
 0x71c   : > { %5044 = vmatpush3.bf16.msra.mxu1 %v5455_v6  ;;  %v6705_v24 = vsel %vm978_vm8, %v3887_v2, %v3891_v30  ;;  %v3896_v44 = vsel %vm978_vm8, %v3891_v30, %v6709_v11  ;;  %v3881_v47 = vshll.u32 %v6693_v60, 16  ;;  %v3740_v1 = vrot.slane %v3738_v46, 3  ;;  %v5467_v6 = vld [vmem:[#allocation11 + $0x228] sm:$0xff]  }
 0x71d   : > { %5045 = vmatprep.subr.bf16.mxu1 %v5456_v28  ;;  %v3743_v62 = vrot.slane %v3741_v59, 4  ;;  %v3880_v3 = vrot.slane %v3878_v53, 4  ;;  %v3898_v15 = vshrl.u32 %v3859_v12, 16  ;;  %v3901_v18 = vshll.u32 %v3859_v12, 16 }
 0x71e   : > { %v3883_v58 = vrot.slane %v3881_v47, 5 }
 0x71f   : > { %5038 = vmatmul.mubr.bf16.gmra.mrb[20].mxu1 %v3588_v4  ;;  %v3744_v49 = vor.u32 %v3743_v62, %v3740_v1  ;;  %v3900_v20 = vrot.slane %v3898_v15, 4  ;;  %v3903_v21 = vrot.slane %v3901_v18, 5  ;;  %v4425_v4 = vld [vmem:[%s6945_s19 + $0x2] ss:$0 sm:$0xff] }
 0x720   : > { %5046 = vmatpush3.bf16.msra.mxu1 %v5456_v28  ;;  %5057 = vmatprep.mubr.bf16.mxu1 %v3718_v41  ;;  %v3884_v7 = vor.u32 %v3883_v58, %v3880_v3 }
 0x721   : > { %5047 = vmatprep.subr.bf16.mxu1 %v5457_v14  ;;  %v3745_v61 = vsel %vm798_vm7, %v3735_v22, %v3744_v49  ;;  %v3904_v23 = vor.u32 %v3903_v21, %v3900_v20 }
 0x722   : > { %v3888_v60 = vsel %vm978_vm8, %v3884_v7, %v3887_v2 }
 0x723   : > { %v3905_v37 = vsel %vm978_vm8, %v6709_v11, %v3904_v23 }
 0x724   : > { %5048 = vmatpush3.bf16.msra.mxu1 %v5457_v14 }
 0x725   : > { %5049 = vmatprep.subr.bf16.mxu1 %v5458_v43 }
 0x728   : > { %5050 = vmatpush3.bf16.msra.mxu1 %v5458_v43 }
 0x729   : > { %5051 = vmatprep.subr.bf16.mxu1 %v5459_v5 }
 0x72c   : > { %5052 = vmatpush3.bf16.msra.mxu1 %v5459_v5 }
 0x72d   : > { %5053 = vmatprep.subr.bf16.mxu1 %v5460_v57 }
 0x730   : > { %5054 = vmatpush3.bf16.msra.mxu1 %v5460_v57 }
 0x731   : > { %5055 = vmatprep.subr.bf16.mxu1 %v5461_v48 }
 0x734   : > { %5056 = vmatpush3.bf16.msra.mxu1 %v5461_v48 }
 0x735   : > { %5065 = vmatprep.subr.bf16.mxu1 %v5462_v51 }
 0x737   : > { %5058 = vmatmul.mubr.bf16.vlgmr.msra.gmra.mrb[24].mxu1 %v3727_v38 }
 0x738   : > { %5061 = vmatprep.mubr.bf16.mxu1 %v3736_v55  ;;  %5066 = vmatpush3.bf16.msra.mxu1 %v5462_v51 }
 0x739   : > { %5067 = vmatprep.subr.bf16.mxu1 %v5463_v56 }
 0x73c   : > { %5068 = vmatpush3.bf16.msra.mxu1 %v5463_v56 }
 0x73d   : > { %5069 = vmatprep.subr.bf16.mxu1 %v5464_v0 }
 0x73f   : > { %5062 = vmatmul.mubr.bf16.gmra.mrb[28].mxu1 %v3745_v61 }
 0x740   : > { %5070 = vmatpush3.bf16.msra.mxu1 %v5464_v0  ;;  %5081 = vmatprep.mubr.bf16.mxu1 %v3888_v60 }
 0x741   : > { %5071 = vmatprep.subr.bf16.mxu1 %v5465_v9 }
 0x744   : > { %5072 = vmatpush3.bf16.msra.mxu1 %v5465_v9 }
 0x745   : > { %5073 = vmatprep.subr.bf16.mxu1 %v5466_v10 }
 0x748   : > { %5074 = vmatpush3.bf16.msra.mxu1 %v5466_v10 }
 0x749   : > { %5075 = vmatprep.subr.bf16.mxu1 %v5467_v6 }
 0x74c   : > { %5076 = vmatpush3.bf16.msra.mxu1 %v5467_v6 }
 0x74d   : > { %5077 = vmatprep.subr.bf16.mxu1 %v5468_v8 }
 0x750   : > { %5078 = vmatpush3.bf16.msra.mxu1 %v5468_v8 }
 0x751   : > { %5079 = vmatprep.subr.bf16.mxu1 %v5469_v13 }
 0x754   : > { %5080 = vmatpush3.bf16.msra.mxu1 %v5469_v13 }
 0x757   : > { %5082 = vmatmul.mubr.bf16.vlgmr.msra.gmra.mrb[32].mxu1 %v6705_v24 }
 0x758   : > { %5085 = vmatprep.mubr.bf16.mxu1 %v3896_v44 }
 0x75f   : > { %5086 = vmatmul.mubr.bf16.gmra.mrb[36].mxu1 %v3905_v37 }
 0x7ea   : > { %v5035_v27 = vpop.f32.mrb[16].mxu1 }
 0x7eb   : > { %v3675_v26 = vpop.f32.mrb[17].mxu1 }
 0x7ec   : > { %v5036_v19 = vpop.f32.mrb[18].mxu1 }
 0x7ed   : > { %v3677_v33 = vpop.f32.mrb[19].mxu1 }
 0x7f2   : > { %v5039_v34 = vpop.f32.mrb[20].mxu1 }
 0x7f3   : > { %v3689_v63 = vpop.f32.mrb[21].mxu1 }
 0x7f4   : > { %v5040_v16 = vpop.f32.mrb[22].mxu1 }
 0x7f5   : > { %v3692_v28 = vpop.f32.mrb[23].mxu1 }
 0x80a   : > { %v5059_v35 = vpop.f32.mrb[24].mxu1 }
 0x80b   : > { %v3839_v32 = vadd.f32 %v5059_v35, %v5035_v27  ;;  %v3832_v29 = vpop.f32.mrb[25].mxu1 }
 0x80c   : > { %v5060_v22 = vpop.f32.mrb[26].mxu1 }
 0x80d   : > { %v3842_v2 = vadd.f32 %v5060_v22, %v5036_v19  ;;  %v3834_v30 = vpop.f32.mrb[27].mxu1 }
 0x812   : > { %v5063_v25 = vpop.f32.mrb[28].mxu1 }
 0x813   : > { %v3846_v38 = vpop.f32.mrb[29].mxu1 }
 0x814   : > { %v3847_v40 = vadd.f32 %v3846_v38, %v3689_v63  ;;  %v5064_v55 = vpop.f32.mrb[30].mxu1 }
 0x815   : > { %v3849_v24 = vpop.f32.mrb[31].mxu1 }
 0x816   : > { %v3850_v14 = vadd.f32 %v3849_v24, %v3692_v28 }
 0x82a   : > { %v5083_v54 = vpop.f32.mrb[32].mxu1 }
 0x82b   : > { %v4019_v41 = vadd.f32 %v5083_v54, %v3839_v32  ;;  %v3992_v11 = vpop.f32.mrb[33].mxu1 }
 0x82c   : > { %v5084_v43 = vpop.f32.mrb[34].mxu1 }
 0x82d   : > { %v4031_v44 = vadd.f32 %v4425_v4, %v4019_v41  ;;  %v4020_v5 = vadd.f32 %v5084_v43, %v3842_v2  ;;  %v3994_v57 = vpop.f32.mrb[35].mxu1 }
 0x82f   : > { %v4035_v48 = vsel %vm6250_vm9, %v4031_v44, 0.0  ;;  %v4032_v51 = vadd.f32 %v4425_v4, %v4020_v5 }
 0x830   : > { %v4039_v46 = vadd.f32 %v4035_v48, %v6590_v17 }
 0x831   : > { %v4036_v59 = vsel %vm6264_vm5, %v4032_v51, 0.0 }
 0x832   : > { %4043 = vst [vmem:[%s6730_s17] sm:$0xff] %v4039_v46  ;;  %v4040_v53 = vadd.f32 %v4036_v59, %v6599_v39  ;;  %v5087_v47 = vpop.f32.mrb[36].mxu1 }
 0x833   : > { %v4006_v31 = vpop.f32.mrb[37].mxu1 }
 0x834   : > { %4044 = vst [vmem:[%s6730_s17 + $0x8] sm:$0xff] %v4040_v53  ;;  %v4021_v56 = vadd.f32 %v4006_v31, %v3847_v40  ;;  %v5088_v1 = vpop.f32.mrb[38].mxu1 }
 0x835   : > { %v4009_v17 = vpop.f32.mrb[39].mxu1 }
 0x836   : > { %v4033_v62 = vadd.f32 %v4425_v4, %v4021_v56  ;;  %v4022_v36 = vadd.f32 %v4009_v17, %v3850_v14 }
 0x837   : > { %4054 = sbr.rel (!%p6947_p2) target bundleno = 2138 (0x85a), region = 72 }
 0x838   : > { %v4037_v3 = vsel %vm6283_vm4, %v4033_v62, 0.0  ;;  %v4034_v58 = vadd.f32 %v4425_v4, %v4022_v36 }
 0x839   : > { %v4041_v0 = vadd.f32 %v4037_v3, %v6615_v50 }
 0x83a   : > { %v4038_v49 = vsel %vm6292_vm1, %v4034_v58, 0.0 }
 0x83b   : > { %4045 = vst [vmem:[%s6730_s17 + $0x10] sm:$0xff] %v4041_v0  ;;  %v4042_v39 = vadd.f32 %v4038_v49, %v6624_v52 }
 0x83d   : > { %4046 = vst [vmem:[%s6730_s17 + $0x18] sm:$0xff] %v4042_v39 }
 0x83e   : > { %s6994_s22 = smov (!%p4057_p5, %s4056_s22), 4 }
 0x83f   : > { %s6747_s30 = sshll.u32 %s6994_s22, 7 }
 0x840   : > { %s4061_s27 = ssub.s32 512, %s6747_s30 }
 0x841   : > { %4062 = vsyncadd %s4048_s24, %s4061_s27  ;;  %s6949_s6 = sld [smem:[#allocation23_spill]]  ;;  %p4429_p6 = scmp.ne.s32.totalorder %s6747_s30, 0 }
 0x842   : > { %s4069_s23 = sshll.u32 %s6730_s17, 4  ;;  %s6950_s16 = sld [smem:[#allocation37_spill]]  ;;  %s6755_s23 = int_to_ptr.vmem [resolvable:$true] %s4069_s23 }
 0x843   : > { %s5610_s18 = scalar_lea.vmem %s6755_s23, %s6747_s30  ;;  %s5786_s25 = smov [#allocation12]  }
 0x844   : > { %p5611_p12 = scmp.ne.s32.totalorder %s6755_s23, %s5610_s18  ;;  %s5614_s22 = sshll.u32 %s5786_s25, 4  ;;  %s5615_s22 = int_to_ptr.vmem [resolvable:$false] %s5614_s22 }
 0x845   : > { %s5616_s17 = scalar_lea.vmem %s5615_s22, 1024  ;;  %p5617_p1 = scmp.lt.s32.totalorder %s6755_s23, %s5615_s22 }
 0x846   : > { %p5612_p13 = pnand %p5611_p12, %p4429_p6  ;;  %p5618_p11 = scmp.lt.s32.totalorder %s5616_s17, %s5610_s18 }
 0x847   : > { %s5172_s21 = smul.u32 9, %s6949_s6 }
 0x848   : > { %p5613_p9 = pneg %p5612_p13  ;;  %p5619_p10 = por %p5618_p11, %p5617_p1 }
 0x849   : > { %s4065_s11 = sadd.s32 %s5172_s21, %s4427_s10 }
 0x84a   : > { %s4430_s8 = sshll.u32 %s4065_s11, 7  ;;  %p5620_p0 = pnand %p5619_p10, %p5613_p9 }
 0x84b   : > { %s6760_s20 = scalar_lea.hbm %s6950_s16, %s4430_s8 }
 0x84c   : > { %5623 = shalt.err (!%p5620_p0)
}
 0x84d   : > { %s5624_s10 = scalar_lea.hbm %s6760_s20, %s6747_s30  ;;  %s5628_s21 = scalar_lea.hbm %s6950_s16, 2304 }
 0x84e   : > { %p5625_p8 = scmp.ne.s32.totalorder %s6760_s20, %s5624_s10  ;;  %p5629_p3 = scmp.lt.u32.totalorder %s6760_s20, %s6950_s16 }
 0x84f   : > { %p5630_p2 = scmp.lt.u32.totalorder %s5628_s21, %s5624_s10  ;;  %p5632_p12 = scmp.lt.u32.totalorder %s5624_s10, %s6760_s20 }
 0x850   : > { %p5626_p4 = pnand %p5625_p8, %p4429_p6 }
 0x851   : > { %p5631_p5 = por %p5630_p2, %p5629_p3 }
 0x852   : > { %p5627_p7 = pneg %p5626_p4 }
 0x853   : > { %p5633_p13 = por %p5632_p12, %p5631_p5 }
 0x855   : > { %p5634_p9 = pnand %p5633_p13, %p5627_p7 }
 0x857   : > { %5637 = shalt.err (!%p5634_p9)
}
 0x858   : > { %s5787_s28 = smov 128   ;;  %s5788_s15 = smov 8  }
 0x859   : > { %4075 = dma.vmem_to_hbm [thread:$0]  (%p4429_p6), %s6755_s23, %s6747_s30, %s6760_s20, %s4048_s24, %s5787_s28, %s5787_s28, %s5788_s15  }
 0x85a PF: > { %s6951_s18 = sld [smem:[#allocation20_spill]]  ;;  %p5200_p1 = scmp.ge.s32.totalorder %s5770_s14, 2 }
 0x85b   : > { %s6952_s25 = sld [smem:[#allocation33_spill]] }
 0x860   : > { %s4084_s22 = sand.u32 1, %s6951_s18  }
 0x861   : > { %p6953_p11 = scmp.ne.s32.totalorder %s6952_s25, 0  ;;  %s4085_s17 = scalar_lea.sflag [#allocation5], %s4084_s22 }
 0x863   : > { %p5193_p10 = pnand %p5200_p1, %p6953_p11 }
 0x865   : > { %5711 = dma.done.wait (!%p5193_p10), %s4085_s17, 512  }
 0x866   : > { %5713 = vsyncadd (!%p5193_p10), %s4085_s17, 4294966784  ;;  %s27_s14 = sadd.s32 1, %s5770_s14   ;;  %s6955_s24 = sld [smem:[#allocation18_spill]] }
 0x867   : > { %p6793_p0 = scmp.ge.s32.totalorder %s27_s14, 8   ;;  %s6956_s7 = sld [smem:[#allocation34_spill]] }
 0x868   : > { %s6957_s27 = sld [smem:[#allocation19_spill]]  ;;  %s6958_s30 = sld [smem:[#allocation30_spill]] }
 0x869   : > { %s6959_s23 = sld [smem:[#allocation21_spill]]  ;;  %s6960_s20 = sld [smem:[#allocation28_spill]] }
 0x86a   : > { %s6961_s6 = sld [smem:[#allocation25_spill]]  ;;  %s6962_s21 = sld [smem:[#allocation26_spill]] }
 0x86b   : > { %s6964_s25 = smov %s5726_s26  ;;  %s6966_s28 = smov %s5738_s29 }
 0x86c   : > { %s6969_s8 = smov %s5750_s9  ;;  %s6971_s10 = smov %s5762_s12 }
 0x86d   : > { %s6965_s26 = smov %s6956_s7  ;;  %s6972_s11 = smov %s5766_s13 }
 0x86e   : > { %s6967_s29 = smov %s6958_s30  ;;  %26 = sbr.rel (!%p6793_p0) target bundleno = 17 (0x11), region = 145 }
 0x86f   : > { %s6968_s30 = smov %s6959_s23  ;;  %s6970_s9 = smov %s6960_s20 }
 0x870   : > { %s6973_s12 = smov %s6961_s6  ;;  %s6974_s13 = smov %s6962_s21 }
 0x875   :  { %4090 = vsyncpa [#allocation4], 1 }
 0x876   :  { %4092 = vsyncpa [#allocation4 + $0x1], 1 }
 0x877   :  { %4093 = vsyncpa [#allocation7], 1 }
 0x878   :  { %4095 = vsyncpa [#allocation7 + $0x1], 1 }
 0x879   :  { %4096 = vsyncpa [#allocation10], 1 }
 0x87a   :  { %4097 = vsyncpa [#allocation5], 1 }
 0x87b   :  { %4099 = vsyncpa [#allocation5 + $0x1], 1 }

</bundles_post_ra>
